<compile_context>
chip_gen: v6e
topology: v6e:2x2x1
jax: 0.10.0
libtpu: 0.0.40
codegen_flags: <defaults>
</compile_context>

<pallas_src>
import functools
import math

import jax
import jax.numpy as jnp
from jax.experimental import pallas as pl
from jax.experimental.pallas import tpu as pltpu


def _adapt_kernel(x_ref,
                  w_in_ref, b_in_ref,
                  w_qkv_ref, b_qkv_ref,
                  w_ao_ref, b_ao_ref,
                  ln_g_ref, ln_b_ref,
                  w_op_ref, b_op_ref,
                  o_ref,
                  *, n_heads, head_dim, seq_len, batch_tile, n_layers,
                  ln_eps, matmul_dtype):
    """One grid step == one tile of TB batch elements, (batch, seq) flattened.

    x_ref    : (TB*S, Din+1)   features with the time stamp as the last column
    w_in_ref : (Din+1, H)      [input_projection.weight^T ; time_embedding.weight^T]
    b_in_ref : (1, H)          input bias + time bias
    w_qkv_ref: (L, H, 3H)      packed in_proj weights, transposed, Q cols scaled
    b_qkv_ref: (L, 1, 3H)
    w_ao_ref : (L, H, H)       attention out_proj.weight^T
    b_ao_ref : (L, 1, H)
    ln_*_ref : (1, H)          shared LayerNorm gamma / beta
    w_op_ref : (Din, H)        output_projection.weight (torch layout, A.B^T)
    b_op_ref : (Din, 1)
    o_ref    : (1, Din, TB*S)  lane-dense transposed output slab
    """
    f32 = jnp.float32
    cdt = matmul_dtype
    TB, S, hd, nH = batch_tile, seq_len, head_dim, n_heads
    N = TB * S
    H = nH * hd

    def mm(a, b):  # MXU matmul, f32 accumulation
        return jnp.dot(a.astype(cdt), b.astype(cdt), preferred_element_type=f32)

    # ---- input projection (time embedding folded in as an extra K column) --
    h = mm(x_ref[...], w_in_ref[...]) + b_in_ref[...]            # (N, H) f32

    for layer in range(n_layers):                 # static unroll (L == 2)
        w_qkv = w_qkv_ref[layer]                  # (H, 3H)
        b_qkv = b_qkv_ref[layer]                  # (1, 3H)
        w_ao = w_ao_ref[layer]                    # (H, H)
        b_ao = b_ao_ref[layer]                    # (1, H)

        # one lane-dense packed QKV projection
        qkv = mm(h, w_qkv) + b_qkv                # (N, 3H)

        # per-(batch, head) S x S attention -- only the real pairs, no mask,
        # no (N,N) scores; statically unrolled over nH heads.
        o_heads = []
        for i in range(nH):
            lo = i * hd
            q_i = qkv[:, lo:lo + hd].reshape(TB, S, hd)
            k_i = qkv[:, H + lo:H + lo + hd].reshape(TB, S, hd)
            v_i = qkv[:, 2 * H + lo:2 * H + lo + hd].reshape(TB, S, hd)

            s = jnp.einsum("bqd,bkd->bqk", q_i.astype(cdt), k_i.astype(cdt),
                           preferred_element_type=f32)           # (TB, S, S)
            m = jnp.max(s, axis=-1, keepdims=True)
            p = jnp.exp(s - m)                                   # f32 on EUP
            denom = jnp.sum(p, axis=-1, keepdims=True)
            o_i = jnp.einsum("bqk,bkd->bqd", p.astype(cdt), v_i.astype(cdt),
                             preferred_element_type=f32)         # (TB, S, hd)
            # deferred softmax normalization on the hd-wide PV result
            o_i = o_i * pl.reciprocal(denom, approx=True)
            o_heads.append(o_i.reshape(N, hd))

        # fused head-concat + out-projection: single (N,H) @ (H,H) MXU matmul
        attended = mm(jnp.concatenate(o_heads, axis=-1), w_ao) + b_ao

        # residual + (shared) LayerNorm, all f32 on the VPU
        y = h + attended
        mu = jnp.mean(y, axis=-1, keepdims=True)
        d = y - mu
        var = jnp.mean(d * d, axis=-1, keepdims=True)
        h = d * jax.lax.rsqrt(var + ln_eps) * ln_g_ref[...] + ln_b_ref[...]

    # ---- output projection, emitted lane-dense as (Din, N) = Wop . h^T -----
    out_t = jnp.einsum("dh,nh->dn", w_op_ref[...].astype(cdt), h.astype(cdt),
                       preferred_element_type=f32) + b_op_ref[...]
    o_ref[...] = out_t[None].astype(o_ref.dtype)


def adapt_anomaly_detector_forward(x, time_stamps, params, *, n_heads,
                                   batch_tile=8, ln_eps=1e-5,
                                   matmul_dtype=jnp.float32,
                                   single_buffer_weights=False):
    """x: (B, S, input_dim) f32, time_stamps: (B, S) f32.
    params follow torch layouts (see __main__).
    matmul_dtype=jnp.bfloat16 is the recommended setting on v6e/v7x.
    single_buffer_weights=True single-buffers the resident weights (v7x /
    production-H VMEM budgeting)."""
    B, S, Din = x.shape
    H = params["w_input"].shape[0]
    assert H % n_heads == 0
    hd = H // n_heads
    L = params["attn_in_w"].shape[0]
    TB = min(batch_tile, B)
    assert B % TB == 0, "batch must be divisible by the batch tile"

    scale = 1.0 / math.sqrt(hd)

    # ----- one-time host-side weight preprocessing --------------------------
    # time embedding folded into the input projection (extra K row / column)
    w_in_aug = jnp.concatenate(
        [params["w_input"].T, params["w_time"].reshape(1, H)], axis=0)  # (Din+1,H)
    b_in_aug = (params["b_input"] + params["b_time"]).reshape(1, H)

    # packed per-layer QKV weights, transposed; 1/sqrt(hd) folded into Q cols
    w_qkv = jnp.transpose(params["attn_in_w"], (0, 2, 1))               # (L,H,3H)
    w_qkv = w_qkv.at[:, :, :H].multiply(scale)
    b_qkv = params["attn_in_b"].reshape(L, 1, 3 * H)
    b_qkv = b_qkv.at[:, :, :H].multiply(scale)

    w_ao = jnp.transpose(params["attn_out_w"], (0, 2, 1))               # (L,H,H)
    b_ao = params["attn_out_b"].reshape(L, 1, H)

    ln_g = params["ln_g"].reshape(1, H)
    ln_b = params["ln_b"].reshape(1, H)

    w_op = params["w_output"]                                           # (Din,H)
    b_op = params["b_output"].reshape(Din, 1)

    # flatten (batch, seq) and append the time stamp as an extra feature col
    x_aug = jnp.concatenate(
        [x.reshape(B * S, Din), time_stamps.reshape(B * S, 1).astype(x.dtype)],
        axis=-1)                                                        # (B*S,Din+1)

    kernel = functools.partial(
        _adapt_kernel, n_heads=n_heads, head_dim=hd, seq_len=S,
        batch_tile=TB, n_layers=L, ln_eps=ln_eps, matmul_dtype=matmul_dtype)

    def wspec(shape):
        zero = (0,) * len(shape)
        idx = lambda b, _z=zero: _z
        if single_buffer_weights:
            # constant-index weights: single-buffer to halve resident VMEM
            return pl.BlockSpec(shape, idx, pipeline_mode=pl.Buffered(1))
        return pl.BlockSpec(shape, idx)

    in_specs = [
        pl.BlockSpec((TB * S, Din + 1), lambda b: (b, 0)),   # x (+time column)
        wspec((Din + 1, H)),                                 # w_in_aug
        wspec((1, H)),                                       # b_in_aug
        wspec((L, H, 3 * H)),                                # packed qkv weights
        wspec((L, 1, 3 * H)),                                # packed qkv biases
        wspec((L, H, H)),                                    # attn out_proj w^T
        wspec((L, 1, H)),                                    # attn out_proj b
        wspec((1, H)),                                       # ln gamma
        wspec((1, H)),                                       # ln beta
        wspec((Din, H)),                                     # output proj w
        wspec((Din, 1)),                                     # output proj b
    ]
    # lane-dense transposed output slab: (grid, Din, TB*S)
    out_specs = pl.BlockSpec((1, Din, TB * S), lambda b: (b, 0, 0))

    out_t = pl.pallas_call(
        kernel,
        out_shape=jax.ShapeDtypeStruct((B // TB, Din, TB * S), x.dtype),
        grid_spec=pltpu.PrefetchScalarGridSpec(
            num_scalar_prefetch=0,
            grid=(B // TB,),
            in_specs=in_specs,
            out_specs=out_specs,
        ),
        compiler_params=pltpu.CompilerParams(
            dimension_semantics=("parallel",),
            vmem_limit_bytes=32 * 1024 * 1024,   # stays within v7x's 64 MiB
        ),
    )(x_aug, w_in_aug, b_in_aug, w_qkv, b_qkv, w_ao, b_ao, ln_g, ln_b,
      w_op, b_op)

    # (B//TB, Din, TB*S) -> (B, S, Din): free layout plumbing in the wrapper
    return jnp.transpose(out_t, (0, 2, 1)).reshape(B, S, Din)


# --------------------------- pure-JAX reference -----------------------------
def _reference_forward(x, time_stamps, params, *, n_heads, ln_eps=1e-5):
    B, S, Din = x.shape
    H = params["w_input"].shape[0]
    hd = H // n_heads
    L = params["attn_in_w"].shape[0]

    h = jnp.einsum("bsi,hi->bsh", x, params["w_input"]) + params["b_input"]
    h = h + time_stamps[..., None] * params["w_time"][:, 0] + params["b_time"]

    for l in range(L):
        qkv = (jnp.einsum("bsd,ed->bse", h, params["attn_in_w"][l])
               + params["attn_in_b"][l])
        q, k, v = jnp.split(qkv, 3, axis=-1)

        def heads(z):
            return z.reshape(B, S, n_heads, hd).transpose(0, 2, 1, 3)

        q, k, v = heads(q), heads(k), heads(v)
        s = jnp.einsum("bhqd,bhkd->bhqk", q / math.sqrt(hd), k)
        p = jax.nn.softmax(s, axis=-1)
        o = jnp.einsum("bhqk,bhkd->bhqd", p, v)
        o = o.transpose(0, 2, 1, 3).reshape(B, S, H)
        attended = (jnp.einsum("bsd,ed->bse", o, params["attn_out_w"][l])
                    + params["attn_out_b"][l])

        y = h + attended
        mu = y.mean(-1, keepdims=True)
        var = ((y - mu) ** 2).mean(-1, keepdims=True)
        h = (y - mu) / jnp.sqrt(var + ln_eps) * params["ln_g"] + params["ln_b"]

    return jnp.einsum("bsh,ih->bsi", h, params["w_output"]) + params["b_output"]


if __name__ == "__main__":
    B, S, Din = 32, 8, 16           # batch, sequence length, input_dim
    H, n_heads, L = 64, 4, 2        # hidden_dim, n_heads, n_layers (defaults)

    key = jax.random.PRNGKey(0)
    ks = jax.random.split(key, 16)

    def unif(k, shape, bound):
        return jax.random.uniform(k, shape, jnp.float32, -bound, bound)

    x = jax.random.normal(ks[0], (B, S, Din), jnp.float32)
    time_stamps = jax.random.uniform(ks[1], (B, S), jnp.float32)

    bi, bh = 1.0 / math.sqrt(Din), 1.0 / math.sqrt(H)
    params = {
        "w_input": unif(ks[2], (H, Din), bi),         # input_projection
        "b_input": unif(ks[3], (H,), bi),
        "w_time": unif(ks[4], (H, 1), 1.0),           # time_embedding
        "b_time": unif(ks[5], (H,), 1.0),
        "attn_in_w": unif(ks[6], (L, 3 * H, H), bh),  # MHA in_proj (per layer)
        "attn_in_b": unif(ks[7], (L, 3 * H), bh),
        "attn_out_w": unif(ks[8], (L, H, H), bh),     # MHA out_proj (per layer)
        "attn_out_b": unif(ks[9], (L, H), bh),
        "ln_g": 1.0 + 0.1 * jax.random.normal(ks[10], (H,), jnp.float32),
        "ln_b": 0.1 * jax.random.normal(ks[11], (H,), jnp.float32),
        "w_output": unif(ks[12], (Din, H), bh),       # output_projection
        "b_output": unif(ks[13], (Din,), bh),
    }

    ref = _reference_forward(x, time_stamps, params, n_heads=n_heads)

    # f32 path (numerical parity with the f32 PyTorch module)
    out = adapt_anomaly_detector_forward(x, time_stamps, params,
                                         n_heads=n_heads, batch_tile=8)
    out = jax.block_until_ready(out)
    assert out.shape == (B, S, Din)
    # approx EUP reciprocal in the softmax introduces a small relative error
    assert jnp.allclose(out, ref, atol=5e-3, rtol=5e-3), (
        float(jnp.max(jnp.abs(out - ref))))

    # v6e/v7x path: bf16 matmul operands, f32 softmax/LayerNorm (loose check)
    out_bf16 = adapt_anomaly_detector_forward(x, time_stamps, params,
                                              n_heads=n_heads, batch_tile=8,
                                              matmul_dtype=jnp.bfloat16)
    out_bf16 = jax.block_until_ready(out_bf16)
    assert jnp.allclose(out_bf16, ref, atol=1e-1, rtol=1e-1), (
        float(jnp.max(jnp.abs(out_bf16 - ref))))

    print("KERNEL_OK")
</pallas_src>

<mosaic_0001>
module attributes {stable_mosaic.version = 11 : i64} {
  func.func @_adapt_kernel(%arg0: i32, %arg1: memref<64x17xf32, #tpu.memory_space<vmem>>, %arg2: memref<17x64xf32, #tpu.memory_space<vmem>>, %arg3: memref<1x64xf32, #tpu.memory_space<vmem>>, %arg4: memref<2x64x192xf32, #tpu.memory_space<vmem>>, %arg5: memref<2x1x192xf32, #tpu.memory_space<vmem>>, %arg6: memref<2x64x64xf32, #tpu.memory_space<vmem>>, %arg7: memref<2x1x64xf32, #tpu.memory_space<vmem>>, %arg8: memref<1x64xf32, #tpu.memory_space<vmem>>, %arg9: memref<1x64xf32, #tpu.memory_space<vmem>>, %arg10: memref<16x64xf32, #tpu.memory_space<vmem>>, %arg11: memref<16x1xf32, #tpu.memory_space<vmem>>, %arg12: memref<1x16x64xf32, #tpu.memory_space<vmem>>) attributes {dimension_semantics = [#tpu.dimension_semantics<parallel>], iteration_bounds = array<i64: 4>, scalar_prefetch = 0 : i64, scratch_operands = 0 : i64, tpu.core_type = #tpu.core_type<tc>, window_params = [{transform_indices = @transform_0, window_bounds = array<i64: 64, 17>}, {pipeline_mode = #tpu.pipeline_mode<synchronous>, transform_indices = @transform_1, window_bounds = array<i64: 17, 64>}, {pipeline_mode = #tpu.pipeline_mode<synchronous>, transform_indices = @transform_2, window_bounds = array<i64: 1, 64>}, {pipeline_mode = #tpu.pipeline_mode<synchronous>, transform_indices = @transform_3, window_bounds = array<i64: 2, 64, 192>}, {pipeline_mode = #tpu.pipeline_mode<synchronous>, transform_indices = @transform_4, window_bounds = array<i64: 2, 1, 192>}, {pipeline_mode = #tpu.pipeline_mode<synchronous>, transform_indices = @transform_5, window_bounds = array<i64: 2, 64, 64>}, {pipeline_mode = #tpu.pipeline_mode<synchronous>, transform_indices = @transform_6, window_bounds = array<i64: 2, 1, 64>}, {pipeline_mode = #tpu.pipeline_mode<synchronous>, transform_indices = @transform_7, window_bounds = array<i64: 1, 64>}, {pipeline_mode = #tpu.pipeline_mode<synchronous>, transform_indices = @transform_8, window_bounds = array<i64: 1, 64>}, {pipeline_mode = #tpu.pipeline_mode<synchronous>, transform_indices = @transform_9, window_bounds = array<i64: 16, 64>}, {pipeline_mode = #tpu.pipeline_mode<synchronous>, transform_indices = @transform_10, window_bounds = array<i64: 16, 1>}, {transform_indices = @transform_11, window_bounds = array<i64: 1, 16, 64>}]} {
    %c0 = arith.constant 0 : index
    %c0_0 = arith.constant 0 : index
    %0 = vector.load %arg1[%c0, %c0_0] : memref<64x17xf32, #tpu.memory_space<vmem>>, vector<64x17xf32>
    %c0_1 = arith.constant 0 : index
    %c0_2 = arith.constant 0 : index
    %1 = vector.load %arg2[%c0_1, %c0_2] : memref<17x64xf32, #tpu.memory_space<vmem>>, vector<17x64xf32>
    %cst = arith.constant dense<0.000000e+00> : vector<64x64xf32>
    %2 = tpu.matmul %0, %1, %cst {dimension_numbers = #tpu.dot_dimension_numbers<[1], [0], [0], [1], [0, 0, 1, 1], [], []>} : vector<64x17xf32>, vector<17x64xf32>, vector<64x64xf32> -> vector<64x64xf32>
    %c0_3 = arith.constant 0 : index
    %c0_4 = arith.constant 0 : index
    %3 = vector.load %arg3[%c0_3, %c0_4] : memref<1x64xf32, #tpu.memory_space<vmem>>, vector<1x64xf32>
    %4 = vector.broadcast %3 : vector<1x64xf32> to vector<64x64xf32>
    %5 = arith.addf %2, %4 : vector<64x64xf32>
    %c0_5 = arith.constant 0 : index
    %c0_6 = arith.constant 0 : index
    %c0_7 = arith.constant 0 : index
    %6 = vector.load %arg4[%c0_5, %c0_6, %c0_7] : memref<2x64x192xf32, #tpu.memory_space<vmem>>, vector<1x64x192xf32>
    %7 = vector.shape_cast %6 : vector<1x64x192xf32> to vector<64x192xf32>
    %c0_8 = arith.constant 0 : index
    %c0_9 = arith.constant 0 : index
    %c0_10 = arith.constant 0 : index
    %8 = vector.load %arg5[%c0_8, %c0_9, %c0_10] : memref<2x1x192xf32, #tpu.memory_space<vmem>>, vector<1x1x192xf32>
    %9 = vector.shape_cast %8 : vector<1x1x192xf32> to vector<1x192xf32>
    %c0_11 = arith.constant 0 : index
    %c0_12 = arith.constant 0 : index
    %c0_13 = arith.constant 0 : index
    %10 = vector.load %arg6[%c0_11, %c0_12, %c0_13] : memref<2x64x64xf32, #tpu.memory_space<vmem>>, vector<1x64x64xf32>
    %11 = vector.shape_cast %10 : vector<1x64x64xf32> to vector<64x64xf32>
    %c0_14 = arith.constant 0 : index
    %c0_15 = arith.constant 0 : index
    %c0_16 = arith.constant 0 : index
    %12 = vector.load %arg7[%c0_14, %c0_15, %c0_16] : memref<2x1x64xf32, #tpu.memory_space<vmem>>, vector<1x1x64xf32>
    %13 = vector.shape_cast %12 : vector<1x1x64xf32> to vector<1x64xf32>
    %cst_17 = arith.constant dense<0.000000e+00> : vector<64x192xf32>
    %14 = tpu.matmul %5, %7, %cst_17 {dimension_numbers = #tpu.dot_dimension_numbers<[1], [0], [0], [1], [0, 0, 1, 1], [], []>} : vector<64x64xf32>, vector<64x192xf32>, vector<64x192xf32> -> vector<64x192xf32>
    %15 = vector.broadcast %9 : vector<1x192xf32> to vector<64x192xf32>
    %16 = arith.addf %14, %15 : vector<64x192xf32>
    %17 = vector.extract_strided_slice %16 {offsets = [0, 0], sizes = [64, 16], strides = [1, 1]} : vector<64x192xf32> to vector<64x16xf32>
    %18 = vector.shape_cast %17 : vector<64x16xf32> to vector<8x8x16xf32>
    %19 = vector.extract_strided_slice %16 {offsets = [0, 64], sizes = [64, 16], strides = [1, 1]} : vector<64x192xf32> to vector<64x16xf32>
    %20 = vector.shape_cast %19 : vector<64x16xf32> to vector<8x8x16xf32>
    %21 = vector.extract_strided_slice %16 {offsets = [0, 128], sizes = [64, 16], strides = [1, 1]} : vector<64x192xf32> to vector<64x16xf32>
    %22 = vector.shape_cast %21 : vector<64x16xf32> to vector<8x8x16xf32>
    "tpu.trace_start"() <{level = 10 : i32, message = "bqd,bkd->bqk"}> : () -> ()
    %cst_18 = arith.constant dense<0.000000e+00> : vector<8x8x8xf32>
    %23 = tpu.matmul %18, %20, %cst_18 {dimension_numbers = #tpu.dot_dimension_numbers<[2], [2], [1], [1], [0, 0, 0, 1, 1, 1], [0], [0]>} : vector<8x8x16xf32>, vector<8x8x16xf32>, vector<8x8x8xf32> -> vector<8x8x8xf32>
    "tpu.trace_stop"() : () -> ()
    %cst_19 = arith.constant dense<0xFF800000> : vector<8x8xf32>
    %24 = vector.multi_reduction <maximumf>, %23, %cst_19 [2] : vector<8x8x8xf32> to vector<8x8xf32>
    %25 = vector.shape_cast %24 : vector<8x8xf32> to vector<8x8x1xf32>
    %26 = vector.broadcast %25 : vector<8x8x1xf32> to vector<8x8x8xf32>
    %27 = arith.subf %23, %26 : vector<8x8x8xf32>
    %28 = math.exp %27 : vector<8x8x8xf32>
    %cst_20 = arith.constant dense<0.000000e+00> : vector<8x8xf32>
    %29 = vector.multi_reduction <add>, %28, %cst_20 [2] : vector<8x8x8xf32> to vector<8x8xf32>
    %30 = vector.shape_cast %29 : vector<8x8xf32> to vector<8x8x1xf32>
    "tpu.trace_start"() <{level = 10 : i32, message = "bqk,bkd->bqd"}> : () -> ()
    %cst_21 = arith.constant dense<0.000000e+00> : vector<8x8x16xf32>
    %31 = tpu.matmul %28, %22, %cst_21 {dimension_numbers = #tpu.dot_dimension_numbers<[2], [1], [1], [2], [0, 0, 0, 1, 1, 2], [0], [0]>} : vector<8x8x8xf32>, vector<8x8x16xf32>, vector<8x8x16xf32> -> vector<8x8x16xf32>
    "tpu.trace_stop"() : () -> ()
    %32 = tpu.reciprocal %30 {approx = true} : vector<8x8x1xf32> -> vector<8x8x1xf32>
    %33 = vector.broadcast %32 : vector<8x8x1xf32> to vector<8x8x16xf32>
    %34 = arith.mulf %31, %33 : vector<8x8x16xf32>
    %35 = vector.shape_cast %34 : vector<8x8x16xf32> to vector<64x16xf32>
    %36 = vector.extract_strided_slice %16 {offsets = [0, 16], sizes = [64, 16], strides = [1, 1]} : vector<64x192xf32> to vector<64x16xf32>
    %37 = vector.shape_cast %36 : vector<64x16xf32> to vector<8x8x16xf32>
    %38 = vector.extract_strided_slice %16 {offsets = [0, 80], sizes = [64, 16], strides = [1, 1]} : vector<64x192xf32> to vector<64x16xf32>
    %39 = vector.shape_cast %38 : vector<64x16xf32> to vector<8x8x16xf32>
    %40 = vector.extract_strided_slice %16 {offsets = [0, 144], sizes = [64, 16], strides = [1, 1]} : vector<64x192xf32> to vector<64x16xf32>
    %41 = vector.shape_cast %40 : vector<64x16xf32> to vector<8x8x16xf32>
    "tpu.trace_start"() <{level = 10 : i32, message = "bqd,bkd->bqk"}> : () -> ()
    %cst_22 = arith.constant dense<0.000000e+00> : vector<8x8x8xf32>
    %42 = tpu.matmul %37, %39, %cst_22 {dimension_numbers = #tpu.dot_dimension_numbers<[2], [2], [1], [1], [0, 0, 0, 1, 1, 1], [0], [0]>} : vector<8x8x16xf32>, vector<8x8x16xf32>, vector<8x8x8xf32> -> vector<8x8x8xf32>
    "tpu.trace_stop"() : () -> ()
    %cst_23 = arith.constant dense<0xFF800000> : vector<8x8xf32>
    %43 = vector.multi_reduction <maximumf>, %42, %cst_23 [2] : vector<8x8x8xf32> to vector<8x8xf32>
    %44 = vector.shape_cast %43 : vector<8x8xf32> to vector<8x8x1xf32>
    %45 = vector.broadcast %44 : vector<8x8x1xf32> to vector<8x8x8xf32>
    %46 = arith.subf %42, %45 : vector<8x8x8xf32>
    %47 = math.exp %46 : vector<8x8x8xf32>
    %cst_24 = arith.constant dense<0.000000e+00> : vector<8x8xf32>
    %48 = vector.multi_reduction <add>, %47, %cst_24 [2] : vector<8x8x8xf32> to vector<8x8xf32>
    %49 = vector.shape_cast %48 : vector<8x8xf32> to vector<8x8x1xf32>
    "tpu.trace_start"() <{level = 10 : i32, message = "bqk,bkd->bqd"}> : () -> ()
    %cst_25 = arith.constant dense<0.000000e+00> : vector<8x8x16xf32>
    %50 = tpu.matmul %47, %41, %cst_25 {dimension_numbers = #tpu.dot_dimension_numbers<[2], [1], [1], [2], [0, 0, 0, 1, 1, 2], [0], [0]>} : vector<8x8x8xf32>, vector<8x8x16xf32>, vector<8x8x16xf32> -> vector<8x8x16xf32>
    "tpu.trace_stop"() : () -> ()
    %51 = tpu.reciprocal %49 {approx = true} : vector<8x8x1xf32> -> vector<8x8x1xf32>
    %52 = vector.broadcast %51 : vector<8x8x1xf32> to vector<8x8x16xf32>
    %53 = arith.mulf %50, %52 : vector<8x8x16xf32>
    %54 = vector.shape_cast %53 : vector<8x8x16xf32> to vector<64x16xf32>
    %55 = vector.extract_strided_slice %16 {offsets = [0, 32], sizes = [64, 16], strides = [1, 1]} : vector<64x192xf32> to vector<64x16xf32>
    %56 = vector.shape_cast %55 : vector<64x16xf32> to vector<8x8x16xf32>
    %57 = vector.extract_strided_slice %16 {offsets = [0, 96], sizes = [64, 16], strides = [1, 1]} : vector<64x192xf32> to vector<64x16xf32>
    %58 = vector.shape_cast %57 : vector<64x16xf32> to vector<8x8x16xf32>
    %59 = vector.extract_strided_slice %16 {offsets = [0, 160], sizes = [64, 16], strides = [1, 1]} : vector<64x192xf32> to vector<64x16xf32>
    %60 = vector.shape_cast %59 : vector<64x16xf32> to vector<8x8x16xf32>
    "tpu.trace_start"() <{level = 10 : i32, message = "bqd,bkd->bqk"}> : () -> ()
    %cst_26 = arith.constant dense<0.000000e+00> : vector<8x8x8xf32>
    %61 = tpu.matmul %56, %58, %cst_26 {dimension_numbers = #tpu.dot_dimension_numbers<[2], [2], [1], [1], [0, 0, 0, 1, 1, 1], [0], [0]>} : vector<8x8x16xf32>, vector<8x8x16xf32>, vector<8x8x8xf32> -> vector<8x8x8xf32>
    "tpu.trace_stop"() : () -> ()
    %cst_27 = arith.constant dense<0xFF800000> : vector<8x8xf32>
    %62 = vector.multi_reduction <maximumf>, %61, %cst_27 [2] : vector<8x8x8xf32> to vector<8x8xf32>
    %63 = vector.shape_cast %62 : vector<8x8xf32> to vector<8x8x1xf32>
    %64 = vector.broadcast %63 : vector<8x8x1xf32> to vector<8x8x8xf32>
    %65 = arith.subf %61, %64 : vector<8x8x8xf32>
    %66 = math.exp %65 : vector<8x8x8xf32>
    %cst_28 = arith.constant dense<0.000000e+00> : vector<8x8xf32>
    %67 = vector.multi_reduction <add>, %66, %cst_28 [2] : vector<8x8x8xf32> to vector<8x8xf32>
    %68 = vector.shape_cast %67 : vector<8x8xf32> to vector<8x8x1xf32>
    "tpu.trace_start"() <{level = 10 : i32, message = "bqk,bkd->bqd"}> : () -> ()
    %cst_29 = arith.constant dense<0.000000e+00> : vector<8x8x16xf32>
    %69 = tpu.matmul %66, %60, %cst_29 {dimension_numbers = #tpu.dot_dimension_numbers<[2], [1], [1], [2], [0, 0, 0, 1, 1, 2], [0], [0]>} : vector<8x8x8xf32>, vector<8x8x16xf32>, vector<8x8x16xf32> -> vector<8x8x16xf32>
    "tpu.trace_stop"() : () -> ()
    %70 = tpu.reciprocal %68 {approx = true} : vector<8x8x1xf32> -> vector<8x8x1xf32>
    %71 = vector.broadcast %70 : vector<8x8x1xf32> to vector<8x8x16xf32>
    %72 = arith.mulf %69, %71 : vector<8x8x16xf32>
    %73 = vector.shape_cast %72 : vector<8x8x16xf32> to vector<64x16xf32>
    %74 = vector.extract_strided_slice %16 {offsets = [0, 48], sizes = [64, 16], strides = [1, 1]} : vector<64x192xf32> to vector<64x16xf32>
    %75 = vector.shape_cast %74 : vector<64x16xf32> to vector<8x8x16xf32>
    %76 = vector.extract_strided_slice %16 {offsets = [0, 112], sizes = [64, 16], strides = [1, 1]} : vector<64x192xf32> to vector<64x16xf32>
    %77 = vector.shape_cast %76 : vector<64x16xf32> to vector<8x8x16xf32>
    %78 = vector.extract_strided_slice %16 {offsets = [0, 176], sizes = [64, 16], strides = [1, 1]} : vector<64x192xf32> to vector<64x16xf32>
    %79 = vector.shape_cast %78 : vector<64x16xf32> to vector<8x8x16xf32>
    "tpu.trace_start"() <{level = 10 : i32, message = "bqd,bkd->bqk"}> : () -> ()
    %cst_30 = arith.constant dense<0.000000e+00> : vector<8x8x8xf32>
    %80 = tpu.matmul %75, %77, %cst_30 {dimension_numbers = #tpu.dot_dimension_numbers<[2], [2], [1], [1], [0, 0, 0, 1, 1, 1], [0], [0]>} : vector<8x8x16xf32>, vector<8x8x16xf32>, vector<8x8x8xf32> -> vector<8x8x8xf32>
    "tpu.trace_stop"() : () -> ()
    %cst_31 = arith.constant dense<0xFF800000> : vector<8x8xf32>
    %81 = vector.multi_reduction <maximumf>, %80, %cst_31 [2] : vector<8x8x8xf32> to vector<8x8xf32>
    %82 = vector.shape_cast %81 : vector<8x8xf32> to vector<8x8x1xf32>
    %83 = vector.broadcast %82 : vector<8x8x1xf32> to vector<8x8x8xf32>
    %84 = arith.subf %80, %83 : vector<8x8x8xf32>
    %85 = math.exp %84 : vector<8x8x8xf32>
    %cst_32 = arith.constant dense<0.000000e+00> : vector<8x8xf32>
    %86 = vector.multi_reduction <add>, %85, %cst_32 [2] : vector<8x8x8xf32> to vector<8x8xf32>
    %87 = vector.shape_cast %86 : vector<8x8xf32> to vector<8x8x1xf32>
    "tpu.trace_start"() <{level = 10 : i32, message = "bqk,bkd->bqd"}> : () -> ()
    %cst_33 = arith.constant dense<0.000000e+00> : vector<8x8x16xf32>
    %88 = tpu.matmul %85, %79, %cst_33 {dimension_numbers = #tpu.dot_dimension_numbers<[2], [1], [1], [2], [0, 0, 0, 1, 1, 2], [0], [0]>} : vector<8x8x8xf32>, vector<8x8x16xf32>, vector<8x8x16xf32> -> vector<8x8x16xf32>
    "tpu.trace_stop"() : () -> ()
    %89 = tpu.reciprocal %87 {approx = true} : vector<8x8x1xf32> -> vector<8x8x1xf32>
    %90 = vector.broadcast %89 : vector<8x8x1xf32> to vector<8x8x16xf32>
    %91 = arith.mulf %88, %90 : vector<8x8x16xf32>
    %92 = vector.shape_cast %91 : vector<8x8x16xf32> to vector<64x16xf32>
    %93 = tpu.concatenate %35, %54, %73, %92 in 1 : vector<64x16xf32>, vector<64x16xf32>, vector<64x16xf32>, vector<64x16xf32> -> vector<64x64xf32>
    %cst_34 = arith.constant dense<0.000000e+00> : vector<64x64xf32>
    %94 = tpu.matmul %93, %11, %cst_34 {dimension_numbers = #tpu.dot_dimension_numbers<[1], [0], [0], [1], [0, 0, 1, 1], [], []>} : vector<64x64xf32>, vector<64x64xf32>, vector<64x64xf32> -> vector<64x64xf32>
    %95 = vector.broadcast %13 : vector<1x64xf32> to vector<64x64xf32>
    %96 = arith.addf %94, %95 : vector<64x64xf32>
    %97 = arith.addf %5, %96 : vector<64x64xf32>
    %cst_35 = arith.constant dense<0.000000e+00> : vector<64xf32>
    %98 = vector.multi_reduction <add>, %97, %cst_35 [1] : vector<64x64xf32> to vector<64xf32>
    %99 = vector.shape_cast %98 : vector<64xf32> to vector<64x1xf32>
    %cst_36 = arith.constant 6.400000e+01 : f32
    %100 = vector.broadcast %cst_36 : f32 to vector<64x1xf32>
    %101 = arith.divf %99, %100 : vector<64x1xf32>
    %102 = vector.broadcast %101 : vector<64x1xf32> to vector<64x64xf32>
    %103 = arith.subf %97, %102 : vector<64x64xf32>
    %104 = arith.mulf %103, %103 : vector<64x64xf32>
    %cst_37 = arith.constant dense<0.000000e+00> : vector<64xf32>
    %105 = vector.multi_reduction <add>, %104, %cst_37 [1] : vector<64x64xf32> to vector<64xf32>
    %106 = vector.shape_cast %105 : vector<64xf32> to vector<64x1xf32>
    %cst_38 = arith.constant 6.400000e+01 : f32
    %107 = vector.broadcast %cst_38 : f32 to vector<64x1xf32>
    %108 = arith.divf %106, %107 : vector<64x1xf32>
    %cst_39 = arith.constant 9.99999974E-6 : f32
    %109 = vector.broadcast %cst_39 : f32 to vector<64x1xf32>
    %110 = arith.addf %108, %109 : vector<64x1xf32>
    %111 = math.rsqrt %110 : vector<64x1xf32>
    %112 = vector.broadcast %111 : vector<64x1xf32> to vector<64x64xf32>
    %113 = arith.mulf %103, %112 : vector<64x64xf32>
    %c0_40 = arith.constant 0 : index
    %c0_41 = arith.constant 0 : index
    %114 = vector.load %arg8[%c0_40, %c0_41] : memref<1x64xf32, #tpu.memory_space<vmem>>, vector<1x64xf32>
    %115 = vector.broadcast %114 : vector<1x64xf32> to vector<64x64xf32>
    %116 = arith.mulf %113, %115 : vector<64x64xf32>
    %c0_42 = arith.constant 0 : index
    %c0_43 = arith.constant 0 : index
    %117 = vector.load %arg9[%c0_42, %c0_43] : memref<1x64xf32, #tpu.memory_space<vmem>>, vector<1x64xf32>
    %118 = vector.broadcast %117 : vector<1x64xf32> to vector<64x64xf32>
    %119 = arith.addf %116, %118 : vector<64x64xf32>
    %c1 = arith.constant 1 : index
    %c0_44 = arith.constant 0 : index
    %c0_45 = arith.constant 0 : index
    %120 = vector.load %arg4[%c1, %c0_44, %c0_45] : memref<2x64x192xf32, #tpu.memory_space<vmem>>, vector<1x64x192xf32>
    %121 = vector.shape_cast %120 : vector<1x64x192xf32> to vector<64x192xf32>
    %c1_46 = arith.constant 1 : index
    %c0_47 = arith.constant 0 : index
    %c0_48 = arith.constant 0 : index
    %122 = vector.load %arg5[%c1_46, %c0_47, %c0_48] : memref<2x1x192xf32, #tpu.memory_space<vmem>>, vector<1x1x192xf32>
    %123 = vector.shape_cast %122 : vector<1x1x192xf32> to vector<1x192xf32>
    %c1_49 = arith.constant 1 : index
    %c0_50 = arith.constant 0 : index
    %c0_51 = arith.constant 0 : index
    %124 = vector.load %arg6[%c1_49, %c0_50, %c0_51] : memref<2x64x64xf32, #tpu.memory_space<vmem>>, vector<1x64x64xf32>
    %125 = vector.shape_cast %124 : vector<1x64x64xf32> to vector<64x64xf32>
    %c1_52 = arith.constant 1 : index
    %c0_53 = arith.constant 0 : index
    %c0_54 = arith.constant 0 : index
    %126 = vector.load %arg7[%c1_52, %c0_53, %c0_54] : memref<2x1x64xf32, #tpu.memory_space<vmem>>, vector<1x1x64xf32>
    %127 = vector.shape_cast %126 : vector<1x1x64xf32> to vector<1x64xf32>
    %cst_55 = arith.constant dense<0.000000e+00> : vector<64x192xf32>
    %128 = tpu.matmul %119, %121, %cst_55 {dimension_numbers = #tpu.dot_dimension_numbers<[1], [0], [0], [1], [0, 0, 1, 1], [], []>} : vector<64x64xf32>, vector<64x192xf32>, vector<64x192xf32> -> vector<64x192xf32>
    %129 = vector.broadcast %123 : vector<1x192xf32> to vector<64x192xf32>
    %130 = arith.addf %128, %129 : vector<64x192xf32>
    %131 = vector.extract_strided_slice %130 {offsets = [0, 0], sizes = [64, 16], strides = [1, 1]} : vector<64x192xf32> to vector<64x16xf32>
    %132 = vector.shape_cast %131 : vector<64x16xf32> to vector<8x8x16xf32>
    %133 = vector.extract_strided_slice %130 {offsets = [0, 64], sizes = [64, 16], strides = [1, 1]} : vector<64x192xf32> to vector<64x16xf32>
    %134 = vector.shape_cast %133 : vector<64x16xf32> to vector<8x8x16xf32>
    %135 = vector.extract_strided_slice %130 {offsets = [0, 128], sizes = [64, 16], strides = [1, 1]} : vector<64x192xf32> to vector<64x16xf32>
    %136 = vector.shape_cast %135 : vector<64x16xf32> to vector<8x8x16xf32>
    "tpu.trace_start"() <{level = 10 : i32, message = "bqd,bkd->bqk"}> : () -> ()
    %cst_56 = arith.constant dense<0.000000e+00> : vector<8x8x8xf32>
    %137 = tpu.matmul %132, %134, %cst_56 {dimension_numbers = #tpu.dot_dimension_numbers<[2], [2], [1], [1], [0, 0, 0, 1, 1, 1], [0], [0]>} : vector<8x8x16xf32>, vector<8x8x16xf32>, vector<8x8x8xf32> -> vector<8x8x8xf32>
    "tpu.trace_stop"() : () -> ()
    %cst_57 = arith.constant dense<0xFF800000> : vector<8x8xf32>
    %138 = vector.multi_reduction <maximumf>, %137, %cst_57 [2] : vector<8x8x8xf32> to vector<8x8xf32>
    %139 = vector.shape_cast %138 : vector<8x8xf32> to vector<8x8x1xf32>
    %140 = vector.broadcast %139 : vector<8x8x1xf32> to vector<8x8x8xf32>
    %141 = arith.subf %137, %140 : vector<8x8x8xf32>
    %142 = math.exp %141 : vector<8x8x8xf32>
    %cst_58 = arith.constant dense<0.000000e+00> : vector<8x8xf32>
    %143 = vector.multi_reduction <add>, %142, %cst_58 [2] : vector<8x8x8xf32> to vector<8x8xf32>
    %144 = vector.shape_cast %143 : vector<8x8xf32> to vector<8x8x1xf32>
    "tpu.trace_start"() <{level = 10 : i32, message = "bqk,bkd->bqd"}> : () -> ()
    %cst_59 = arith.constant dense<0.000000e+00> : vector<8x8x16xf32>
    %145 = tpu.matmul %142, %136, %cst_59 {dimension_numbers = #tpu.dot_dimension_numbers<[2], [1], [1], [2], [0, 0, 0, 1, 1, 2], [0], [0]>} : vector<8x8x8xf32>, vector<8x8x16xf32>, vector<8x8x16xf32> -> vector<8x8x16xf32>
    "tpu.trace_stop"() : () -> ()
    %146 = tpu.reciprocal %144 {approx = true} : vector<8x8x1xf32> -> vector<8x8x1xf32>
    %147 = vector.broadcast %146 : vector<8x8x1xf32> to vector<8x8x16xf32>
    %148 = arith.mulf %145, %147 : vector<8x8x16xf32>
    %149 = vector.shape_cast %148 : vector<8x8x16xf32> to vector<64x16xf32>
    %150 = vector.extract_strided_slice %130 {offsets = [0, 16], sizes = [64, 16], strides = [1, 1]} : vector<64x192xf32> to vector<64x16xf32>
    %151 = vector.shape_cast %150 : vector<64x16xf32> to vector<8x8x16xf32>
    %152 = vector.extract_strided_slice %130 {offsets = [0, 80], sizes = [64, 16], strides = [1, 1]} : vector<64x192xf32> to vector<64x16xf32>
    %153 = vector.shape_cast %152 : vector<64x16xf32> to vector<8x8x16xf32>
    %154 = vector.extract_strided_slice %130 {offsets = [0, 144], sizes = [64, 16], strides = [1, 1]} : vector<64x192xf32> to vector<64x16xf32>
    %155 = vector.shape_cast %154 : vector<64x16xf32> to vector<8x8x16xf32>
    "tpu.trace_start"() <{level = 10 : i32, message = "bqd,bkd->bqk"}> : () -> ()
    %cst_60 = arith.constant dense<0.000000e+00> : vector<8x8x8xf32>
    %156 = tpu.matmul %151, %153, %cst_60 {dimension_numbers = #tpu.dot_dimension_numbers<[2], [2], [1], [1], [0, 0, 0, 1, 1, 1], [0], [0]>} : vector<8x8x16xf32>, vector<8x8x16xf32>, vector<8x8x8xf32> -> vector<8x8x8xf32>
    "tpu.trace_stop"() : () -> ()
    %cst_61 = arith.constant dense<0xFF800000> : vector<8x8xf32>
    %157 = vector.multi_reduction <maximumf>, %156, %cst_61 [2] : vector<8x8x8xf32> to vector<8x8xf32>
    %158 = vector.shape_cast %157 : vector<8x8xf32> to vector<8x8x1xf32>
    %159 = vector.broadcast %158 : vector<8x8x1xf32> to vector<8x8x8xf32>
    %160 = arith.subf %156, %159 : vector<8x8x8xf32>
    %161 = math.exp %160 : vector<8x8x8xf32>
    %cst_62 = arith.constant dense<0.000000e+00> : vector<8x8xf32>
    %162 = vector.multi_reduction <add>, %161, %cst_62 [2] : vector<8x8x8xf32> to vector<8x8xf32>
    %163 = vector.shape_cast %162 : vector<8x8xf32> to vector<8x8x1xf32>
    "tpu.trace_start"() <{level = 10 : i32, message = "bqk,bkd->bqd"}> : () -> ()
    %cst_63 = arith.constant dense<0.000000e+00> : vector<8x8x16xf32>
    %164 = tpu.matmul %161, %155, %cst_63 {dimension_numbers = #tpu.dot_dimension_numbers<[2], [1], [1], [2], [0, 0, 0, 1, 1, 2], [0], [0]>} : vector<8x8x8xf32>, vector<8x8x16xf32>, vector<8x8x16xf32> -> vector<8x8x16xf32>
    "tpu.trace_stop"() : () -> ()
    %165 = tpu.reciprocal %163 {approx = true} : vector<8x8x1xf32> -> vector<8x8x1xf32>
    %166 = vector.broadcast %165 : vector<8x8x1xf32> to vector<8x8x16xf32>
    %167 = arith.mulf %164, %166 : vector<8x8x16xf32>
    %168 = vector.shape_cast %167 : vector<8x8x16xf32> to vector<64x16xf32>
    %169 = vector.extract_strided_slice %130 {offsets = [0, 32], sizes = [64, 16], strides = [1, 1]} : vector<64x192xf32> to vector<64x16xf32>
    %170 = vector.shape_cast %169 : vector<64x16xf32> to vector<8x8x16xf32>
    %171 = vector.extract_strided_slice %130 {offsets = [0, 96], sizes = [64, 16], strides = [1, 1]} : vector<64x192xf32> to vector<64x16xf32>
    %172 = vector.shape_cast %171 : vector<64x16xf32> to vector<8x8x16xf32>
    %173 = vector.extract_strided_slice %130 {offsets = [0, 160], sizes = [64, 16], strides = [1, 1]} : vector<64x192xf32> to vector<64x16xf32>
    %174 = vector.shape_cast %173 : vector<64x16xf32> to vector<8x8x16xf32>
    "tpu.trace_start"() <{level = 10 : i32, message = "bqd,bkd->bqk"}> : () -> ()
    %cst_64 = arith.constant dense<0.000000e+00> : vector<8x8x8xf32>
    %175 = tpu.matmul %170, %172, %cst_64 {dimension_numbers = #tpu.dot_dimension_numbers<[2], [2], [1], [1], [0, 0, 0, 1, 1, 1], [0], [0]>} : vector<8x8x16xf32>, vector<8x8x16xf32>, vector<8x8x8xf32> -> vector<8x8x8xf32>
    "tpu.trace_stop"() : () -> ()
    %cst_65 = arith.constant dense<0xFF800000> : vector<8x8xf32>
    %176 = vector.multi_reduction <maximumf>, %175, %cst_65 [2] : vector<8x8x8xf32> to vector<8x8xf32>
    %177 = vector.shape_cast %176 : vector<8x8xf32> to vector<8x8x1xf32>
    %178 = vector.broadcast %177 : vector<8x8x1xf32> to vector<8x8x8xf32>
    %179 = arith.subf %175, %178 : vector<8x8x8xf32>
    %180 = math.exp %179 : vector<8x8x8xf32>
    %cst_66 = arith.constant dense<0.000000e+00> : vector<8x8xf32>
    %181 = vector.multi_reduction <add>, %180, %cst_66 [2] : vector<8x8x8xf32> to vector<8x8xf32>
    %182 = vector.shape_cast %181 : vector<8x8xf32> to vector<8x8x1xf32>
    "tpu.trace_start"() <{level = 10 : i32, message = "bqk,bkd->bqd"}> : () -> ()
    %cst_67 = arith.constant dense<0.000000e+00> : vector<8x8x16xf32>
    %183 = tpu.matmul %180, %174, %cst_67 {dimension_numbers = #tpu.dot_dimension_numbers<[2], [1], [1], [2], [0, 0, 0, 1, 1, 2], [0], [0]>} : vector<8x8x8xf32>, vector<8x8x16xf32>, vector<8x8x16xf32> -> vector<8x8x16xf32>
    "tpu.trace_stop"() : () -> ()
    %184 = tpu.reciprocal %182 {approx = true} : vector<8x8x1xf32> -> vector<8x8x1xf32>
    %185 = vector.broadcast %184 : vector<8x8x1xf32> to vector<8x8x16xf32>
    %186 = arith.mulf %183, %185 : vector<8x8x16xf32>
    %187 = vector.shape_cast %186 : vector<8x8x16xf32> to vector<64x16xf32>
    %188 = vector.extract_strided_slice %130 {offsets = [0, 48], sizes = [64, 16], strides = [1, 1]} : vector<64x192xf32> to vector<64x16xf32>
    %189 = vector.shape_cast %188 : vector<64x16xf32> to vector<8x8x16xf32>
    %190 = vector.extract_strided_slice %130 {offsets = [0, 112], sizes = [64, 16], strides = [1, 1]} : vector<64x192xf32> to vector<64x16xf32>
    %191 = vector.shape_cast %190 : vector<64x16xf32> to vector<8x8x16xf32>
    %192 = vector.extract_strided_slice %130 {offsets = [0, 176], sizes = [64, 16], strides = [1, 1]} : vector<64x192xf32> to vector<64x16xf32>
    %193 = vector.shape_cast %192 : vector<64x16xf32> to vector<8x8x16xf32>
    "tpu.trace_start"() <{level = 10 : i32, message = "bqd,bkd->bqk"}> : () -> ()
    %cst_68 = arith.constant dense<0.000000e+00> : vector<8x8x8xf32>
    %194 = tpu.matmul %189, %191, %cst_68 {dimension_numbers = #tpu.dot_dimension_numbers<[2], [2], [1], [1], [0, 0, 0, 1, 1, 1], [0], [0]>} : vector<8x8x16xf32>, vector<8x8x16xf32>, vector<8x8x8xf32> -> vector<8x8x8xf32>
    "tpu.trace_stop"() : () -> ()
    %cst_69 = arith.constant dense<0xFF800000> : vector<8x8xf32>
    %195 = vector.multi_reduction <maximumf>, %194, %cst_69 [2] : vector<8x8x8xf32> to vector<8x8xf32>
    %196 = vector.shape_cast %195 : vector<8x8xf32> to vector<8x8x1xf32>
    %197 = vector.broadcast %196 : vector<8x8x1xf32> to vector<8x8x8xf32>
    %198 = arith.subf %194, %197 : vector<8x8x8xf32>
    %199 = math.exp %198 : vector<8x8x8xf32>
    %cst_70 = arith.constant dense<0.000000e+00> : vector<8x8xf32>
    %200 = vector.multi_reduction <add>, %199, %cst_70 [2] : vector<8x8x8xf32> to vector<8x8xf32>
    %201 = vector.shape_cast %200 : vector<8x8xf32> to vector<8x8x1xf32>
    "tpu.trace_start"() <{level = 10 : i32, message = "bqk,bkd->bqd"}> : () -> ()
    %cst_71 = arith.constant dense<0.000000e+00> : vector<8x8x16xf32>
    %202 = tpu.matmul %199, %193, %cst_71 {dimension_numbers = #tpu.dot_dimension_numbers<[2], [1], [1], [2], [0, 0, 0, 1, 1, 2], [0], [0]>} : vector<8x8x8xf32>, vector<8x8x16xf32>, vector<8x8x16xf32> -> vector<8x8x16xf32>
    "tpu.trace_stop"() : () -> ()
    %203 = tpu.reciprocal %201 {approx = true} : vector<8x8x1xf32> -> vector<8x8x1xf32>
    %204 = vector.broadcast %203 : vector<8x8x1xf32> to vector<8x8x16xf32>
    %205 = arith.mulf %202, %204 : vector<8x8x16xf32>
    %206 = vector.shape_cast %205 : vector<8x8x16xf32> to vector<64x16xf32>
    %207 = tpu.concatenate %149, %168, %187, %206 in 1 : vector<64x16xf32>, vector<64x16xf32>, vector<64x16xf32>, vector<64x16xf32> -> vector<64x64xf32>
    %cst_72 = arith.constant dense<0.000000e+00> : vector<64x64xf32>
    %208 = tpu.matmul %207, %125, %cst_72 {dimension_numbers = #tpu.dot_dimension_numbers<[1], [0], [0], [1], [0, 0, 1, 1], [], []>} : vector<64x64xf32>, vector<64x64xf32>, vector<64x64xf32> -> vector<64x64xf32>
    %209 = vector.broadcast %127 : vector<1x64xf32> to vector<64x64xf32>
    %210 = arith.addf %208, %209 : vector<64x64xf32>
    %211 = arith.addf %119, %210 : vector<64x64xf32>
    %cst_73 = arith.constant dense<0.000000e+00> : vector<64xf32>
    %212 = vector.multi_reduction <add>, %211, %cst_73 [1] : vector<64x64xf32> to vector<64xf32>
    %213 = vector.shape_cast %212 : vector<64xf32> to vector<64x1xf32>
    %cst_74 = arith.constant 6.400000e+01 : f32
    %214 = vector.broadcast %cst_74 : f32 to vector<64x1xf32>
    %215 = arith.divf %213, %214 : vector<64x1xf32>
    %216 = vector.broadcast %215 : vector<64x1xf32> to vector<64x64xf32>
    %217 = arith.subf %211, %216 : vector<64x64xf32>
    %218 = arith.mulf %217, %217 : vector<64x64xf32>
    %cst_75 = arith.constant dense<0.000000e+00> : vector<64xf32>
    %219 = vector.multi_reduction <add>, %218, %cst_75 [1] : vector<64x64xf32> to vector<64xf32>
    %220 = vector.shape_cast %219 : vector<64xf32> to vector<64x1xf32>
    %cst_76 = arith.constant 6.400000e+01 : f32
    %221 = vector.broadcast %cst_76 : f32 to vector<64x1xf32>
    %222 = arith.divf %220, %221 : vector<64x1xf32>
    %cst_77 = arith.constant 9.99999974E-6 : f32
    %223 = vector.broadcast %cst_77 : f32 to vector<64x1xf32>
    %224 = arith.addf %222, %223 : vector<64x1xf32>
    %225 = math.rsqrt %224 : vector<64x1xf32>
    %226 = vector.broadcast %225 : vector<64x1xf32> to vector<64x64xf32>
    %227 = arith.mulf %217, %226 : vector<64x64xf32>
    %c0_78 = arith.constant 0 : index
    %c0_79 = arith.constant 0 : index
    %228 = vector.load %arg8[%c0_78, %c0_79] : memref<1x64xf32, #tpu.memory_space<vmem>>, vector<1x64xf32>
    %229 = vector.broadcast %228 : vector<1x64xf32> to vector<64x64xf32>
    %230 = arith.mulf %227, %229 : vector<64x64xf32>
    %c0_80 = arith.constant 0 : index
    %c0_81 = arith.constant 0 : index
    %231 = vector.load %arg9[%c0_80, %c0_81] : memref<1x64xf32, #tpu.memory_space<vmem>>, vector<1x64xf32>
    %232 = vector.broadcast %231 : vector<1x64xf32> to vector<64x64xf32>
    %233 = arith.addf %230, %232 : vector<64x64xf32>
    %c0_82 = arith.constant 0 : index
    %c0_83 = arith.constant 0 : index
    %234 = vector.load %arg10[%c0_82, %c0_83] : memref<16x64xf32, #tpu.memory_space<vmem>>, vector<16x64xf32>
    "tpu.trace_start"() <{level = 10 : i32, message = "dh,nh->dn"}> : () -> ()
    %cst_84 = arith.constant dense<0.000000e+00> : vector<16x64xf32>
    %235 = tpu.matmul %234, %233, %cst_84 {dimension_numbers = #tpu.dot_dimension_numbers<[1], [1], [0], [0], [0, 0, 1, 0], [], []>} : vector<16x64xf32>, vector<64x64xf32>, vector<16x64xf32> -> vector<16x64xf32>
    "tpu.trace_stop"() : () -> ()
    %c0_85 = arith.constant 0 : index
    %c0_86 = arith.constant 0 : index
    %236 = vector.load %arg11[%c0_85, %c0_86] : memref<16x1xf32, #tpu.memory_space<vmem>>, vector<16x1xf32>
    %237 = vector.broadcast %236 : vector<16x1xf32> to vector<16x64xf32>
    %238 = arith.addf %235, %237 : vector<16x64xf32>
    %239 = vector.shape_cast %238 : vector<16x64xf32> to vector<1x16x64xf32>
    %c0_87 = arith.constant 0 : index
    %c0_88 = arith.constant 0 : index
    %c0_89 = arith.constant 0 : index
    %240 = vector.load %arg12[%c0_87, %c0_88, %c0_89] : memref<1x16x64xf32, #tpu.memory_space<vmem>>, vector<1x16x64xf32>
    tpu.vector_store %arg12[%c0_87, %c0_88, %c0_89], %239 {strides = array<i32>} : memref<1x16x64xf32, #tpu.memory_space<vmem>>, vector<1x16x64xf32>,
    return
  }
  func.func @transform_0(%arg0: i32) -> (i32, i32) {
    %c0_i32 = arith.constant 0 : i32
    %c0_i32_0 = arith.constant 0 : i32
    return %arg0, %c0_i32 : i32, i32
  }
  func.func @transform_1(%arg0: i32) -> (i32, i32) {
    %c0_i32 = arith.constant 0 : i32
    %c0_i32_0 = arith.constant 0 : i32
    %c0_i32_1 = arith.constant 0 : i32
    return %c0_i32, %c0_i32_0 : i32, i32
  }
  func.func @transform_2(%arg0: i32) -> (i32, i32) {
    %c0_i32 = arith.constant 0 : i32
    %c0_i32_0 = arith.constant 0 : i32
    %c0_i32_1 = arith.constant 0 : i32
    return %c0_i32, %c0_i32_0 : i32, i32
  }
  func.func @transform_3(%arg0: i32) -> (i32, i32, i32) {
    %c0_i32 = arith.constant 0 : i32
    %c0_i32_0 = arith.constant 0 : i32
    %c0_i32_1 = arith.constant 0 : i32
    %c0_i32_2 = arith.constant 0 : i32
    return %c0_i32, %c0_i32_0, %c0_i32_1 : i32, i32, i32
  }
  func.func @transform_4(%arg0: i32) -> (i32, i32, i32) {
    %c0_i32 = arith.constant 0 : i32
    %c0_i32_0 = arith.constant 0 : i32
    %c0_i32_1 = arith.constant 0 : i32
    %c0_i32_2 = arith.constant 0 : i32
    return %c0_i32, %c0_i32_0, %c0_i32_1 : i32, i32, i32
  }
  func.func @transform_5(%arg0: i32) -> (i32, i32, i32) {
    %c0_i32 = arith.constant 0 : i32
    %c0_i32_0 = arith.constant 0 : i32
    %c0_i32_1 = arith.constant 0 : i32
    %c0_i32_2 = arith.constant 0 : i32
    return %c0_i32, %c0_i32_0, %c0_i32_1 : i32, i32, i32
  }
  func.func @transform_6(%arg0: i32) -> (i32, i32, i32) {
    %c0_i32 = arith.constant 0 : i32
    %c0_i32_0 = arith.constant 0 : i32
    %c0_i32_1 = arith.constant 0 : i32
    %c0_i32_2 = arith.constant 0 : i32
    return %c0_i32, %c0_i32_0, %c0_i32_1 : i32, i32, i32
  }
  func.func @transform_7(%arg0: i32) -> (i32, i32) {
    %c0_i32 = arith.constant 0 : i32
    %c0_i32_0 = arith.constant 0 : i32
    %c0_i32_1 = arith.constant 0 : i32
    return %c0_i32, %c0_i32_0 : i32, i32
  }
  func.func @transform_8(%arg0: i32) -> (i32, i32) {
    %c0_i32 = arith.constant 0 : i32
    %c0_i32_0 = arith.constant 0 : i32
    %c0_i32_1 = arith.constant 0 : i32
    return %c0_i32, %c0_i32_0 : i32, i32
  }
  func.func @transform_9(%arg0: i32) -> (i32, i32) {
    %c0_i32 = arith.constant 0 : i32
    %c0_i32_0 = arith.constant 0 : i32
    %c0_i32_1 = arith.constant 0 : i32
    return %c0_i32, %c0_i32_0 : i32, i32
  }
  func.func @transform_10(%arg0: i32) -> (i32, i32) {
    %c0_i32 = arith.constant 0 : i32
    %c0_i32_0 = arith.constant 0 : i32
    %c0_i32_1 = arith.constant 0 : i32
    return %c0_i32, %c0_i32_0 : i32, i32
  }
  func.func @transform_11(%arg0: i32) -> (i32, i32, i32) {
    %c0_i32 = arith.constant 0 : i32
    %c0_i32_0 = arith.constant 0 : i32
    %c0_i32_1 = arith.constant 0 : i32
    return %arg0, %c0_i32, %c0_i32_0 : i32, i32, i32
  }
}

</mosaic_0001>

<bundles_post_ra>
// kernel: tpu_custom_call.1
= control target key start
LH: loop header
LB: loop body
LE: loop exit
PB: predicated region body
PF: predicated region fallthrough
CT: control target
= control target key end

     0   :  { %s16815_s0 = inlined_call_operand.vmem [shape: f32[256,17], index: 0, kind: input, shape index: {}]   ;;  %s16816_s1 = inlined_call_operand.vmem [shape: f32[17,64], index: 1, kind: input, shape index: {}]   ;;  %s16817_s2 = inlined_call_operand.vmem [shape: f32[1,64], index: 2, kind: input, shape index: {}]   ;;  %s16818_s3 = inlined_call_operand.vmem [shape: f32[2,64,192], index: 3, kind: input, shape index: {}]   ;;  %s16819_s4 = inlined_call_operand.vmem [shape: f32[2,1,192], index: 4, kind: input, shape index: {}]   ;;  %s16820_s5 = inlined_call_operand.hbm [shape: f32[2,64,64], index: 5, kind: input, shape index: {}]   ;;  %s16821_s6 = inlined_call_operand.vmem [shape: f32[2,1,64], index: 6, kind: input, shape index: {}]   ;;  %s16822_s7 = inlined_call_operand.vmem [shape: f32[1,64], index: 7, kind: input, shape index: {}]   ;;  %s16823_s8 = inlined_call_operand.vmem [shape: f32[1,64], index: 8, kind: input, shape index: {}]   ;;  %s16824_s9 = inlined_call_operand.vmem [shape: f32[16,64], index: 9, kind: input, shape index: {}]   ;;  %s16825_s10 = inlined_call_operand.vmem [shape: f32[16,1], index: 10, kind: input, shape index: {}]   ;;  %s16826_s11 = inlined_call_operand.hbm [shape: f32[4,16,64], index: 11, kind: output, shape index: {}]  }
   0x1   :  { %16863 = sst [smem:[#allocation22_spill]] %s16815_s0 }
   0x2   :  { %16 = vsyncpa [#allocation3], 0 }
   0x3   :  { %17 = vsyncpa [#allocation4], 0 }
   0x4   :  { %19 = vsyncpa [#allocation4 + $0x1], 0  ;;  %s14274_s17 = smov 0   ;;  %s14276_s18 = smov 0  }
   0x5   :  { %s14278_s19 = smov 0   ;;  %s14280_s20 = smov 0  }
   0x6 LB: > { %s14295_s21 = sadd.s32 4294967295, %s14196_s20   ;;  %s12427_s22 = sadd.s32 4294967294, %s14196_s20   ;;  %s14196_s20 = sphi %s14280_s20, %s16936_s20   ;;  %s14192_s19 = sphi %s14278_s19, %s16935_s19   ;;  %s14188_s18 = sphi %s14276_s18, %s16934_s18   ;;  %s14184_s17 = sphi %s14274_s17, %s16933_s17  }
   0x7   : > { %s14299_s23 = sadd.s32 1, %s14196_s20   ;;  %s268_s24 = sadd.s32 1, %s14192_s19 }
   0x8   : > { %s265_s25 = ssub.s32 %s14196_s20, %s14299_s23  ;;  %p278_p0 = scmp.ne.s32.totalorder %s14192_s19, %s14188_s18 }
   0x9   : > { %p266_p1 = scmp.eq.s32.totalorder %s265_s25, 0  ;;  %p279_p2 = scmp.eq.s32.totalorder %s14295_s21, 3 }
   0xa   : > { %p284_p3 = scmp.ne.s32.totalorder %s14188_s18, %s14184_s17  ;;  %p285_p4 = scmp.eq.s32.totalorder %s12427_s22, 3 }
   0xb   : > { %s14310_s26 = scalar_select %p266_p1, %s14192_s19, %s268_s24  }
   0xc   : > { %p14312_p5 = por %p279_p2, %p278_p0  ;;  %p14316_p6 = por %p285_p4, %p284_p3 }
   0xd   : > { %p12428_p7 = scmp.ge.s32.totalorder %s14196_s20, 1  ;;  %p292_p8 = scmp.lt.s32.totalorder %s14196_s20, 5 }
   0xe   : > { %s16865_s28 = scalar_select %p14316_p6, 1, 0 }
   0xf   : > { %p13766_p9 = scmp.eq.s32.totalorder %s14295_s21, 0  ;;  %p14323_p10 = pnand %p12428_p7, %p292_p8 }
  0x10   : > { %s14198_s30 = smov [#allocation2]  }
  0x11   : > { %s316_s12 = sshll.u32 %s14198_s30, 4  ;;  %p13758_p11 = pneg %p14323_p10  ;;  %s317_s12 = int_to_ptr.vmem [resolvable:$true] %s316_s12 }
  0x12   : > { %s14117_s13 = scalar_lea.vmem %s317_s12, 2048  ;;  %p14125_p3 = scmp.lt.s32.totalorder %s317_s12, %s317_s12 }
  0x13   : > { %p13759_p12 = pnand %p13766_p9, %p13758_p11  ;;  %p14118_p0 = scmp.ne.s32.totalorder %s317_s12, %s14117_s13 }
  0x14   : > { %p14126_p4 = scmp.lt.s32.totalorder %s14117_s13, %s14117_s13 }
  0x15   : > { %p14108_p13 = pneg %p13759_p12 }
  0x16   : > { %p14127_p6 = por %p14126_p4, %p14125_p3 }
  0x17   : > { %p14120_p1 = pnand %p14118_p0, %p14108_p13 }
  0x19   : > { %p14121_p2 = pneg %p14120_p1 }
  0x1b   : > { %p14128_p7 = pnand %p14127_p6, %p14121_p2 }
  0x1d   : > { %14131 = shalt.err (!%p14128_p7)
}
  0x1e   : > { %s14199_s14 = smov 128   ;;  %s14200_s15 = smov 8  }
  0x1f   : > { %13761 = dma.hbm_to_vmem [thread:$0]  (!%p13759_p12), %s16820_s5, 2048, %s317_s12, [#allocation3], %s14199_s14, %s14199_s14, %s14200_s15  }
  0x20   : > { %356 = sbr.rel (%p14323_p10) target bundleno = 5730 (0x1662), region = 64 }
  0x25   : > { %14175 = dma.done.wait (%p13766_p9), [#allocation3], 2048  }
  0x26   : > { %14177 = vsyncadd (%p13766_p9), [#allocation3], 4294965248  ;;  %s12434_s24 = sshll.u32 %s14295_s21, 3  ;;  %vm445_vm0 = vcmask 1040384   ;;  %s16867_s0 = sld [smem:[#allocation22_spill]]  ;;  %vm420_vm1 = vcmask 138240   ;;  %v581_v45 = vlaneseq }
  0x27   : > { %p397_p8 = scmp.lt.s32.totalorder %s12434_s24, 31  ;;  %v412_v0 = vld [vmem:[%s16816_s1 + $0x10] sm:$0x1]  ;;  %v411_v1 = vld [vmem:[%s16816_s1 + $0x8] sm:$0xff]  ;;  %v410_v3 = vld [vmem:[%s16816_s1] sm:$0xff]  ;;  %v16829_v27 = vmov 0.0  }
  0x28   : > { %13019 = vmatprep.subr.msk.mxu0 %vm445_vm0, %v412_v0  ;;  %v569_v5 = vld [vmem:[%s16818_s3 + $0x78] sm:$0xff]  ;;  %v568_v6 = vld [vmem:[%s16818_s3 + $0x70] sm:$0xff]  ;;  %v567_v7 = vld [vmem:[%s16818_s3 + $0x68] sm:$0xff]  ;;  %680 = vmatprep.mubr.f32.mxu1 %v16829_v27  ;;  %vm591_vm2 = vcmask 523264   ;;  %v14464_v46 = vshrl.u32 %v581_v45, 7  ;;  %vm14202_vm3 = vmmov 0  }
  0x29   : > { %s16938_s24 = smov (!%p397_p8, %s12434_s24), 31  ;;  %13020 = vmatpush3.msk.msra.mxu0 %vm445_vm0, %v412_v0  ;;  %632 = vmatprep.subr.mxu1 %v569_v5  ;;  %v566_v8 = vld [vmem:[%s16818_s3 + $0x60] sm:$0xff]  ;;  %v565_v10 = vld [vmem:[%s16818_s3 + $0x58] sm:$0xff]  ;;  %v564_v11 = vld [vmem:[%s16818_s3 + $0x50] sm:$0xff]  ;;  %s16849_s30 = smov 112   ;;  %vm732_vm4 = vcmask 130048  }
  0x2a   : > { %s12435_s25 = sshll.u32 %s16938_s24, 3  ;;  %13021 = vmatprep.subr.mxu0 %v411_v1  ;;  %633 = vmatpush1.msra.mxu1 %v568_v6  ;;  %v563_v12 = vld [vmem:[%s16818_s3 + $0x48] sm:$0xff]  ;;  %v562_v14 = vld [vmem:[%s16818_s3 + $0x40] sm:$0xff]  ;;  %v561_v16 = vld [vmem:[%s16818_s3 + $0x38] sm:$0xff]  ;;  %16876 = vst [vmem:[#allocation16_spill] sm:$0xff] %v14464_v46  ;;  %v16828_v47 = vsub.s32 0, %v14464_v46 }
  0x2b   : > { %13022 = vmatpush3.msra.mxu0 %v411_v1  ;;  %634 = vmatprep.subr.mxu1 %v567_v7  ;;  %v560_v17 = vld [vmem:[%s16818_s3 + $0x30] sm:$0xff]  ;;  %v559_v18 = vld [vmem:[%s16818_s3 + $0x28] sm:$0xff]  ;;  %v558_v22 = vld [vmem:[%s16818_s3 + $0x20] sm:$0xff]  ;;  %v16827_v52 = vsub.s32 1, %v14464_v46  ;;  %s16853_s24 = smov 64   ;;  %vm1346_vm5 = vcmask 64512  }
  0x2c   : > { %s14344_s16 = scalar_lea.vmem %s16867_s0, %s12435_s25  ;;  %13023 = vmatprep.subr.mxu0 %v410_v3  ;;  %635 = vmatpush1.msra.mxu1 %v566_v8  ;;  %v557_v23 = vld [vmem:[%s16818_s3 + $0x18] sm:$0xff]  ;;  %v556_v24 = vld [vmem:[%s16818_s3 + $0x10] sm:$0xff]  ;;  %v555_v25 = vld [vmem:[%s16818_s3 + $0x8] sm:$0xff]  ;;  %s16851_s25 = smov 48   ;;  %vm6091_vm6 = vcmask 261120   ;;  %vm6100_vm7 = vcmask 392192  }
  0x2d   : > { %v402_v2 = vld [vmem:[%s14344_s16] sm:$0xff]  ;;  %v403_v4 = vld [vmem:[%s14344_s16 + $0x8] sm:$0xff]  ;;  %v404_v9 = vld [vmem:[%s14344_s16 + $0x10] sm:$0xff]  ;;  %13024 = vmatpush3.msra.mxu0 %v410_v3  ;;  %636 = vmatprep.subr.mxu1 %v565_v10  ;;  %s16847_s13 = smov 32   ;;  %s16843_s29 = smov 16  }
  0x2e   : > { %13025 = vmatprep.mubr.msk.f32.mxu0 %vm420_vm1, %v402_v2  ;;  %v405_v13 = vld [vmem:[%s14344_s16 + $0x18] sm:$0xff]  ;;  %v406_v15 = vld [vmem:[%s14344_s16 + $0x20] sm:$0xff]  ;;  %637 = vmatpush1.msra.mxu1 %v564_v11  ;;  %v407_v19 = vld [vmem:[%s14344_s16 + $0x28] sm:$0xff]  ;;  %s16841_s12 = smov 80   ;;  %s16908_s22 = smov 112  }
  0x2f   : > { %13026 = vmatmul.mubr.msk.f32.vlgmr.msra.gmra.mxu0 %vm420_vm1, %v403_v4  ;;  %638 = vmatprep.subr.mxu1 %v563_v12  ;;  %v408_v20 = vld [vmem:[%s14344_s16 + $0x30] sm:$0xff]  ;;  %v409_v21 = vld [vmem:[%s14344_s16 + $0x38] sm:$0xff]  ;;  %v554_v26 = vld [vmem:[%s16818_s3] sm:$0xff]  ;;  %s16845_s16 = smov 96   ;;  %s16910_s14 = smov 32  }
  0x30   : > { %13028 = vmatprep.mubr.msk.f32.mxu0 %vm420_vm1, %v404_v9  ;;  %639 = vmatpush1.msra.mxu1 %v562_v14  ;;  %v12436_v29 = vld [vmem:[%s16817_s2] ss:$0 sm:$0xff]  ;;  %s16917_s15 = smov 16  }
  0x31   : > { %640 = vmatprep.subr.mxu1 %v561_v16  ;;  %13037 = vmatprep.subr.mxu0 %v16829_v27  ;;  %v570_v48 = vld [vmem:[%s16819_s4] sm:$0x3] }
  0x32   : > { %641 = vmatpush1.msra.mxu1 %v560_v17  ;;  %v584_v49 = vrot.slane %v570_v48, %v16828_v47  ;;  %v14485_v55 = vrot.slane %v570_v48, %v16827_v52 }
  0x33   : > { %13029 = vmatmul.mubr.msk.f32.gmra.mxu0 %vm420_vm1, %v405_v13  ;;  %642 = vmatprep.subr.mxu1 %v559_v18 }
  0x34   : > { %13031 = vmatprep.mubr.msk.f32.mxu0 %vm420_vm1, %v406_v15  ;;  %643 = vmatpush1.msra.mxu1 %v558_v22 }
  0x35   : > { %644 = vmatprep.subr.mxu1 %v557_v23 }
  0x36   : > { %645 = vmatpush1.msra.mxu1 %v556_v24 }
  0x37   : > { %13032 = vmatmul.mubr.msk.f32.gmra.mxu0 %vm420_vm1, %v407_v19  ;;  %646 = vmatprep.subr.mxu1 %v555_v25 }
  0x38   : > { %13034 = vmatprep.mubr.msk.f32.mxu0 %vm420_vm1, %v408_v20  ;;  %647 = vmatpush1.msra.mxu1 %v554_v26 }
  0x39   : > { %13082 = vmatprep.subr.mxu1 %v16829_v27 }
  0x3b   : > { %13035 = vmatmul.mubr.msk.f32.gmra.mxu0 %vm420_vm1, %v409_v21 }
  0x3c   : > { %13039 = vmatprep.mubr.msk.f32.mxu0 %vm14202_vm3, %v16829_v27 }
  0xef   : > { %v13027_v28 = vpop.f32.mrf.mxu0 }
  0xf0   : > { %v14430_v33 = vadd.f32 %v13027_v28, %v12436_v29 }
  0xf1   : > { %v515_v30 = vpop.f32.mrf.mxu0 }
  0xf2   : > { %v14425_v31 = vadd.f32 %v12436_v29, %v515_v30  ;;  %16869 = vst [vmem:[#allocation9_spill] sm:$0xff] %v14430_v33 }
  0xf3   : > { %v13030_v32 = vpop.f32.mrf.mxu0 }
  0xf4   : > { %16868 = vst [vmem:[#allocation8_spill] sm:$0xff] %v14425_v31  ;;  %12446 = vmatmul.mubr.msk.f32.vlgmr.msra.gmra.mxu1 %vm591_vm2, %v14425_v31  ;;  %v14440_v37 = vadd.f32 %v13030_v32, %v12436_v29 }
  0xf5   : > { %686 = vmatprep.mubr.f32.mxu1 %v16829_v27  ;;  %v525_v34 = vpop.f32.mrf.mxu0 }
  0xf6   : > { %v14435_v35 = vadd.f32 %v12436_v29, %v525_v34  ;;  %16871 = vst [vmem:[#allocation11_spill] sm:$0xff] %v14440_v37 }
  0xf7   : > { %v13033_v36 = vpop.f32.mrf.mxu0 }
  0xf8   : > { %12447 = vmatmul.mubr.msk.f32.gmra.mxu1 %vm591_vm2, %v14430_v33  ;;  %16870 = vst [vmem:[#allocation10_spill] sm:$0xff] %v14435_v35  ;;  %v14450_v41 = vadd.f32 %v13033_v36, %v12436_v29 }
  0xf9   : > { %692 = vmatprep.mubr.f32.mxu1 %v16829_v27  ;;  %v535_v38 = vpop.f32.mrf.mxu0 }
  0xfa   : > { %v14445_v39 = vadd.f32 %v12436_v29, %v535_v38  ;;  %16873 = vst [vmem:[#allocation13_spill] sm:$0xff] %v14450_v41 }
  0xfb   : > { %v13036_v40 = vpop.f32.mrf.mxu0 }
  0xfc   : > { %12448 = vmatmul.mubr.msk.f32.gmra.mxu1 %vm591_vm2, %v14435_v35  ;;  %16872 = vst [vmem:[#allocation12_spill] sm:$0xff] %v14445_v39  ;;  %v14460_v44 = vadd.f32 %v13036_v40, %v12436_v29 }
  0xfd   : > { %698 = vmatprep.mubr.f32.mxu1 %v16829_v27  ;;  %v545_v42 = vpop.f32.mrf.mxu0 }
  0xfe   : > { %v14455_v43 = vadd.f32 %v12436_v29, %v545_v42  ;;  %16875 = vst [vmem:[#allocation15_spill] sm:$0xff] %v14460_v44 }
 0x100   : > { %12449 = vmatmul.mubr.msk.f32.gmra.mxu1 %vm591_vm2, %v14440_v37  ;;  %16874 = vst [vmem:[#allocation14_spill] sm:$0xff] %v14455_v43 }
 0x101   : > { %704 = vmatprep.mubr.f32.mxu1 %v16829_v27 }
 0x104   : > { %12450 = vmatmul.mubr.msk.f32.gmra.mxu1 %vm591_vm2, %v14445_v39 }
 0x105   : > { %710 = vmatprep.mubr.f32.mxu1 %v16829_v27 }
 0x108   : > { %12451 = vmatmul.mubr.msk.f32.gmra.mxu1 %vm591_vm2, %v14450_v41 }
 0x109   : > { %716 = vmatprep.mubr.f32.mxu1 %v16829_v27 }
 0x10c   : > { %12452 = vmatmul.mubr.msk.f32.gmra.mxu1 %vm591_vm2, %v14455_v43 }
 0x10d   : > { %722 = vmatprep.mubr.f32.mxu1 %v16829_v27 }
 0x110   : > { %12453 = vmatmul.mubr.msk.f32.gmra.mxu1 %vm591_vm2, %v14460_v44 }
 0x111   : > { %13084 = vmatprep.mubr.msk.f32.mxu1 %vm14202_vm3, %v16829_v27 }
 0x1b4   : > { %v682_v50 = vpop.f32.mrf.mxu1 }
 0x1b5   : > { %v14476_v51 = vadd.f32 %v682_v50, %v584_v49 }
 0x1b6   : > { %v14479_v53 = vpop.f32.mrf.mxu1 }
 0x1b7   : > { %730 = vrot.lane.b32.xlu0 %v14476_v51, %s16853_s24  ;;  %v14588_v20 = vadd.f32 %v14479_v53, %v14485_v55 }
 0x1b8   : > { %v688_v54 = vpop.f32.mrf.mxu1 }
 0x1b9   : > { %v14487_v56 = vadd.f32 %v688_v54, %v584_v49 }
 0x1ba   : > { %v690_v57 = vpop.f32.mrf.mxu1 }
 0x1bb   : > { %v14490_v58 = vadd.f32 %v690_v57, %v14485_v55  ;;  %808 = vrot.lane.b32.xlu0 %v14487_v56, %s16853_s24 }
 0x1bc   : > { %v694_v59 = vpop.f32.mrf.mxu1 }
 0x1bd   : > { %v14494_v60 = vadd.f32 %v694_v59, %v584_v49  ;;  %13083 = vmatpush3.msra.mxu1 %v14490_v58 }
 0x1be   : > { %v14497_v61 = vpop.f32.mrf.mxu1  ;;  %13092 = vmatprep.subr.mxu1 %v16829_v27 }
 0x1bf   : > { %885 = vrot.lane.b32.xlu1 %v14494_v60, %s16853_s24 }
 0x1c0   : > { %v700_v62 = vpop.f32.mrf.mxu1 }
 0x1c1   : > { %v14502_v63 = vadd.f32 %v700_v62, %v584_v49 }
 0x1c2   : > { %v14504_v0 = vpop.f32.mrf.mxu1 }
 0x1c3   : > { %962 = vrot.lane.b32.xlu1 %v14502_v63, %s16853_s24 }
 0x1c4   : > { %v706_v1 = vpop.f32.mrf.mxu1 }
 0x1c5   : > { %v14508_v2 = vadd.f32 %v706_v1, %v584_v49  ;;  %v14650_v1 = vadd.f32 %v14497_v61, %v14485_v55 }
 0x1c6   : > { %v14510_v3 = vpop.f32.mrf.mxu1 }
 0x1c7   : > { %1039 = vrot.lane.b32.xlu0 %v14508_v2, %s16853_s24 }
 0x1c8   : > { %v712_v4 = vpop.f32.mrf.mxu1 }
 0x1c9   : > { %v14514_v5 = vadd.f32 %v712_v4, %v584_v49  ;;  %v14658_v4 = vadd.f32 %v14504_v0, %v14485_v55 }
 0x1ca   : > { %v14516_v6 = vpop.f32.mrf.mxu1 }
 0x1cb   : > { %1116 = vrot.lane.b32.xlu1 %v14514_v5, %s16853_s24  ;;  %v14666_v61 = vadd.f32 %v14516_v6, %v14485_v55 }
 0x1cc   : > { %v718_v7 = vpop.f32.mrf.mxu1 }
 0x1cd   : > { %v14520_v8 = vadd.f32 %v718_v7, %v584_v49  ;;  %v14670_v7 = vadd.f32 %v14510_v3, %v14485_v55 }
 0x1ce   : > { %v14522_v9 = vpop.f32.mrf.mxu1 }
 0x1cf   : > { %1193 = vrot.lane.b32.xlu0 %v14520_v8, %s16853_s24 }
 0x1d0   : > { %v724_v10 = vpop.f32.mrf.mxu1 }
 0x1d1   : > { %v14526_v11 = vadd.f32 %v724_v10, %v584_v49 }
 0x1d2   : > { %v726_v10 = vpop.f32.mrf.mxu1 }
 0x1d3   : > { %1270 = vrot.lane.b32.xlu1 %v14526_v11, %s16853_s24  ;;  %2099 = vrot.lane.b32.xlu0 %v14487_v56, %s16851_s25  ;;  %v14677_v0 = vadd.f32 %v726_v10, %v14485_v55  ;;  %s16906_s24 = smov 64  }
 0x1d7   : > { %2021 = vrot.lane.b32.xlu1 %v14476_v51, %s16851_s25  ;;  %2177 = vrot.lane.b32.xlu0 %v14494_v60, %s16851_s25 }
 0x1db   : > { %2019 = vrot.lane.b32.xlu1 %v14476_v51, %s16849_s30 }
 0x1df   : > { %2097 = vrot.lane.b32.xlu1 %v14487_v56, %s16849_s30 }
 0x1e3   : > { %2255 = vrot.lane.b32.xlu1 %v14502_v63, %s16851_s25 }
 0x229   : > { %v731_v12 = vpop.permute.xlu0 %730 }
 0x22a   : > { %13038 = vmatpush3.xpose.msk.msra.mxu0 %vm732_vm4, %v731_v12  ;;  %v14681_v12 = vadd.f32 %v14522_v9, %v14485_v55 }
 0x22b   : > { %13042 = vmatprep.subr.mxu0 %v16829_v27 }
 0x22d   : > { %13040 = vmatmul.mubr.msk.f32.vlgmr.msra.gmra.mxu0 %vm732_vm4, %v14476_v51  ;;  %v809_v13 = vpop.permute.xlu0 %808 }
 0x22e   : > { %13043 = vmatpush3.xpose.msk.msra.mxu0 %vm732_vm4, %v809_v13  ;;  %13044 = vmatprep.mubr.msk.f32.mxu0 %vm14202_vm3, %v16829_v27 }
 0x22f   : > { %13047 = vmatprep.subr.mxu0 %v16829_v27 }
 0x231   : > { %v886_v14 = vpop.permute.xlu1 %885  ;;  %13045 = vmatmul.mubr.msk.f32.vlgmr.msra.gmra.mxu0 %vm732_vm4, %v14487_v56 }
 0x232   : > { %13048 = vmatpush3.xpose.msk.msra.mxu0 %vm732_vm4, %v886_v14  ;;  %13049 = vmatprep.mubr.msk.f32.mxu0 %vm14202_vm3, %v16829_v27 }
 0x233   : > { %13052 = vmatprep.subr.mxu0 %v16829_v27 }
 0x235   : > { %v963_v15 = vpop.permute.xlu1 %962  ;;  %13050 = vmatmul.mubr.msk.f32.vlgmr.msra.gmra.mxu0 %vm732_vm4, %v14494_v60 }
 0x236   : > { %13053 = vmatpush3.xpose.msk.msra.mxu0 %vm732_vm4, %v963_v15  ;;  %13054 = vmatprep.mubr.msk.f32.mxu0 %vm14202_vm3, %v16829_v27 }
 0x237   : > { %13057 = vmatprep.subr.mxu0 %v16829_v27 }
 0x239   : > { %13055 = vmatmul.mubr.msk.f32.vlgmr.msra.gmra.mxu0 %vm732_vm4, %v14502_v63  ;;  %v1040_v16 = vpop.permute.xlu0 %1039 }
 0x23a   : > { %13058 = vmatpush3.xpose.msk.msra.mxu0 %vm732_vm4, %v1040_v16  ;;  %13059 = vmatprep.mubr.msk.f32.mxu0 %vm14202_vm3, %v16829_v27 }
 0x23b   : > { %13062 = vmatprep.subr.mxu0 %v16829_v27 }
 0x23d   : > { %v1117_v17 = vpop.permute.xlu1 %1116  ;;  %13060 = vmatmul.mubr.msk.f32.vlgmr.msra.gmra.mxu0 %vm732_vm4, %v14508_v2 }
 0x23e   : > { %13063 = vmatpush3.xpose.msk.msra.mxu0 %vm732_vm4, %v1117_v17  ;;  %13064 = vmatprep.mubr.msk.f32.mxu0 %vm14202_vm3, %v16829_v27 }
 0x23f   : > { %13067 = vmatprep.subr.mxu0 %v16829_v27 }
 0x241   : > { %13065 = vmatmul.mubr.msk.f32.vlgmr.msra.gmra.mxu0 %vm732_vm4, %v14514_v5  ;;  %v1194_v18 = vpop.permute.xlu0 %1193 }
 0x242   : > { %13068 = vmatpush3.xpose.msk.msra.mxu0 %vm732_vm4, %v1194_v18  ;;  %13069 = vmatprep.mubr.msk.f32.mxu0 %vm14202_vm3, %v16829_v27 }
 0x243   : > { %13072 = vmatprep.subr.mxu0 %v16829_v27 }
 0x245   : > { %v1271_v19 = vpop.permute.xlu1 %1270  ;;  %13070 = vmatmul.mubr.msk.f32.vlgmr.msra.gmra.mxu0 %vm732_vm4, %v14520_v8  ;;  %v14703_v6 = vpop.permute.xlu0 %2099 }
 0x246   : > { %13073 = vmatpush3.xpose.msk.msra.mxu0 %vm732_vm4, %v1271_v19  ;;  %13074 = vmatprep.mubr.msk.f32.mxu0 %vm14202_vm3, %v16829_v27 }
 0x247   : > { %13077 = vmatprep.subr.mxu0 %v16829_v27 }
 0x249   : > { %13075 = vmatmul.mubr.msk.f32.vlgmr.msra.gmra.mxu0 %vm732_vm4, %v14526_v11  ;;  %v14699_v55 = vpop.permute.xlu1 %2021  ;;  %v14707_v13 = vpop.permute.xlu0 %2177 }
 0x24a   : > { %13078 = vmatpush3.msra.mxu0 %v14588_v20  ;;  %13079 = vmatprep.mubr.msk.f32.mxu0 %vm14202_vm3, %v16829_v27 }
 0x24b   : > { %13087 = vmatprep.subr.mxu0 %v16829_v27 }
 0x24d   : > { %v14701_v3 = vpop.permute.xlu1 %2019 }
 0x251   : > { %v14705_v9 = vpop.permute.xlu1 %2097 }
 0x255   : > { %v14709_v14 = vpop.permute.xlu1 %2255 }
 0x2ed   : > { %v14596_v21 = vpop.f32.mrf.mxu0 }
 0x2ee   : > { %v1347_v22 = vsel %vm1346_vm5, %v14596_v21, -inf }
 0x2ef   : > { %1348 = vmax.xlane.f32.xlu0 %v1347_v22  ;;  %v13041_v23 = vpop.f32.mrf.mxu0 }
 0x2f1   : > { %v14600_v24 = vpop.f32.mrf.mxu0 }
 0x2f2   : > { %v1350_v25 = vsel %vm1346_vm5, %v14600_v24, -inf }
 0x2f3   : > { %1351 = vmax.xlane.f32.xlu1 %v1350_v25  ;;  %v13046_v26 = vpop.f32.mrf.mxu0 }
 0x2f5   : > { %v14604_v28 = vpop.f32.mrf.mxu0 }
 0x2f6   : > { %v1353_v29 = vsel %vm1346_vm5, %v14604_v28, -inf }
 0x2f7   : > { %1354 = vmax.xlane.f32.xlu0 %v1353_v29  ;;  %v13051_v30 = vpop.f32.mrf.mxu0 }
 0x2f9   : > { %v14608_v32 = vpop.f32.mrf.mxu0 }
 0x2fa   : > { %v1356_v34 = vsel %vm1346_vm5, %v14608_v32, -inf }
 0x2fb   : > { %1357 = vmax.xlane.f32.xlu0 %v1356_v34  ;;  %v13056_v36 = vpop.f32.mrf.mxu0 }
 0x2fd   : > { %v14612_v38 = vpop.f32.mrf.mxu0 }
 0x2fe   : > { %v1359_v40 = vsel %vm1346_vm5, %v14612_v38, -inf }
 0x2ff   : > { %1360 = vmax.xlane.f32.xlu1 %v1359_v40  ;;  %v13061_v42 = vpop.f32.mrf.mxu0 }
 0x301   : > { %v14616_v45 = vpop.f32.mrf.mxu0 }
 0x302   : > { %v1362_v48 = vsel %vm1346_vm5, %v14616_v45, -inf }
 0x303   : > { %1363 = vmax.xlane.f32.xlu0 %v1362_v48  ;;  %v13066_v49 = vpop.f32.mrf.mxu0 }
 0x305   : > { %v14620_v50 = vpop.f32.mrf.mxu0 }
 0x306   : > { %v1365_v53 = vsel %vm1346_vm5, %v14620_v50, -inf }
 0x307   : > { %1366 = vmax.xlane.f32.xlu1 %v1365_v53  ;;  %v13071_v54 = vpop.f32.mrf.mxu0 }
 0x309   : > { %v14624_v57 = vpop.f32.mrf.mxu0 }
 0x30a   : > { %v1368_v59 = vsel %vm1346_vm5, %v14624_v57, -inf }
 0x30b   : > { %1369 = vmax.xlane.f32.xlu0 %v1368_v59  ;;  %v13076_v62 = vpop.f32.mrf.mxu0 }
 0x318   : > { %2253 = vrot.lane.b32.xlu1 %v14502_v63, %s16849_s30 }
 0x31c   : > { %2411 = vrot.lane.b32.xlu1 %v14514_v5, %s16851_s25 }
 0x320   : > { %2409 = vrot.lane.b32.xlu1 %v14514_v5, %s16849_s30 }
 0x321   : > { %2175 = vrot.lane.b32.xlu0 %v14494_v60, %s16849_s30 }
 0x324   : > { %2567 = vrot.lane.b32.xlu1 %v14526_v11, %s16851_s25 }
 0x325   : > { %2333 = vrot.lane.b32.xlu0 %v14508_v2, %s16851_s25 }
 0x328   : > { %2565 = vrot.lane.b32.xlu1 %v14526_v11, %s16849_s30 }
 0x329   : > { %2331 = vrot.lane.b32.xlu0 %v14508_v2, %s16849_s30 }
 0x32c   : > { %2716 = vrot.lane.b32.xlu1 %v14588_v20, %s16849_s30 }
 0x32d   : > { %2489 = vrot.lane.b32.xlu0 %v14520_v8, %s16851_s25 }
 0x330   : > { %2870 = vrot.lane.b32.xlu1 %v14650_v1, %s16849_s30 }
 0x331   : > { %2487 = vrot.lane.b32.xlu0 %v14520_v8, %s16849_s30 }
 0x334   : > { %2947 = vrot.lane.b32.xlu1 %v14658_v4, %s16849_s30 }
 0x335   : > { %2793 = vrot.lane.b32.xlu0 %v14490_v58, %s16849_s30 }
 0x338   : > { %3101 = vrot.lane.b32.xlu1 %v14666_v61, %s16849_s30 }
 0x339   : > { %3024 = vrot.lane.b32.xlu0 %v14670_v7, %s16849_s30 }
 0x33c   : > { %3255 = vrot.lane.b32.xlu1 %v14677_v0, %s16849_s30 }
 0x33d   : > { %3178 = vrot.lane.b32.xlu0 %v14681_v12, %s16849_s30 }
 0x340   : > { %3427 = vrot.lane.b32.xlu1 %v14487_v56, %s16847_s13 }
 0x341   : > { %3349 = vrot.lane.b32.xlu0 %v14476_v51, %s16847_s13 }
 0x344   : > { %3425 = vrot.lane.b32.xlu1 %v14487_v56, %s16845_s16 }
 0x345   : > { %3347 = vrot.lane.b32.xlu0 %v14476_v51, %s16845_s16 }
 0x348   : > { %3583 = vrot.lane.b32.xlu1 %v14502_v63, %s16847_s13 }
 0x349   : > { %3505 = vrot.lane.b32.xlu0 %v14494_v60, %s16847_s13 }
 0x378   : > { %v1349_v15 = vpop.xlane.xlu0 %1348 }
 0x379   : > { %v1371_v16 = vsub.f32 %v14596_v21, %v1349_v15 }
 0x37b   : > { %v1379_v17 = vmul.f32 1.442695, %v1371_v16 }
 0x37c   : > { %v1352_v18 = vpop.xlane.xlu1 %1351 }
 0x37d   : > { %13818 = vpow2.f32 %v1379_v17  ;;  %v1372_v19 = vsub.f32 %v14600_v24, %v1352_v18 }
 0x37f   : > { %v1381_v22 = vmul.f32 1.442695, %v1372_v19 }
 0x380   : > { %v1355_v23 = vpop.xlane.xlu0 %1354 }
 0x381   : > { %13820 = vpow2.f32 %v1381_v22  ;;  %v1373_v25 = vsub.f32 %v14604_v28, %v1355_v23 }
 0x383   : > { %v1383_v26 = vmul.f32 1.442695, %v1373_v25 }
 0x384   : > { %v1358_v29 = vpop.xlane.xlu0 %1357 }
 0x385   : > { %13822 = vpow2.f32 %v1383_v26  ;;  %v1374_v30 = vsub.f32 %v14608_v32, %v1358_v29 }
 0x387   : > { %v1385_v34 = vmul.f32 1.442695, %v1374_v30 }
 0x388   : > { %v1361_v36 = vpop.xlane.xlu1 %1360 }
 0x389   : > { %13824 = vpow2.f32 %v1385_v34  ;;  %v1375_v21 = vsub.f32 %v14612_v38, %v1361_v36 }
 0x38a   : > { %v14716_v40 = vpop.eup %13818 }
 0x38b   : > { %v1387_v42 = vmul.f32 1.442695, %v1375_v21  ;;  %13080 = vmatmul.mubr.msk.f32.vlgmr.msra.gmra.mxu0 %vm1346_vm5, %v14716_v40 }
 0x38c   : > { %13088 = vmatpush3.msra.mxu0 %v14650_v1  ;;  %v1364_v24 = vpop.xlane.xlu0 %1363  ;;  %13089 = vmatprep.mubr.msk.f32.mxu0 %vm14202_vm3, %v16829_v27 }
 0x38d   : > { %13826 = vpow2.f32 %v1387_v42  ;;  %v1376_v28 = vsub.f32 %v14616_v45, %v1364_v24  ;;  %13097 = vmatprep.subr.mxu0 %v16829_v27 }
 0x38e   : > { %v14725_v32 = vpop.eup %13820 }
 0x38f   : > { %v1389_v38 = vmul.f32 1.442695, %v1376_v28  ;;  %13085 = vmatmul.mubr.msk.f32.vlgmr.msra.gmra.mxu1 %vm1346_vm5, %v14725_v32 }
 0x390   : > { %13093 = vmatpush3.msra.mxu1 %v14658_v4  ;;  %v1367_v48 = vpop.xlane.xlu1 %1366  ;;  %13094 = vmatprep.mubr.msk.f32.mxu1 %vm14202_vm3, %v16829_v27 }
 0x391   : > { %13828 = vpow2.f32 %v1389_v38  ;;  %v1377_v49 = vsub.f32 %v14620_v50, %v1367_v48  ;;  %13102 = vmatprep.subr.mxu1 %v16829_v27 }
 0x392   : > { %v14734_v45 = vpop.eup %13822 }
 0x393   : > { %v1391_v53 = vmul.f32 1.442695, %v1377_v49  ;;  %13090 = vmatmul.mubr.msk.f32.vlgmr.msra.gmra.mxu0 %vm1346_vm5, %v14734_v45 }
 0x394   : > { %13098 = vmatpush3.msra.mxu0 %v14670_v7  ;;  %v1370_v54 = vpop.xlane.xlu0 %1369  ;;  %13099 = vmatprep.mubr.msk.f32.mxu0 %vm14202_vm3, %v16829_v27  ;;  %v2254_v59 = vpop.permute.xlu1 %2253 }
 0x395   : > { %13830 = vpow2.f32 %v1391_v53  ;;  %v1378_v62 = vsub.f32 %v14624_v57, %v1370_v54  ;;  %13107 = vmatprep.subr.mxu0 %v16829_v27 }
 0x396   : > { %v14743_v50 = vpop.eup %13824 }
 0x397   : > { %v1393_v10 = vmul.f32 1.442695, %v1378_v62  ;;  %13095 = vmatmul.mubr.msk.f32.vlgmr.msra.gmra.mxu1 %vm1346_vm5, %v14743_v50 }
 0x398   : > { %13103 = vmatpush3.msra.mxu1 %v14666_v61  ;;  %13104 = vmatprep.mubr.msk.f32.mxu1 %vm14202_vm3, %v16829_v27  ;;  %v2176_v15 = vpop.permute.xlu0 %2175  ;;  %v2412_v57 = vpop.permute.xlu1 %2411 }
 0x399   : > { %13832 = vpow2.f32 %v1393_v10  ;;  %13112 = vmatprep.subr.mxu1 %v16829_v27 }
 0x39a   : > { %v14751_v16 = vpop.eup %13826 }
 0x39b   : > { %13100 = vmatmul.mubr.msk.f32.vlgmr.msra.gmra.mxu0 %vm1346_vm5, %v14751_v16 }
 0x39c   : > { %13108 = vmatpush3.msra.mxu0 %v14681_v12  ;;  %13109 = vmatprep.mubr.msk.f32.mxu0 %vm14202_vm3, %v16829_v27  ;;  %v2334_v18 = vpop.permute.xlu0 %2333  ;;  %v2410_v19 = vpop.permute.xlu1 %2409 }
 0x39d   : > { %13117 = vmatprep.subr.mxu0 %v16829_v27 }
 0x39e   : > { %v14759_v17 = vpop.eup %13828 }
 0x39f   : > { %13105 = vmatmul.mubr.msk.f32.vlgmr.msra.gmra.mxu1 %vm1346_vm5, %v14759_v17 }
 0x3a0   : > { %13113 = vmatpush3.msra.mxu1 %v14677_v0  ;;  %13114 = vmatprep.mubr.msk.f32.mxu1 %vm14202_vm3, %v16829_v27  ;;  %v2332_v23 = vpop.permute.xlu0 %2331  ;;  %v2568_v26 = vpop.permute.xlu1 %2567 }
 0x3a1   : > { %13122 = vmatprep.subr.mxu1 %v16829_v27 }
 0x3a2   : > { %v14767_v22 = vpop.eup %13830 }
 0x3a3   : > { %13110 = vmatmul.mubr.msk.f32.vlgmr.msra.gmra.mxu0 %vm1346_vm5, %v14767_v22 }
 0x3a4   : > { %13118 = vmatpush3.xpose.msk.msra.mxu0 %vm732_vm4, %v14699_v55  ;;  %13119 = vmatprep.mubr.msk.f32.mxu0 %vm14202_vm3, %v16829_v27  ;;  %v2490_v55 = vpop.permute.xlu0 %2489 }
 0x3a5   : > { %13127 = vmatprep.subr.mxu0 %v16829_v27 }
 0x3a6   : > { %v14776_v25 = vpop.eup %13832 }
 0x3a7   : > { %13115 = vmatmul.mubr.msk.f32.vlgmr.msra.gmra.mxu1 %vm1346_vm5, %v14776_v25  ;;  %13120 = vmatmul.mubr.msk.f32.vlgmr.msra.gmra.mxu0 %vm732_vm4, %v14701_v3  ;;  %v2566_v3 = vpop.permute.xlu1 %2565 }
 0x3a8   : > { %13123 = vmatpush3.xpose.msk.msra.mxu1 %vm732_vm4, %v14703_v6  ;;  %13128 = vmatpush3.xpose.msk.msra.mxu0 %vm732_vm4, %v14707_v13  ;;  %v2488_v6 = vpop.permute.xlu0 %2487 }
 0x3a9   : > { %13124 = vmatprep.mubr.msk.f32.mxu1 %vm14202_vm3, %v16829_v27  ;;  %13129 = vmatprep.mubr.msk.f32.mxu0 %vm14202_vm3, %v16829_v27 }
 0x3aa   : > { %13132 = vmatprep.subr.mxu1 %v16829_v27  ;;  %13137 = vmatprep.subr.mxu0 %v16829_v27 }
 0x3ab   : > { %13125 = vmatmul.mubr.msk.f32.vlgmr.msra.gmra.mxu1 %vm732_vm4, %v14705_v9  ;;  %13130 = vmatmul.mubr.msk.f32.vlgmr.msra.gmra.mxu0 %vm732_vm4, %v2176_v15  ;;  %v2717_v9 = vpop.permute.xlu1 %2716 }
 0x3ac   : > { %13133 = vmatpush3.xpose.msk.msra.mxu1 %vm732_vm4, %v14709_v14  ;;  %13138 = vmatpush3.xpose.msk.msra.mxu0 %vm732_vm4, %v2334_v18  ;;  %v2794_v13 = vpop.permute.xlu0 %2793 }
 0x3ad   : > { %13134 = vmatprep.mubr.msk.f32.mxu1 %vm14202_vm3, %v16829_v27  ;;  %13139 = vmatprep.mubr.msk.f32.mxu0 %vm14202_vm3, %v16829_v27 }
 0x3ae   : > { %13142 = vmatprep.subr.mxu1 %v16829_v27  ;;  %13147 = vmatprep.subr.mxu0 %v16829_v27 }
 0x3af   : > { %13135 = vmatmul.mubr.msk.f32.vlgmr.msra.gmra.mxu1 %vm732_vm4, %v2254_v59  ;;  %13140 = vmatmul.mubr.msk.f32.vlgmr.msra.gmra.mxu0 %vm732_vm4, %v2332_v23 }
 0x3b0   : > { %13143 = vmatpush3.xpose.msk.msra.mxu1 %vm732_vm4, %v2412_v57  ;;  %13148 = vmatpush3.xpose.msk.msra.mxu0 %vm732_vm4, %v2490_v55 }
 0x3b1   : > { %13144 = vmatprep.mubr.msk.f32.mxu1 %vm14202_vm3, %v16829_v27  ;;  %13149 = vmatprep.mubr.msk.f32.mxu0 %vm14202_vm3, %v16829_v27 }
 0x3b2   : > { %13152 = vmatprep.subr.mxu1 %v16829_v27  ;;  %13157 = vmatprep.subr.mxu0 %v16829_v27 }
 0x3b3   : > { %13145 = vmatmul.mubr.msk.f32.vlgmr.msra.gmra.mxu1 %vm732_vm4, %v2410_v19  ;;  %13150 = vmatmul.mubr.msk.f32.vlgmr.msra.gmra.mxu0 %vm732_vm4, %v2488_v6 }
 0x3b4   : > { %13153 = vmatpush3.xpose.msk.msra.mxu1 %vm732_vm4, %v2568_v26  ;;  %13158 = vmatpush3.msra.mxu0 %v2717_v9 }
 0x3b5   : > { %13154 = vmatprep.mubr.msk.f32.mxu1 %vm14202_vm3, %v16829_v27  ;;  %13162 = vmatprep.subr.mxu1 %v16829_v27 }
 0x3b6   : > { %13159 = vmatprep.mubr.msk.f32.mxu0 %vm14202_vm3, %v16829_v27  ;;  %13167 = vmatprep.subr.mxu0 %v16829_v27 }
 0x3b7   : > { %13155 = vmatmul.mubr.msk.f32.vlgmr.msra.gmra.mxu1 %vm732_vm4, %v2566_v3 }
 0x3b8   : > { %13163 = vmatpush3.msra.mxu1 %v2794_v13  ;;  %13164 = vmatprep.mubr.msk.f32.mxu1 %vm14202_vm3, %v16829_v27 }
 0x3b9   : > { %13172 = vmatprep.subr.mxu1 %v16829_v27 }
 0x44b   : > { %v14827_v14 = vpop.f32.mrf.mxu0 }
 0x44d   : > { %v13081_v29 = vpop.f32.mrf.mxu0 }
 0x44f   : > { %v14829_v30 = vpop.f32.mrf.mxu1 }
 0x451   : > { %v13086_v34 = vpop.f32.mrf.mxu1 }
 0x453   : > { %v14831_v36 = vpop.f32.mrf.mxu0 }
 0x455   : > { %v13091_v21 = vpop.f32.mrf.mxu0 }
 0x457   : > { %v14833_v42 = vpop.f32.mrf.mxu1 }
 0x458   : > { %16877 = vst [vmem:[#allocation17_spill] sm:$0xff] %v14833_v42 }
 0x459   : > { %v13096_v24 = vpop.f32.mrf.mxu1 }
 0x45b   : > { %v14835_v28 = vpop.f32.mrf.mxu0 }
 0x45c   : > { %16878 = vst [vmem:[#allocation18_spill] sm:$0xff] %v14835_v28 }
 0x45d   : > { %v13101_v38 = vpop.f32.mrf.mxu0 }
 0x45f   : > { %v14837_v48 = vpop.f32.mrf.mxu1 }
 0x460   : > { %16879 = vst [vmem:[#allocation19_spill] sm:$0xff] %v14837_v48 }
 0x461   : > { %v13106_v49 = vpop.f32.mrf.mxu1 }
 0x463   : > { %v14839_v53 = vpop.f32.mrf.mxu0 }
 0x464   : > { %16880 = vst [vmem:[#allocation20_spill] sm:$0xff] %v14839_v53 }
 0x465   : > { %v13111_v54 = vpop.f32.mrf.mxu0 }
 0x467   : > { %v14841_v59 = vpop.f32.mrf.mxu1  ;;  %v14843_v62 = vpop.f32.mrf.mxu0 }
 0x468   : > { %16881 = vst [vmem:[#allocation21_spill] sm:$0xff] %v14841_v59  ;;  %v2643_v10 = vsel %vm1346_vm5, %v14843_v62, -inf }
 0x469   : > { %2644 = vmax.xlane.f32.xlu0 %v2643_v10  ;;  %v13116_v15 = vpop.f32.mrf.mxu1  ;;  %v13121_v57 = vpop.f32.mrf.mxu0 }
 0x46b   : > { %v14847_v18 = vpop.f32.mrf.mxu1  ;;  %v14849_v19 = vpop.f32.mrf.mxu0 }
 0x46c   : > { %v2646_v23 = vsel %vm1346_vm5, %v14847_v18, -inf  ;;  %v2649_v26 = vsel %vm1346_vm5, %v14849_v19, -inf }
 0x46d   : > { %2647 = vmax.xlane.f32.xlu1 %v2646_v23  ;;  %v13126_v55 = vpop.f32.mrf.mxu1  ;;  %2650 = vmax.xlane.f32.xlu0 %v2649_v26  ;;  %v13131_v3 = vpop.f32.mrf.mxu0 }
 0x46e   : > { %v2871_v55 = vpop.permute.xlu1 %2870 }
 0x46f   : > { %v14855_v6 = vpop.f32.mrf.mxu1  ;;  %v14857_v9 = vpop.f32.mrf.mxu0 }
 0x470   : > { %v2652_v13 = vsel %vm1346_vm5, %v14855_v6, -inf  ;;  %v2655_v29 = vsel %vm1346_vm5, %v14857_v9, -inf }
 0x471   : > { %v13136_v34 = vpop.f32.mrf.mxu1  ;;  %2653 = vmax.xlane.f32.xlu0 %v2652_v13  ;;  %2656 = vmax.xlane.f32.xlu1 %v2655_v29  ;;  %v13141_v21 = vpop.f32.mrf.mxu0 }
 0x472   : > { %v2948_v3 = vpop.permute.xlu1 %2947  ;;  %v3025_v13 = vpop.permute.xlu0 %3024 }
 0x473   : > { %v14863_v24 = vpop.f32.mrf.mxu1  ;;  %v14865_v38 = vpop.f32.mrf.mxu0 }
 0x474   : > { %v2658_v49 = vsel %vm1346_vm5, %v14863_v24, -inf  ;;  %v2661_v54 = vsel %vm1346_vm5, %v14865_v38, -inf }
 0x475   : > { %v13146_v10 = vpop.f32.mrf.mxu1  ;;  %2659 = vmax.xlane.f32.xlu0 %v2658_v49  ;;  %2662 = vmax.xlane.f32.xlu1 %v2661_v54  ;;  %v13151_v15 = vpop.f32.mrf.mxu0 }
 0x476   : > { %v14911_v29 = vpop.permute.xlu1 %3101  ;;  %v14913_v34 = vpop.permute.xlu0 %3178 }
 0x477   : > { %v14871_v57 = vpop.f32.mrf.mxu1 }
 0x478   : > { %v2664_v23 = vsel %vm1346_vm5, %v14871_v57, -inf }
 0x479   : > { %v13156_v26 = vpop.f32.mrf.mxu1  ;;  %2665 = vmax.xlane.f32.xlu0 %v2664_v23 }
 0x47a   : > { %v14915_v21 = vpop.permute.xlu1 %3255  ;;  %v14917_v49 = vpop.permute.xlu0 %3349 }
 0x47e   : > { %v14919_v54 = vpop.permute.xlu1 %3427  ;;  %v14921_v10 = vpop.permute.xlu0 %3347 }
 0x482   : > { %v14923_v15 = vpop.permute.xlu1 %3425  ;;  %v14925_v23 = vpop.permute.xlu0 %3505 }
 0x486   : > { %3581 = vrot.lane.b32.xlu1 %v14502_v63, %s16845_s16  ;;  %v14927_v26 = vpop.permute.xlu1 %3583 }
 0x48a   : > { %3739 = vrot.lane.b32.xlu1 %v14514_v5, %s16847_s13 }
 0x48e   : > { %3737 = vrot.lane.b32.xlu1 %v14514_v5, %s16845_s16 }
 0x48f   : > { %3503 = vrot.lane.b32.xlu0 %v14494_v60, %s16845_s16 }
 0x492   : > { %3895 = vrot.lane.b32.xlu1 %v14526_v11, %s16847_s13 }
 0x493   : > { %3661 = vrot.lane.b32.xlu0 %v14508_v2, %s16847_s13 }
 0x496   : > { %3893 = vrot.lane.b32.xlu1 %v14526_v11, %s16845_s16 }
 0x497   : > { %3659 = vrot.lane.b32.xlu0 %v14508_v2, %s16845_s16 }
 0x49a   : > { %4043 = vrot.lane.b32.xlu1 %v14588_v20, %s16845_s16 }
 0x49b   : > { %3817 = vrot.lane.b32.xlu0 %v14520_v8, %s16847_s13 }
 0x49e   : > { %4195 = vrot.lane.b32.xlu1 %v14650_v1, %s16845_s16 }
 0x49f   : > { %3815 = vrot.lane.b32.xlu0 %v14520_v8, %s16845_s16 }
 0x4a2   : > { %4271 = vrot.lane.b32.xlu1 %v14658_v4, %s16845_s16 }
 0x4a3   : > { %4119 = vrot.lane.b32.xlu0 %v14490_v58, %s16845_s16 }
 0x4a6   : > { %4423 = vrot.lane.b32.xlu1 %v14666_v61, %s16845_s16 }
 0x4a7   : > { %4347 = vrot.lane.b32.xlu0 %v14670_v7, %s16845_s16 }
 0x4aa   : > { %4575 = vrot.lane.b32.xlu1 %v14677_v0, %s16845_s16 }
 0x4ab   : > { %4499 = vrot.lane.b32.xlu0 %v14681_v12, %s16845_s16  ;;  %s16918_s16 = smov 80  }
 0x4f2   : > { %v2645_v52 = vpop.xlane.xlu0 %2644 }
 0x4f3   : > { %v2667_v47 = vsub.f32 %v14843_v62, %v2645_v52 }
 0x4f5   : > { %v2675_v27 = vmul.f32 1.442695, %v2667_v47 }
 0x4f6   : > { %v2648_v46 = vpop.xlane.xlu1 %2647  ;;  %v2651_v43 = vpop.xlane.xlu0 %2650 }
 0x4f7   : > { %13834 = vpow2.f32 %v2675_v27  ;;  %v2668_v44 = vsub.f32 %v14847_v18, %v2648_v46  ;;  %v2669_v39 = vsub.f32 %v14849_v19, %v2651_v43 }
 0x4f9   : > { %v2677_v41 = vmul.f32 1.442695, %v2668_v44  ;;  %v2679_v37 = vmul.f32 1.442695, %v2669_v39 }
 0x4fa   : > { %v2657_v35 = vpop.xlane.xlu1 %2656  ;;  %v2654_v31 = vpop.xlane.xlu0 %2653 }
 0x4fb   : > { %13836 = vpow2.f32 %v2677_v41  ;;  %v2671_v33 = vsub.f32 %v14857_v9, %v2657_v35  ;;  %v2670_v59 = vsub.f32 %v14855_v6, %v2654_v31 }
 0x4fc   : > { %13838 = vpow2.f32 %v2679_v37  ;;  %v16882_v37 = vmov 0.0  }
 0x4fd   : > { %v2683_v53 = vmul.f32 1.442695, %v2671_v33  ;;  %v2681_v52 = vmul.f32 1.442695, %v2670_v59 }
 0x4fe   : > { %v2663_v47 = vpop.xlane.xlu1 %2662  ;;  %v2660_v62 = vpop.xlane.xlu0 %2659 }
 0x4ff   : > { %13840 = vpow2.f32 %v2683_v53  ;;  %v2673_v27 = vsub.f32 %v14865_v38, %v2663_v47  ;;  %v2672_v46 = vsub.f32 %v14863_v24, %v2660_v62 }
 0x500   : > { %13842 = vpow2.f32 %v2681_v52 }
 0x501   : > { %v2687_v43 = vmul.f32 1.442695, %v2673_v27  ;;  %v2685_v39 = vmul.f32 1.442695, %v2672_v46 }
 0x502   : > { %v2666_v44 = vpop.xlane.xlu0 %2665  ;;  %v3582_v31 = vpop.permute.xlu1 %3581 }
 0x503   : > { %13844 = vpow2.f32 %v2687_v43  ;;  %v2674_v41 = vsub.f32 %v14871_v57, %v2666_v44 }
 0x504   : > { %v14937_v35 = vpop.eup %13834  ;;  %13846 = vpow2.f32 %v2685_v39 }
 0x505   : > { %v2689_v33 = vmul.f32 1.442695, %v2674_v41  ;;  %13160 = vmatmul.mubr.msk.f32.vlgmr.msra.gmra.mxu0 %vm1346_vm5, %v14937_v35 }
 0x506   : > { %13168 = vmatpush3.msra.mxu0 %v2871_v55  ;;  %13169 = vmatprep.mubr.msk.f32.mxu0 %vm14202_vm3, %v16882_v37  ;;  %v3504_v59 = vpop.permute.xlu0 %3503  ;;  %v3740_v19 = vpop.permute.xlu1 %3739 }
 0x507   : > { %13848 = vpow2.f32 %v2689_v33  ;;  %13177 = vmatprep.subr.mxu0 %v16882_v37 }
 0x508   : > { %v14944_v53 = vpop.eup %13836 }
 0x509   : > { %v14946_v18 = vpop.eup %13838  ;;  %13165 = vmatmul.mubr.msk.f32.vlgmr.msra.gmra.mxu1 %vm1346_vm5, %v14944_v53 }
 0x50a   : > { %13170 = vmatmul.mubr.msk.f32.vlgmr.msra.gmra.mxu0 %vm1346_vm5, %v14946_v18  ;;  %13173 = vmatpush3.msra.mxu1 %v2948_v3  ;;  %v3662_v24 = vpop.permute.xlu0 %3661  ;;  %v3738_v57 = vpop.permute.xlu1 %3737 }
 0x50b   : > { %13178 = vmatpush3.msra.mxu0 %v3025_v13  ;;  %13174 = vmatprep.mubr.msk.f32.mxu1 %vm14202_vm3, %v16882_v37 }
 0x50c   : > { %v14954_v6 = vpop.eup %13840  ;;  %13179 = vmatprep.mubr.msk.f32.mxu0 %vm14202_vm3, %v16882_v37  ;;  %13182 = vmatprep.subr.mxu1 %v16882_v37 }
 0x50d   : > { %v14959_v9 = vpop.eup %13842  ;;  %13187 = vmatprep.subr.mxu0 %v16882_v37 }
 0x50e   : > { %13175 = vmatmul.mubr.msk.f32.vlgmr.msra.gmra.mxu1 %vm1346_vm5, %v14959_v9  ;;  %13180 = vmatmul.mubr.msk.f32.vlgmr.msra.gmra.mxu0 %vm1346_vm5, %v14954_v6  ;;  %v3660_v13 = vpop.permute.xlu0 %3659 }
 0x50f   : > { %13183 = vmatpush3.msra.mxu1 %v14911_v29  ;;  %13188 = vmatpush3.msra.mxu0 %v14913_v34  ;;  %v3896_v29 = vpop.permute.xlu1 %3895 }
 0x510   : > { %v14968_v38 = vpop.eup %13844  ;;  %13184 = vmatprep.mubr.msk.f32.mxu1 %vm14202_vm3, %v16882_v37  ;;  %13189 = vmatprep.mubr.msk.f32.mxu0 %vm14202_vm3, %v16882_v37 }
 0x511   : > { %v14974_v55 = vpop.eup %13846  ;;  %13192 = vmatprep.subr.mxu1 %v16882_v37  ;;  %13197 = vmatprep.subr.mxu0 %v16882_v37 }
 0x512   : > { %13185 = vmatmul.mubr.msk.f32.vlgmr.msra.gmra.mxu1 %vm1346_vm5, %v14974_v55  ;;  %13190 = vmatmul.mubr.msk.f32.vlgmr.msra.gmra.mxu0 %vm1346_vm5, %v14968_v38  ;;  %v3818_v34 = vpop.permute.xlu0 %3817 }
 0x513   : > { %13193 = vmatpush3.msra.mxu1 %v14915_v21  ;;  %13198 = vmatpush3.xpose.msk.msra.mxu0 %vm732_vm4, %v14917_v49  ;;  %v3894_v21 = vpop.permute.xlu1 %3893 }
 0x514   : > { %v14985_v3 = vpop.eup %13848  ;;  %13194 = vmatprep.mubr.msk.f32.mxu1 %vm14202_vm3, %v16882_v37  ;;  %13199 = vmatprep.mubr.msk.f32.mxu0 %vm14202_vm3, %v16882_v37 }
 0x515   : > { %13202 = vmatprep.subr.mxu1 %v16882_v37  ;;  %13207 = vmatprep.subr.mxu0 %v16882_v37 }
 0x516   : > { %13195 = vmatmul.mubr.msk.f32.vlgmr.msra.gmra.mxu1 %vm1346_vm5, %v14985_v3  ;;  %13200 = vmatmul.mubr.msk.f32.vlgmr.msra.gmra.mxu0 %vm732_vm4, %v14921_v10  ;;  %v3816_v49 = vpop.permute.xlu0 %3815 }
 0x517   : > { %13203 = vmatpush3.xpose.msk.msra.mxu1 %vm732_vm4, %v14919_v54  ;;  %13208 = vmatpush3.xpose.msk.msra.mxu0 %vm732_vm4, %v14925_v23  ;;  %v4044_v54 = vpop.permute.xlu1 %4043 }
 0x518   : > { %13204 = vmatprep.mubr.msk.f32.mxu1 %vm14202_vm3, %v16882_v37  ;;  %13209 = vmatprep.mubr.msk.f32.mxu0 %vm14202_vm3, %v16882_v37 }
 0x519   : > { %13212 = vmatprep.subr.mxu1 %v16882_v37  ;;  %13217 = vmatprep.subr.mxu0 %v16882_v37 }
 0x51a   : > { %13205 = vmatmul.mubr.msk.f32.vlgmr.msra.gmra.mxu1 %vm732_vm4, %v14923_v15  ;;  %13210 = vmatmul.mubr.msk.f32.vlgmr.msra.gmra.mxu0 %vm732_vm4, %v3504_v59  ;;  %v4120_v10 = vpop.permute.xlu0 %4119 }
 0x51b   : > { %13213 = vmatpush3.xpose.msk.msra.mxu1 %vm732_vm4, %v14927_v26  ;;  %13218 = vmatpush3.xpose.msk.msra.mxu0 %vm732_vm4, %v3662_v24 }
 0x51c   : > { %13214 = vmatprep.mubr.msk.f32.mxu1 %vm14202_vm3, %v16882_v37  ;;  %13219 = vmatprep.mubr.msk.f32.mxu0 %vm14202_vm3, %v16882_v37 }
 0x51d   : > { %13222 = vmatprep.subr.mxu1 %v16882_v37  ;;  %13227 = vmatprep.subr.mxu0 %v16882_v37 }
 0x51e   : > { %13215 = vmatmul.mubr.msk.f32.vlgmr.msra.gmra.mxu1 %vm732_vm4, %v3582_v31  ;;  %13220 = vmatmul.mubr.msk.f32.vlgmr.msra.gmra.mxu0 %vm732_vm4, %v3660_v13 }
 0x51f   : > { %13223 = vmatpush3.xpose.msk.msra.mxu1 %vm732_vm4, %v3740_v19  ;;  %13228 = vmatpush3.xpose.msk.msra.mxu0 %vm732_vm4, %v3818_v34 }
 0x520   : > { %13224 = vmatprep.mubr.msk.f32.mxu1 %vm14202_vm3, %v16882_v37  ;;  %13229 = vmatprep.mubr.msk.f32.mxu0 %vm14202_vm3, %v16882_v37 }
 0x521   : > { %13232 = vmatprep.subr.mxu1 %v16882_v37  ;;  %13237 = vmatprep.subr.mxu0 %v16882_v37 }
 0x522   : > { %13225 = vmatmul.mubr.msk.f32.vlgmr.msra.gmra.mxu1 %vm732_vm4, %v3738_v57  ;;  %13230 = vmatmul.mubr.msk.f32.vlgmr.msra.gmra.mxu0 %vm732_vm4, %v3816_v49 }
 0x523   : > { %13233 = vmatpush3.xpose.msk.msra.mxu1 %vm732_vm4, %v3896_v29  ;;  %13238 = vmatpush3.msra.mxu0 %v4044_v54 }
 0x524   : > { %13234 = vmatprep.mubr.msk.f32.mxu1 %vm14202_vm3, %v16882_v37  ;;  %13242 = vmatprep.subr.mxu1 %v16882_v37 }
 0x525   : > { %13239 = vmatprep.mubr.msk.f32.mxu0 %vm14202_vm3, %v16882_v37  ;;  %13247 = vmatprep.subr.mxu0 %v16882_v37 }
 0x526   : > { %13235 = vmatmul.mubr.msk.f32.vlgmr.msra.gmra.mxu1 %vm732_vm4, %v3894_v21 }
 0x527   : > { %13243 = vmatpush3.msra.mxu1 %v4120_v10  ;;  %13244 = vmatprep.mubr.msk.f32.mxu1 %vm14202_vm3, %v16882_v37 }
 0x528   : > { %13252 = vmatprep.subr.mxu1 %v16882_v37 }
 0x5c5   : > { %v15042_v15 = vpop.f32.mrf.mxu0 }
 0x5c7   : > { %v13161_v23 = vpop.f32.mrf.mxu0 }
 0x5c9   : > { %v15044_v26 = vpop.f32.mrf.mxu1 }
 0x5ca   : > { %v15046_v52 = vpop.f32.mrf.mxu0 }
 0x5cb   : > { %v13166_v47 = vpop.f32.mrf.mxu1 }
 0x5cc   : > { %v13171_v62 = vpop.f32.mrf.mxu0 }
 0x5ce   : > { %v15048_v27 = vpop.f32.mrf.mxu1  ;;  %v15050_v46 = vpop.f32.mrf.mxu0 }
 0x5d0   : > { %v13176_v43 = vpop.f32.mrf.mxu1  ;;  %v13181_v39 = vpop.f32.mrf.mxu0 }
 0x5d2   : > { %v15052_v44 = vpop.f32.mrf.mxu1  ;;  %v15054_v41 = vpop.f32.mrf.mxu0 }
 0x5d4   : > { %v13186_v31 = vpop.f32.mrf.mxu1  ;;  %v13191_v33 = vpop.f32.mrf.mxu0 }
 0x5d6   : > { %v15056_v59 = vpop.f32.mrf.mxu1  ;;  %v15058_v19 = vpop.f32.mrf.mxu0 }
 0x5d7   : > { %v3971_v24 = vsel %vm1346_vm5, %v15058_v19, -inf }
 0x5d8   : > { %3972 = vmax.xlane.f32.xlu0 %v3971_v24  ;;  %v13196_v57 = vpop.f32.mrf.mxu1  ;;  %v13201_v13 = vpop.f32.mrf.mxu0 }
 0x5da   : > { %v15062_v29 = vpop.f32.mrf.mxu1  ;;  %v15064_v34 = vpop.f32.mrf.mxu0 }
 0x5db   : > { %v3974_v21 = vsel %vm1346_vm5, %v15062_v29, -inf  ;;  %v3977_v49 = vsel %vm1346_vm5, %v15064_v34, -inf }
 0x5dc   : > { %3975 = vmax.xlane.f32.xlu1 %v3974_v21  ;;  %v13206_v54 = vpop.f32.mrf.mxu1  ;;  %3978 = vmax.xlane.f32.xlu0 %v3977_v49  ;;  %v13211_v10 = vpop.f32.mrf.mxu0 }
 0x5de   : > { %v15070_v23 = vpop.f32.mrf.mxu1  ;;  %v15072_v47 = vpop.f32.mrf.mxu0 }
 0x5df   : > { %v3980_v62 = vsel %vm1346_vm5, %v15070_v23, -inf  ;;  %v3983_v43 = vsel %vm1346_vm5, %v15072_v47, -inf }
 0x5e0   : > { %v13216_v39 = vpop.f32.mrf.mxu1  ;;  %3981 = vmax.xlane.f32.xlu0 %v3980_v62  ;;  %3984 = vmax.xlane.f32.xlu1 %v3983_v43  ;;  %v13221_v31 = vpop.f32.mrf.mxu0 }
 0x5e2   : > { %v15078_v33 = vpop.f32.mrf.mxu1  ;;  %v15080_v24 = vpop.f32.mrf.mxu0 }
 0x5e3   : > { %v3986_v57 = vsel %vm1346_vm5, %v15078_v33, -inf  ;;  %v3989_v13 = vsel %vm1346_vm5, %v15080_v24, -inf }
 0x5e4   : > { %v13226_v21 = vpop.f32.mrf.mxu1  ;;  %3987 = vmax.xlane.f32.xlu0 %v3986_v57  ;;  %3990 = vmax.xlane.f32.xlu1 %v3989_v13  ;;  %v13231_v49 = vpop.f32.mrf.mxu0 }
 0x5e6   : > { %v15086_v54 = vpop.f32.mrf.mxu1 }
 0x5e7   : > { %v3992_v10 = vsel %vm1346_vm5, %v15086_v54, -inf }
 0x5e8   : > { %v13236_v62 = vpop.f32.mrf.mxu1  ;;  %3993 = vmax.xlane.f32.xlu0 %v3992_v10 }
 0x5f5   : > { %4747 = vrot.lane.b32.xlu1 %v14487_v56, %s16843_s29 }
 0x5f9   : > { %4745 = vrot.lane.b32.xlu1 %v14487_v56, %s16841_s12 }
 0x5fd   : > { %4903 = vrot.lane.b32.xlu1 %v14502_v63, %s16843_s29 }
 0x5fe   : > { %4669 = vrot.lane.b32.xlu0 %v14476_v51, %s16843_s29 }
 0x601   : > { %4901 = vrot.lane.b32.xlu1 %v14502_v63, %s16841_s12 }
 0x602   : > { %4667 = vrot.lane.b32.xlu0 %v14476_v51, %s16841_s12  ;;  %v4196_v51 = vpop.permute.xlu1 %4195 }
 0x605   : > { %5059 = vrot.lane.b32.xlu1 %v14514_v5, %s16843_s29 }
 0x606   : > { %4825 = vrot.lane.b32.xlu0 %v14494_v60, %s16843_s29  ;;  %v4272_v56 = vpop.permute.xlu1 %4271 }
 0x609   : > { %5057 = vrot.lane.b32.xlu1 %v14514_v5, %s16841_s12 }
 0x60a   : > { %4823 = vrot.lane.b32.xlu0 %v14494_v60, %s16841_s12  ;;  %v4348_v60 = vpop.permute.xlu0 %4347  ;;  %v4424_v63 = vpop.permute.xlu1 %4423 }
 0x60d   : > { %5215 = vrot.lane.b32.xlu1 %v14526_v11, %s16843_s29 }
 0x60e   : > { %4981 = vrot.lane.b32.xlu0 %v14508_v2, %s16843_s29  ;;  %v15130_v5 = vpop.permute.xlu1 %4575 }
 0x611   : > { %5213 = vrot.lane.b32.xlu1 %v14526_v11, %s16841_s12 }
 0x612   : > { %4979 = vrot.lane.b32.xlu0 %v14508_v2, %s16841_s12  ;;  %v4500_v2 = vpop.permute.xlu0 %4499 }
 0x615   : > { %5363 = vrot.lane.b32.xlu1 %v14588_v20, %s16841_s12 }
 0x616   : > { %5137 = vrot.lane.b32.xlu0 %v14520_v8, %s16843_s29 }
 0x619   : > { %5515 = vrot.lane.b32.xlu1 %v14650_v1, %s16841_s12 }
 0x61a   : > { %5135 = vrot.lane.b32.xlu0 %v14520_v8, %s16841_s12 }
 0x61d   : > { %5591 = vrot.lane.b32.xlu1 %v14658_v4, %s16841_s12 }
 0x61e   : > { %5439 = vrot.lane.b32.xlu0 %v14490_v58, %s16841_s12 }
 0x661   : > { %v3973_v11 = vpop.xlane.xlu0 %3972 }
 0x662   : > { %v3995_v20 = vsub.f32 %v15058_v19, %v3973_v11 }
 0x664   : > { %v4003_v1 = vmul.f32 1.442695, %v3995_v20 }
 0x665   : > { %v3976_v43 = vpop.xlane.xlu1 %3975  ;;  %v3979_v39 = vpop.xlane.xlu0 %3978 }
 0x666   : > { %13850 = vpow2.f32 %v4003_v1  ;;  %v3996_v8 = vsub.f32 %v15062_v29, %v3976_v43  ;;  %v3997_v4 = vsub.f32 %v15064_v34, %v3979_v39 }
 0x668   : > { %v4005_v31 = vmul.f32 1.442695, %v3996_v8  ;;  %v4007_v58 = vmul.f32 1.442695, %v3997_v4 }
 0x669   : > { %v3985_v57 = vpop.xlane.xlu1 %3984  ;;  %v3982_v13 = vpop.xlane.xlu0 %3981 }
 0x66a   : > { %13852 = vpow2.f32 %v4005_v31  ;;  %v3999_v21 = vsub.f32 %v15072_v47, %v3985_v57  ;;  %v3998_v49 = vsub.f32 %v15070_v23, %v3982_v13 }
 0x66b   : > { %13854 = vpow2.f32 %v4007_v58 }
 0x66c   : > { %v4011_v10 = vmul.f32 1.442695, %v3999_v21  ;;  %v4009_v19 = vmul.f32 1.442695, %v3998_v49 }
 0x66d   : > { %v3991_v62 = vpop.xlane.xlu1 %3990  ;;  %v3988_v11 = vpop.xlane.xlu0 %3987 }
 0x66e   : > { %13856 = vpow2.f32 %v4011_v10  ;;  %v4001_v20 = vsub.f32 %v15080_v24, %v3991_v62  ;;  %v4000_v29 = vsub.f32 %v15078_v33, %v3988_v11 }
 0x66f   : > { %13858 = vpow2.f32 %v4009_v19 }
 0x670   : > { %v4015_v34 = vmul.f32 1.442695, %v4001_v20  ;;  %v4013_v1 = vmul.f32 1.442695, %v4000_v29 }
 0x671   : > { %v4748_v43 = vpop.permute.xlu1 %4747  ;;  %v3994_v39 = vpop.xlane.xlu0 %3993 }
 0x672   : > { %13860 = vpow2.f32 %v4015_v34  ;;  %v4002_v47 = vsub.f32 %v15086_v54, %v3994_v39 }
 0x673   : > { %v15140_v8 = vpop.eup %13850  ;;  %13862 = vpow2.f32 %v4013_v1 }
 0x674   : > { %v4017_v23 = vmul.f32 1.442695, %v4002_v47  ;;  %13240 = vmatmul.mubr.msk.f32.vlgmr.msra.gmra.mxu0 %vm1346_vm5, %v15140_v8 }
 0x675   : > { %13248 = vmatpush3.msra.mxu0 %v4196_v51  ;;  %v4746_v4 = vpop.permute.xlu1 %4745  ;;  %v4670_v24 = vpop.permute.xlu0 %4669  ;;  %13249 = vmatprep.mubr.msk.f32.mxu0 %vm14202_vm3, %v16882_v37 }
 0x676   : > { %13864 = vpow2.f32 %v4017_v23  ;;  %13257 = vmatprep.subr.mxu0 %v16882_v37 }
 0x677   : > { %v15147_v33 = vpop.eup %13852 }
 0x678   : > { %v15149_v31 = vpop.eup %13854  ;;  %13245 = vmatmul.mubr.msk.f32.vlgmr.msra.gmra.mxu1 %vm1346_vm5, %v15147_v33 }
 0x679   : > { %13250 = vmatmul.mubr.msk.f32.vlgmr.msra.gmra.mxu0 %vm1346_vm5, %v15149_v31  ;;  %13253 = vmatpush3.msra.mxu1 %v4272_v56  ;;  %v4904_v54 = vpop.permute.xlu1 %4903  ;;  %v4668_v51 = vpop.permute.xlu0 %4667 }
 0x67a   : > { %13258 = vmatpush3.msra.mxu0 %v4348_v60  ;;  %13254 = vmatprep.mubr.msk.f32.mxu1 %vm14202_vm3, %v16882_v37 }
 0x67b   : > { %v15157_v58 = vpop.eup %13856  ;;  %13259 = vmatprep.mubr.msk.f32.mxu0 %vm14202_vm3, %v16882_v37  ;;  %13262 = vmatprep.subr.mxu1 %v16882_v37 }
 0x67c   : > { %v15162_v57 = vpop.eup %13858  ;;  %13267 = vmatprep.subr.mxu0 %v16882_v37 }
 0x67d   : > { %13255 = vmatmul.mubr.msk.f32.vlgmr.msra.gmra.mxu1 %vm1346_vm5, %v15162_v57  ;;  %13260 = vmatmul.mubr.msk.f32.vlgmr.msra.gmra.mxu0 %vm1346_vm5, %v15157_v58  ;;  %v4902_v56 = vpop.permute.xlu1 %4901  ;;  %v4826_v60 = vpop.permute.xlu0 %4825 }
 0x67e   : > { %13263 = vmatpush3.msra.mxu1 %v4424_v63  ;;  %13268 = vmatpush3.msra.mxu0 %v4500_v2 }
 0x67f   : > { %v15169_v13 = vpop.eup %13860  ;;  %13264 = vmatprep.mubr.msk.f32.mxu1 %vm14202_vm3, %v16882_v37  ;;  %13269 = vmatprep.mubr.msk.f32.mxu0 %vm14202_vm3, %v16882_v37 }
 0x680   : > { %v15175_v21 = vpop.eup %13862  ;;  %13272 = vmatprep.subr.mxu1 %v16882_v37  ;;  %13277 = vmatprep.subr.mxu0 %v16882_v37 }
 0x681   : > { %13265 = vmatmul.mubr.msk.f32.vlgmr.msra.gmra.mxu1 %vm1346_vm5, %v15175_v21  ;;  %13270 = vmatmul.mubr.msk.f32.vlgmr.msra.gmra.mxu0 %vm1346_vm5, %v15169_v13  ;;  %v5060_v63 = vpop.permute.xlu1 %5059  ;;  %v4824_v2 = vpop.permute.xlu0 %4823 }
 0x682   : > { %13273 = vmatpush3.msra.mxu1 %v15130_v5  ;;  %13278 = vmatpush3.xpose.msk.msra.mxu0 %vm732_vm4, %v4670_v24 }
 0x683   : > { %v15185_v49 = vpop.eup %13864  ;;  %13274 = vmatprep.mubr.msk.f32.mxu1 %vm14202_vm3, %v16882_v37  ;;  %13279 = vmatprep.mubr.msk.f32.mxu0 %vm14202_vm3, %v16882_v37 }
 0x684   : > { %13282 = vmatprep.subr.mxu1 %v16882_v37  ;;  %13287 = vmatprep.subr.mxu0 %v16882_v37 }
 0x685   : > { %13275 = vmatmul.mubr.msk.f32.vlgmr.msra.gmra.mxu1 %vm1346_vm5, %v15185_v49  ;;  %13280 = vmatmul.mubr.msk.f32.vlgmr.msra.gmra.mxu0 %vm732_vm4, %v4668_v51  ;;  %v5058_v5 = vpop.permute.xlu1 %5057  ;;  %v4982_v10 = vpop.permute.xlu0 %4981 }
 0x686   : > { %13283 = vmatpush3.xpose.msk.msra.mxu1 %vm732_vm4, %v4748_v43  ;;  %13288 = vmatpush3.xpose.msk.msra.mxu0 %vm732_vm4, %v4826_v60 }
 0x687   : > { %13284 = vmatprep.mubr.msk.f32.mxu1 %vm14202_vm3, %v16882_v37  ;;  %13289 = vmatprep.mubr.msk.f32.mxu0 %vm14202_vm3, %v16882_v37 }
 0x688   : > { %13292 = vmatprep.subr.mxu1 %v16882_v37  ;;  %13297 = vmatprep.subr.mxu0 %v16882_v37 }
 0x689   : > { %13285 = vmatmul.mubr.msk.f32.vlgmr.msra.gmra.mxu1 %vm732_vm4, %v4746_v4  ;;  %13290 = vmatmul.mubr.msk.f32.vlgmr.msra.gmra.mxu0 %vm732_vm4, %v4824_v2  ;;  %v5216_v19 = vpop.permute.xlu1 %5215  ;;  %v4980_v62 = vpop.permute.xlu0 %4979 }
 0x68a   : > { %13293 = vmatpush3.xpose.msk.msra.mxu1 %vm732_vm4, %v4904_v54  ;;  %13298 = vmatpush3.xpose.msk.msra.mxu0 %vm732_vm4, %v4982_v10 }
 0x68b   : > { %13294 = vmatprep.mubr.msk.f32.mxu1 %vm14202_vm3, %v16882_v37  ;;  %13299 = vmatprep.mubr.msk.f32.mxu0 %vm14202_vm3, %v16882_v37 }
 0x68c   : > { %13302 = vmatprep.subr.mxu1 %v16882_v37  ;;  %13307 = vmatprep.subr.mxu0 %v16882_v37 }
 0x68d   : > { %13295 = vmatmul.mubr.msk.f32.vlgmr.msra.gmra.mxu1 %vm732_vm4, %v4902_v56  ;;  %13300 = vmatmul.mubr.msk.f32.vlgmr.msra.gmra.mxu0 %vm732_vm4, %v4980_v62  ;;  %v5214_v11 = vpop.permute.xlu1 %5213  ;;  %v5138_v20 = vpop.permute.xlu0 %5137 }
 0x68e   : > { %13303 = vmatpush3.xpose.msk.msra.mxu1 %vm732_vm4, %v5060_v63  ;;  %13308 = vmatpush3.xpose.msk.msra.mxu0 %vm732_vm4, %v5138_v20 }
 0x68f   : > { %13304 = vmatprep.mubr.msk.f32.mxu1 %vm14202_vm3, %v16882_v37  ;;  %13312 = vmatprep.subr.mxu1 %v16882_v37 }
 0x690   : > { %13309 = vmatprep.mubr.msk.f32.mxu0 %vm14202_vm3, %v16882_v37  ;;  %13317 = vmatprep.subr.mxu0 %v16882_v37 }
 0x691   : > { %13305 = vmatmul.mubr.msk.f32.vlgmr.msra.gmra.mxu1 %vm732_vm4, %v5058_v5  ;;  %v5364_v29 = vpop.permute.xlu1 %5363  ;;  %v5136_v34 = vpop.permute.xlu0 %5135 }
 0x692   : > { %13313 = vmatpush3.xpose.msk.msra.mxu1 %vm732_vm4, %v5216_v19  ;;  %13310 = vmatmul.mubr.msk.f32.vlgmr.msra.gmra.mxu0 %vm732_vm4, %v5136_v34 }
 0x693   : > { %13318 = vmatpush3.msra.mxu0 %v5364_v29  ;;  %13314 = vmatprep.mubr.msk.f32.mxu1 %vm14202_vm3, %v16882_v37 }
 0x694   : > { %13322 = vmatprep.subr.mxu1 %v16882_v37  ;;  %13319 = vmatprep.mubr.msk.f32.mxu0 %vm14202_vm3, %v16882_v37 }
 0x695   : > { %13315 = vmatmul.mubr.msk.f32.vlgmr.msra.gmra.mxu1 %vm732_vm4, %v5214_v11  ;;  %v5440_v1 = vpop.permute.xlu0 %5439  ;;  %13327 = vmatprep.subr.mxu0 %v16882_v37 }
 0x696   : > { %13323 = vmatpush3.msra.mxu1 %v5440_v1  ;;  %13324 = vmatprep.mubr.msk.f32.mxu1 %vm14202_vm3, %v16882_v37 }
 0x697   : > { %13332 = vmatprep.subr.mxu1 %v16882_v37 }
 0x734   : > { %v15237_v43 = vpop.f32.mrf.mxu0 }
 0x736   : > { %v13241_v39 = vpop.f32.mrf.mxu0 }
 0x738   : > { %v15239_v47 = vpop.f32.mrf.mxu1 }
 0x739   : > { %v15241_v23 = vpop.f32.mrf.mxu0 }
 0x73a   : > { %v13246_v4 = vpop.f32.mrf.mxu1 }
 0x73b   : > { %v13251_v24 = vpop.f32.mrf.mxu0 }
 0x73d   : > { %v15243_v54 = vpop.f32.mrf.mxu1  ;;  %v15245_v51 = vpop.f32.mrf.mxu0 }
 0x73f   : > { %v13256_v56 = vpop.f32.mrf.mxu1  ;;  %v13261_v60 = vpop.f32.mrf.mxu0 }
 0x741   : > { %v15247_v63 = vpop.f32.mrf.mxu1  ;;  %v15249_v2 = vpop.f32.mrf.mxu0 }
 0x743   : > { %v13266_v5 = vpop.f32.mrf.mxu1  ;;  %v13271_v10 = vpop.f32.mrf.mxu0 }
 0x745   : > { %v15251_v19 = vpop.f32.mrf.mxu1  ;;  %v15253_v62 = vpop.f32.mrf.mxu0 }
 0x746   : > { %v5291_v11 = vsel %vm1346_vm5, %v15253_v62, -inf }
 0x747   : > { %v13276_v20 = vpop.f32.mrf.mxu1  ;;  %5292 = vmax.xlane.f32.xlu0 %v5291_v11  ;;  %v13281_v29 = vpop.f32.mrf.mxu0 }
 0x749   : > { %v15257_v34 = vpop.f32.mrf.mxu1  ;;  %v15259_v1 = vpop.f32.mrf.mxu0 }
 0x74a   : > { %v5294_v39 = vsel %vm1346_vm5, %v15257_v34, -inf  ;;  %v5297_v4 = vsel %vm1346_vm5, %v15259_v1, -inf }
 0x74b   : > { %5295 = vmax.xlane.f32.xlu1 %v5294_v39  ;;  %v13286_v24 = vpop.f32.mrf.mxu1  ;;  %5298 = vmax.xlane.f32.xlu0 %v5297_v4  ;;  %v13291_v56 = vpop.f32.mrf.mxu0 }
 0x74d   : > { %v15265_v60 = vpop.f32.mrf.mxu1  ;;  %v15267_v5 = vpop.f32.mrf.mxu0 }
 0x74e   : > { %v5300_v10 = vsel %vm1346_vm5, %v15265_v60, -inf  ;;  %v5303_v11 = vsel %vm1346_vm5, %v15267_v5, -inf }
 0x74f   : > { %v13296_v20 = vpop.f32.mrf.mxu1  ;;  %5301 = vmax.xlane.f32.xlu0 %v5300_v10  ;;  %5304 = vmax.xlane.f32.xlu1 %v5303_v11  ;;  %v13301_v29 = vpop.f32.mrf.mxu0 }
 0x750   : > { %v4019_v20 = vsel %vm1346_vm5, %v15140_v8, 0.0  ;;  %v5516_v8 = vpop.permute.xlu1 %5515 }
 0x751   : > { %v5131_v48 = vpop.f32.mrf.mxu1 }
 0x752   : > { %v5306_v39 = vsel %vm1346_vm5, %v5131_v48, -inf  ;;  %v15274_v24 = vpop.f32.mrf.mxu0 }
 0x753   : > { %v13306_v4 = vpop.f32.mrf.mxu1  ;;  %5307 = vmax.xlane.f32.xlu0 %v5306_v39  ;;  %v5309_v10 = vsel %vm1346_vm5, %v15274_v24, -inf }
 0x754   : > { %v13311_v56 = vpop.f32.mrf.mxu0  ;;  %v5592_v29 = vpop.permute.xlu1 %5591 }
 0x755   : > { %v15276_v28 = vpop.f32.mrf.mxu1 }
 0x756   : > { %v5312_v11 = vsel %vm1346_vm5, %v15276_v28, -inf }
 0x757   : > { %v13316_v42 = vpop.f32.mrf.mxu1 }
 0x758   : > { %v2697_v42 = vsel %vm1346_vm5, %v14946_v18, 0.0  ;;  %v4031_v18 = vsel %vm1346_vm5, %v15157_v58, 0.0 }
 0x760   : > { %5743 = vrot.lane.b32.xlu1 %v14666_v61, %s16841_s12  ;;  %v2694_v61 = vsel %vm1346_vm5, %v14944_v53, 0.0  ;;  %v2703_v53 = vsel %vm1346_vm5, %v14954_v6, 0.0  ;;  %v2706_v6 = vsel %vm1346_vm5, %v14974_v55, 0.0 }
 0x769   : > { %5667 = vrot.lane.b32.xlu0 %v14670_v7, %s16841_s12  ;;  %v2691_v7 = vsel %vm1346_vm5, %v14937_v35, 0.0  ;;  %v2700_v35 = vsel %vm1346_vm5, %v14959_v9, 0.0 }
 0x784   : > { %5310 = vmax.xlane.f32.xlu1 %v5309_v10 }
 0x788   : > { %5313 = vmax.xlane.f32.xlu0 %v5312_v11 }
 0x795   : > { %5895 = vrot.lane.b32.xlu1 %v14677_v0, %s16841_s12  ;;  %v4025_v0 = vsel %vm1346_vm5, %v15149_v31, 0.0  ;;  %v4028_v31 = vsel %vm1346_vm5, %v15162_v57, 0.0 }
 0x79e   : > { %5819 = vrot.lane.b32.xlu0 %v14681_v12, %s16841_s12  ;;  %v4022_v12 = vsel %vm1346_vm5, %v15147_v33, 0.0  ;;  %s16911_s12 = smov 96  }
 0x7b9   : > { %2695 = vadd.xlane.f32.xlu1 %v2694_v61 }
 0x7bd   : > { %2692 = vadd.xlane.f32.xlu0 %v2691_v7  ;;  %2698 = vadd.xlane.f32.xlu1 %v2697_v42 }
 0x7c1   : > { %4020 = vadd.xlane.f32.xlu0 %v4019_v20  ;;  %4026 = vadd.xlane.f32.xlu1 %v4025_v0 }
 0x7c5   : > { %4023 = vadd.xlane.f32.xlu0 %v4022_v12  ;;  %2704 = vadd.xlane.f32.xlu1 %v2703_v53 }
 0x7c9   : > { %2701 = vadd.xlane.f32.xlu0 %v2700_v35  ;;  %4032 = vadd.xlane.f32.xlu1 %v4031_v18  ;;  %v2709_v18 = vsel %vm1346_vm5, %v14968_v38, 0.0 }
 0x7cd   : > { %4029 = vadd.xlane.f32.xlu0 %v4028_v31 }
 0x7d0   : > { %v5293_v33 = vpop.xlane.xlu0 %5292 }
 0x7d1   : > { %v5315_v39 = vsub.f32 %v15253_v62, %v5293_v33  ;;  %2707 = vadd.xlane.f32.xlu0 %v2706_v6 }
 0x7d3   : > { %v5323_v4 = vmul.f32 1.442695, %v5315_v39 }
 0x7d4   : > { %v5296_v9 = vpop.xlane.xlu1 %5295  ;;  %v5299_v56 = vpop.xlane.xlu0 %5298 }
 0x7d5   : > { %13866 = vpow2.f32 %v5323_v4  ;;  %v5316_v58 = vsub.f32 %v15257_v34, %v5296_v9  ;;  %v5317_v10 = vsub.f32 %v15259_v1, %v5299_v56  ;;  %v2712_v4 = vsel %vm1346_vm5, %v14985_v3, 0.0 }
 0x7d7   : > { %v5325_v11 = vmul.f32 1.442695, %v5316_v58  ;;  %v5327_v61 = vmul.f32 1.442695, %v5317_v10  ;;  %v1395_v58 = vsel %vm1346_vm5, %v14716_v40, 0.0 }
 0x7d8   : > { %v5305_v57 = vpop.xlane.xlu1 %5304  ;;  %v5302_v7 = vpop.xlane.xlu0 %5301 }
 0x7d9   : > { %13868 = vpow2.f32 %v5325_v11  ;;  %v5319_v42 = vsub.f32 %v15267_v5, %v5305_v57  ;;  %v5318_v55 = vsub.f32 %v15265_v60, %v5302_v7 }
 0x7da   : > { %13870 = vpow2.f32 %v5327_v61 }
 0x7db   : > { %v5331_v62 = vmul.f32 1.442695, %v5319_v42  ;;  %v5329_v20 = vmul.f32 1.442695, %v5318_v55 }
 0x7dc   : > { %v5308_v0 = vpop.xlane.xlu0 %5307  ;;  %v5744_v33 = vpop.permute.xlu1 %5743 }
 0x7dd   : > { %13872 = vpow2.f32 %v5331_v62  ;;  %v5320_v12 = vsub.f32 %v5131_v48, %v5308_v0  ;;  %v1398_v0 = vsel %vm1346_vm5, %v14725_v32, 0.0 }
 0x7de   : > { %13874 = vpow2.f32 %v5329_v20 }
 0x7df   : > { %v5333_v53 = vmul.f32 1.442695, %v5320_v12  ;;  %v1413_v12 = vsel %vm1346_vm5, %v14767_v22, 0.0 }
 0x7e0   : > { %v5668_v35 = vpop.permute.xlu0 %5667 }
 0x7e1   : > { %13876 = vpow2.f32 %v5333_v53  ;;  %v1410_v53 = vsel %vm1346_vm5, %v14759_v17, 0.0 }
 0x7e2   : > { %v13867_v34 = vpop.eup %13866 }
 0x7e3   : > { %13320 = vmatmul.mubr.msk.f32.vlgmr.msra.gmra.mxu0 %vm1346_vm5, %v13867_v34  ;;  %v5339_v1 = vsel %vm1346_vm5, %v13867_v34, 0.0 }
 0x7e4   : > { %13328 = vmatpush3.msra.mxu0 %v5516_v8  ;;  %5340 = vadd.xlane.f32.xlu1 %v5339_v1 }
 0x7e5   : > { %13329 = vmatprep.mubr.msk.f32.mxu0 %vm14202_vm3, %v16882_v37  ;;  %13337 = vmatprep.subr.mxu0 %v16882_v37 }
 0x7e6   : > { %v13869_v60 = vpop.eup %13868 }
 0x7e7   : > { %v13871_v5 = vpop.eup %13870  ;;  %13325 = vmatmul.mubr.msk.f32.vlgmr.msra.gmra.mxu1 %vm1346_vm5, %v13869_v60  ;;  %v5342_v48 = vsel %vm1346_vm5, %v13869_v60, 0.0 }
 0x7e8   : > { %13330 = vmatmul.mubr.msk.f32.vlgmr.msra.gmra.mxu0 %vm1346_vm5, %v13871_v5  ;;  %13333 = vmatpush3.msra.mxu1 %v5592_v29  ;;  %v4034_v29 = vsel %vm1346_vm5, %v15175_v21, 0.0  ;;  %v5345_v38 = vsel %vm1346_vm5, %v13871_v5, 0.0  ;;  %v4037_v21 = vsel %vm1346_vm5, %v15169_v13, 0.0  ;;  %v4040_v13 = vsel %vm1346_vm5, %v15185_v49, 0.0 }
 0x7e9   : > { %13338 = vmatpush3.msra.mxu0 %v5668_v35  ;;  %5343 = vadd.xlane.f32.xlu0 %v5342_v48 }
 0x7ea   : > { %v13873_v8 = vpop.eup %13872  ;;  %2710 = vadd.xlane.f32.xlu1 %v2709_v18  ;;  %13334 = vmatprep.mubr.msk.f32.mxu1 %vm14202_vm3, %v16882_v37 }
 0x7eb   : > { %v13875_v31 = vpop.eup %13874  ;;  %13339 = vmatprep.mubr.msk.f32.mxu0 %vm14202_vm3, %v16882_v37  ;;  %13342 = vmatprep.subr.mxu1 %v16882_v37  ;;  %v5351_v9 = vsel %vm1346_vm5, %v13873_v8, 0.0 }
 0x7ec   : > { %13335 = vmatmul.mubr.msk.f32.vlgmr.msra.gmra.mxu1 %vm1346_vm5, %v13875_v31  ;;  %13340 = vmatmul.mubr.msk.f32.vlgmr.msra.gmra.mxu0 %vm1346_vm5, %v13873_v8  ;;  %v5348_v39 = vsel %vm1346_vm5, %v13875_v31, 0.0 }
 0x7ed   : > { %13343 = vmatpush3.msra.mxu1 %v5744_v33  ;;  %4035 = vadd.xlane.f32.xlu0 %v4034_v29 }
 0x7ee   : > { %v13877_v6 = vpop.eup %13876  ;;  %5346 = vadd.xlane.f32.xlu1 %v5345_v38  ;;  %13344 = vmatprep.mubr.msk.f32.mxu1 %vm14202_vm3, %v16882_v37 }
 0x7ef   : > { %13352 = vmatprep.subr.mxu1 %v16882_v37  ;;  %13347 = vmatprep.subr.mxu0 %v16882_v37  ;;  %v5354_v56 = vsel %vm1346_vm5, %v13877_v6, 0.0 }
 0x7f0   : > { %13345 = vmatmul.mubr.msk.f32.vlgmr.msra.gmra.mxu1 %vm1346_vm5, %v13877_v6  ;;  %13349 = vmatprep.mubr.msk.f32.mxu0 %vm14202_vm3, %v16882_v37 }
 0x7f1   : > { %5349 = vadd.xlane.f32.xlu0 %v5348_v39  ;;  %13354 = vmatprep.mubr.msk.f32.mxu1 %vm14202_vm3, %v16882_v37 }
 0x7f2   : > { %4038 = vadd.xlane.f32.xlu1 %v4037_v21 }
 0x7f5   : > { %2713 = vadd.xlane.f32.xlu0 %v2712_v4 }
 0x7f6   : > { %5352 = vadd.xlane.f32.xlu1 %v5351_v9 }
 0x7f9   : > { %5355 = vadd.xlane.f32.xlu0 %v5354_v56 }
 0x7fa   : > { %1396 = vadd.xlane.f32.xlu1 %v1395_v58  ;;  %v578_v58 = vld [vmem:[#allocation2 + $0x38] sm:$0xff] }
 0x7fd   : > { %4041 = vadd.xlane.f32.xlu0 %v4040_v13  ;;  %v577_v13 = vld [vmem:[#allocation2 + $0x30] sm:$0xff] }
 0x80d   : > { %v5311_v10 = vpop.xlane.xlu1 %5310 }
 0x80e   : > { %v5321_v11 = vsub.f32 %v15274_v24, %v5311_v10  ;;  %v1401_v24 = vsel %vm1346_vm5, %v14734_v45, 0.0  ;;  %v1404_v45 = vsel %vm1346_vm5, %v14743_v50, 0.0 }
 0x810   : > { %v5335_v61 = vmul.f32 1.442695, %v5321_v11  ;;  %v575_v11 = vld [vmem:[#allocation2 + $0x20] sm:$0xff] }
 0x811   : > { %v5896_v3 = vpop.permute.xlu1 %5895  ;;  %v5314_v57 = vpop.xlane.xlu0 %5313 }
 0x812   : > { %13878 = vpow2.f32 %v5335_v61  ;;  %v5322_v7 = vsub.f32 %v15276_v28, %v5314_v57  ;;  %13353 = vmatpush3.msra.mxu1 %v5896_v3  ;;  %v1407_v28 = vsel %vm1346_vm5, %v14751_v16, 0.0  ;;  %v1416_v16 = vsel %vm1346_vm5, %v14776_v25, 0.0 }
 0x814   : > { %v5337_v42 = vmul.f32 1.442695, %v5322_v7 }
 0x815   : > { %v5820_v55 = vpop.permute.xlu0 %5819 }
 0x816   : > { %13880 = vpow2.f32 %v5337_v42  ;;  %13348 = vmatpush3.msra.mxu0 %v5820_v55 }
 0x817   : > { %13357 = vmatprep.subr.mxu0 %v578_v58 }
 0x81f   : > { %v13879_v40 = vpop.eup %13878 }
 0x820   : > { %13350 = vmatmul.mubr.msk.f32.vlgmr.msra.gmra.mxu0 %vm1346_vm5, %v13879_v40  ;;  %v5357_v49 = vsel %vm1346_vm5, %v13879_v40, 0.0  ;;  %v572_v40 = vld [vmem:[#allocation2 + $0x8] sm:$0xff] }
 0x821   : > { %5358 = vadd.xlane.f32.xlu1 %v5357_v49  ;;  %13358 = vmatpush3.msra.mxu0 %v578_v58  ;;  %v571_v49 = vld [vmem:[#allocation2] sm:$0xff] }
 0x822   : > { %13359 = vmatprep.subr.mxu0 %v577_v13 }
 0x823   : > { %v13881_v62 = vpop.eup %13880  ;;  %13360 = vmatpush3.msra.mxu0 %v577_v13 }
 0x824   : > { %13355 = vmatmul.mubr.msk.f32.vlgmr.msra.gmra.mxu1 %vm1346_vm5, %v13881_v62  ;;  %v5360_v20 = vsel %vm1346_vm5, %v13881_v62, 0.0 }
 0x825   : > { %1402 = vadd.xlane.f32.xlu1 %v1401_v24  ;;  %5361 = vadd.xlane.f32.xlu0 %v5360_v20 }
 0x826   : > { %6516 = vmatprep.mubr.f32.mxu1 %v16882_v37 }
 0x829   : > { %1408 = vadd.xlane.f32.xlu1 %v1407_v28  ;;  %1399 = vadd.xlane.f32.xlu0 %v1398_v0 }
 0x82d   : > { %1414 = vadd.xlane.f32.xlu1 %v1413_v12  ;;  %1405 = vadd.xlane.f32.xlu0 %v1404_v45 }
 0x831   : > { %1411 = vadd.xlane.f32.xlu0 %v1410_v53 }
 0x835   : > { %1417 = vadd.xlane.f32.xlu0 %v1416_v16 }
 0x842   : > { %v2696_v34 = vpop.xlane.xlu1 %2695 }
 0x843   : > { %13882 = vrcp.f32 %v2696_v34 }
 0x846   : > { %v2699_v32 = vpop.xlane.xlu1 %2698  ;;  %v2693_v1 = vpop.xlane.xlu0 %2692 }
 0x847   : > { %13884 = vrcp.f32 %v2699_v32 }
 0x848   : > { %13886 = vrcp.f32 %v2693_v1 }
 0x84a   : > { %v4027_v22 = vpop.xlane.xlu1 %4026  ;;  %v4021_v60 = vpop.xlane.xlu0 %4020 }
 0x84b   : > { %13888 = vrcp.f32 %v4027_v22 }
 0x84c   : > { %13890 = vrcp.f32 %v4021_v60 }
 0x84e   : > { %v2705_v50 = vpop.xlane.xlu1 %2704  ;;  %v4024_v5 = vpop.xlane.xlu0 %4023 }
 0x84f   : > { %13892 = vrcp.f32 %v2705_v50 }
 0x850   : > { %v13883_v48 = vpop.eup %13882  ;;  %13894 = vrcp.f32 %v4024_v5 }
 0x851   : > { %v3340_v17 = vmul.f32 %v13883_v48, %v15044_v26 }
 0x852   : > { %v2702_v35 = vpop.xlane.xlu0 %2701  ;;  %v4033_v61 = vpop.xlane.xlu1 %4032 }
 0x853   : > { %5997 = vrot.lane.b32.xlu0 %v3340_v17, %s16843_s29  ;;  %13896 = vrcp.f32 %v2702_v35 }
 0x854   : > { %v13885_v25 = vpop.eup %13884 }
 0x855   : > { %v13887_v18 = vpop.eup %13886  ;;  %v3341_v8 = vmul.f32 %v13885_v25, %v15046_v52 }
 0x856   : > { %v4030_v31 = vpop.xlane.xlu0 %4029  ;;  %v3339_v33 = vmul.f32 %v13887_v18, %v15042_v15 }
 0x857   : > { %13898 = vrcp.f32 %v4030_v31  ;;  %5999 = vrot.lane.b32.xlu0 %v3341_v8, %s16843_s29 }
 0x858   : > { %v13889_v29 = vpop.eup %13888  ;;  %5995 = vrot.lane.b32.xlu1 %v3339_v33, %s16843_s29 }
 0x859   : > { %v13891_v38 = vpop.eup %13890  ;;  %v4661_v26 = vmul.f32 %v13889_v29, %v15241_v23 }
 0x85a   : > { %v2708_v6 = vpop.xlane.xlu0 %2707  ;;  %v4659_v39 = vmul.f32 %v13891_v38, %v15237_v43 }
 0x85b   : > { %13900 = vrcp.f32 %v2708_v6  ;;  %6031 = vrot.lane.b32.xlu0 %v4661_v26, %s16847_s13 }
 0x85c   : > { %v13893_v21 = vpop.eup %13892  ;;  %6027 = vrot.lane.b32.xlu1 %v4659_v39, %s16847_s13 }
 0x85d   : > { %v13895_v52 = vpop.eup %13894  ;;  %v3343_v15 = vmul.f32 %v13893_v21, %v15050_v46 }
 0x85e   : > { %v4660_v4 = vmul.f32 %v13895_v52, %v15239_v47  ;;  %v576_v47 = vld [vmem:[#allocation2 + $0x28] sm:$0xff] }
 0x85f   : > { %6003 = vrot.lane.b32.xlu0 %v3343_v15, %s16843_s29  ;;  %13361 = vmatprep.subr.mxu0 %v576_v47 }
 0x860   : > { %6029 = vrot.lane.b32.xlu1 %v4660_v4, %s16847_s13  ;;  %v13897_v9 = vpop.eup %13896  ;;  %13362 = vmatpush3.msra.mxu0 %v576_v47 }
 0x861   : > { %v3342_v23 = vmul.f32 %v13897_v9, %v15048_v27  ;;  %v574_v27 = vld [vmem:[#allocation2 + $0x18] sm:$0xff]  ;;  %13363 = vmatprep.subr.mxu0 %v575_v11 }
 0x862   : > { %13364 = vmatpush3.msra.mxu0 %v575_v11 }
 0x863   : > { %13365 = vmatprep.subr.mxu0 %v574_v27 }
 0x864   : > { %v13899_v56 = vpop.eup %13898  ;;  %6001 = vrot.lane.b32.xlu1 %v3342_v23, %s16843_s29  ;;  %13366 = vmatpush3.msra.mxu0 %v574_v27 }
 0x865   : > { %v4662_v43 = vmul.f32 %v13899_v56, %v15243_v54  ;;  %v573_v54 = vld [vmem:[#allocation2 + $0x10] sm:$0xff] }
 0x866   : > { %13367 = vmatprep.subr.mxu0 %v573_v54 }
 0x867   : > { %13368 = vmatpush3.msra.mxu0 %v573_v54 }
 0x868   : > { %v13901_v10 = vpop.eup %13900  ;;  %6033 = vrot.lane.b32.xlu1 %v4662_v43, %s16847_s13  ;;  %13369 = vmatprep.subr.mxu0 %v572_v40 }
 0x869   : > { %v3344_v46 = vmul.f32 %v13901_v10, %v15052_v44  ;;  %13370 = vmatpush3.msra.mxu0 %v572_v40 }
 0x86a   : > { %13371 = vmatprep.subr.mxu0 %v571_v49 }
 0x86b   : > { %13372 = vmatpush3.msra.mxu0 %v571_v49 }
 0x86c   : > { %6005 = vrot.lane.b32.xlu1 %v3344_v46, %s16843_s29  ;;  %13385 = vmatprep.subr.mxu0 %v16882_v37 }
 0x86d   : > { %v5341_v3 = vpop.xlane.xlu1 %5340 }
 0x86e   : > { %13902 = vrcp.f32 %v5341_v3 }
 0x86f   : > { %13904 = vrcp.f32 %v4033_v61 }
 0x872   : > { %v5344_v44 = vpop.xlane.xlu0 %5343 }
 0x873   : > { %v2711_v57 = vpop.xlane.xlu1 %2710  ;;  %13906 = vrcp.f32 %v5344_v44 }
 0x876   : > { %v4036_v7 = vpop.xlane.xlu0 %4035 }
 0x877   : > { %v5347_v42 = vpop.xlane.xlu1 %5346  ;;  %13908 = vrcp.f32 %v4036_v7 }
 0x878   : > { %13910 = vrcp.f32 %v5347_v42 }
 0x879   : > { %13912 = vrcp.f32 %v2711_v57 }
 0x87a   : > { %v5350_v55 = vpop.xlane.xlu0 %5349 }
 0x87b   : > { %v4039_v62 = vpop.xlane.xlu1 %4038  ;;  %13914 = vrcp.f32 %v5350_v55  ;;  %v13903_v28 = vpop.eup %13902 }
 0x87c   : > { %v13905_v53 = vpop.eup %13904 }
 0x87d   : > { %v4663_v60 = vmul.f32 %v13905_v53, %v15245_v51 }
 0x87e   : > { %v2714_v24 = vpop.xlane.xlu0 %2713 }
 0x87f   : > { %v5353_v20 = vpop.xlane.xlu1 %5352  ;;  %13916 = vrcp.f32 %v2714_v24 }
 0x880   : > { %13918 = vrcp.f32 %v5353_v20  ;;  %v13907_v34 = vpop.eup %13906 }
 0x881   : > { %13920 = vrcp.f32 %v4039_v62 }
 0x882   : > { %v5356_v0 = vpop.xlane.xlu0 %5355 }
 0x883   : > { %13922 = vrcp.f32 %v5356_v0  ;;  %v1397_v13 = vpop.xlane.xlu1 %1396 }
 0x884   : > { %v13909_v50 = vpop.eup %13908 }
 0x885   : > { %v13911_v35 = vpop.eup %13910  ;;  %v4664_v31 = vmul.f32 %v13909_v50, %v15247_v63 }
 0x886   : > { %v4042_v5 = vpop.xlane.xlu0 %4041  ;;  %v13913_v33 = vpop.eup %13912 }
 0x887   : > { %13924 = vrcp.f32 %v4042_v5  ;;  %v3345_v39 = vmul.f32 %v13913_v33, %v15054_v41 }
 0x888   : > { %v13915_v51 = vpop.eup %13914 }
 0x88c   : > { %v13917_v21 = vpop.eup %13916 }
 0x88d   : > { %v13919_v15 = vpop.eup %13918  ;;  %v3346_v4 = vmul.f32 %v13917_v21, %v15056_v59 }
 0x88e   : > { %v13921_v9 = vpop.eup %13920 }
 0x88f   : > { %v4665_v43 = vmul.f32 %v13921_v9, %v15249_v2 }
 0x890   : > { %v13923_v23 = vpop.eup %13922 }
 0x894   : > { %v13925_v41 = vpop.eup %13924 }
 0x895   : > { %v4666_v58 = vmul.f32 %v13925_v41, %v15251_v19 }
 0x8a3   : > { %v5435_v12 = vpop.f32.mrf.mxu0 }
 0x8a4   : > { %v5979_v45 = vmul.f32 %v13903_v28, %v5435_v12 }
 0x8a5   : > { %v13321_v16 = vpop.f32.mrf.mxu0 }
 0x8a6   : > { %6059 = vrot.lane.b32.xlu0 %v5979_v45, %s16851_s25 }
 0x8a7   : > { %v5511_v32 = vpop.f32.mrf.mxu1 }
 0x8a8   : > { %v5980_v1 = vmul.f32 %v13907_v34, %v5511_v32  ;;  %v5587_v22 = vpop.f32.mrf.mxu0 }
 0x8a9   : > { %v13326_v48 = vpop.f32.mrf.mxu1  ;;  %v5981_v25 = vmul.f32 %v13911_v35, %v5587_v22 }
 0x8aa   : > { %v13331_v17 = vpop.f32.mrf.mxu0  ;;  %6035 = vrot.lane.b32.xlu0 %v4663_v60, %s16847_s13  ;;  %6061 = vrot.lane.b32.xlu1 %v5980_v1, %s16851_s25  ;;  %v5359_v59 = vpop.xlane.xlu1 %5358 }
 0x8ab   : > { %13926 = vrcp.f32 %v5359_v59  ;;  %v16885_v59 = vld [vmem:[#allocation19_spill] sm:$0xff] }
 0x8ac   : > { %v5663_v18 = vpop.f32.mrf.mxu1  ;;  %v5739_v8 = vpop.f32.mrf.mxu0 }
 0x8ad   : > { %v5982_v26 = vmul.f32 %v13915_v51, %v5663_v18  ;;  %v5983_v63 = vmul.f32 %v13919_v15, %v5739_v8 }
 0x8ae   : > { %v13336_v29 = vpop.f32.mrf.mxu1  ;;  %v13341_v38 = vpop.f32.mrf.mxu0  ;;  %6063 = vrot.lane.b32.xlu0 %v5981_v25, %s16851_s25  ;;  %6037 = vrot.lane.b32.xlu1 %v4664_v31, %s16847_s13 }
 0x8af   : > { %v5362_v10 = vpop.xlane.xlu0 %5361  ;;  %v1403_v19 = vpop.xlane.xlu1 %1402 }
 0x8b0   : > { %v5815_v6 = vpop.f32.mrf.mxu1  ;;  %13928 = vrcp.f32 %v5362_v10 }
 0x8b1   : > { %v5984_v56 = vmul.f32 %v13923_v23, %v5815_v6  ;;  %13930 = vrcp.f32 %v1397_v13 }
 0x8b2   : > { %v13346_v52 = vpop.f32.mrf.mxu1  ;;  %6007 = vrot.lane.b32.xlu0 %v3345_v39, %s16843_s29  ;;  %6065 = vrot.lane.b32.xlu1 %v5982_v26, %s16851_s25  ;;  %v16883_v26 = vld [vmem:[#allocation17_spill] sm:$0xff] }
 0x8b3   : > { %v1400_v44 = vpop.xlane.xlu0 %1399  ;;  %v1409_v57 = vpop.xlane.xlu1 %1408 }
 0x8b4   : > { %13932 = vrcp.f32 %v1400_v44 }
 0x8b5   : > { %13934 = vrcp.f32 %v1403_v19 }
 0x8b6   : > { %6067 = vrot.lane.b32.xlu0 %v5983_v63, %s16851_s25  ;;  %6009 = vrot.lane.b32.xlu1 %v3346_v4, %s16843_s29  ;;  %v16884_v4 = vld [vmem:[#allocation18_spill] sm:$0xff] }
 0x8b7   : > { %v1406_v7 = vpop.xlane.xlu0 %1405  ;;  %v15419_v42 = vpop.xlane.xlu1 %1414 }
 0x8b8   : > { %v13927_v46 = vpop.eup %13926  ;;  %13936 = vrcp.f32 %v1406_v7 }
 0x8b9   : > { %13938 = vrcp.f32 %v1409_v57 }
 0x8ba   : > { %6039 = vrot.lane.b32.xlu0 %v4665_v43, %s16847_s13  ;;  %6069 = vrot.lane.b32.xlu1 %v5984_v56, %s16851_s25 }
 0x8bb   : > { %v1412_v55 = vpop.xlane.xlu0 %1411 }
 0x8bc   : > { %13940 = vrcp.f32 %v1412_v55 }
 0x8bd   : > { %v13929_v2 = vpop.eup %13928  ;;  %13942 = vrcp.f32 %v15419_v42 }
 0x8be   : > { %6041 = vrot.lane.b32.xlu1 %v4666_v58, %s16847_s13  ;;  %v13931_v45 = vpop.eup %13930 }
 0x8bf   : > { %v15421_v49 = vpop.xlane.xlu0 %1417  ;;  %v2011_v34 = vmul.f32 %v13931_v45, %v14827_v14 }
 0x8c0   : > { %13944 = vrcp.f32 %v15421_v49 }
 0x8c1   : > { %v13933_v32 = vpop.eup %13932 }
 0x8c2   : > { %v2012_v5 = vmul.f32 %v13933_v32, %v14829_v30  ;;  %v13935_v17 = vpop.eup %13934 }
 0x8c3   : > { %v2013_v8 = vmul.f32 %v13935_v17, %v14831_v36 }
 0x8c5   : > { %v5998_v24 = vpop.permute.xlu0 %5997  ;;  %v13937_v33 = vpop.eup %13936 }
 0x8c6   : > { %v6084_v35 = vsel %vm732_vm4, %v2012_v5, %v5998_v24  ;;  %v2014_v6 = vmul.f32 %v13937_v33, %v16883_v26  ;;  %v13939_v21 = vpop.eup %13938 }
 0x8c7   : > { %v2015_v9 = vmul.f32 %v13939_v21, %v16884_v4  ;;  %v16893_v21 = vld [vmem:[#allocation12_spill] sm:$0xff] }
 0x8c9   : > { %v6000_v28 = vpop.permute.xlu0 %5999  ;;  %v13941_v56 = vpop.eup %13940 }
 0x8ca   : > { %v5996_v40 = vpop.permute.xlu1 %5995  ;;  %v6085_v30 = vsel %vm732_vm4, %v2013_v8, %v6000_v28  ;;  %v2016_v10 = vmul.f32 %v13941_v56, %v16885_v59  ;;  %v16891_v8 = vld [vmem:[#allocation11_spill] sm:$0xff] }
 0x8cb   : > { %v6083_v1 = vsel %vm732_vm4, %v2011_v34, %v5996_v40  ;;  %v16888_v34 = vld [vmem:[#allocation9_spill] sm:$0xff] }
 0x8cd   : > { %v6032_v12 = vpop.permute.xlu0 %6031 }
 0x8ce   : > { %v6028_v62 = vpop.permute.xlu1 %6027  ;;  %v6094_v29 = vsel %vm6091_vm6, %v6085_v30, %v6032_v12  ;;  %v12550_v12 = vld [vmem:[%s16821_s6] ss:$0 sm:$0xff] }
 0x8cf   : > { %v6092_v22 = vsel %vm6091_vm6, %v6083_v1, %v6028_v62  ;;  %v16887_v62 = vld [vmem:[#allocation21_spill] sm:$0xff] }
 0x8d1   : > { %v6004_v16 = vpop.permute.xlu0 %6003 }
 0x8d2   : > { %v6030_v20 = vpop.permute.xlu1 %6029  ;;  %v6087_v43 = vsel %vm732_vm4, %v2015_v9, %v6004_v16 }
 0x8d3   : > { %v6093_v14 = vsel %vm6091_vm6, %v6084_v35, %v6030_v20 }
 0x8d6   : > { %v6002_v0 = vpop.permute.xlu1 %6001 }
 0x8d7   : > { %v6086_v36 = vsel %vm732_vm4, %v2014_v6, %v6002_v0 }
 0x8da   : > { %v6034_v53 = vpop.permute.xlu1 %6033 }
 0x8db   : > { %v6095_v52 = vsel %vm6091_vm6, %v6086_v36, %v6034_v53 }
 0x8de   : > { %v6006_v60 = vpop.permute.xlu1 %6005 }
 0x8e0   : > { %v5891_v47 = vpop.f32.mrf.mxu0 }
 0x8e1   : > { %v5985_v11 = vmul.f32 %v13927_v46, %v5891_v47  ;;  %v6088_v47 = vsel %vm732_vm4, %v2016_v10, %v6006_v60 }
 0x8e2   : > { %v13351_v27 = vpop.f32.mrf.mxu0 }
 0x8e3   : > { %6071 = vrot.lane.b32.xlu0 %v5985_v11, %s16851_s25 }
 0x8e4   : > { %v5967_v54 = vpop.f32.mrf.mxu1 }
 0x8e5   : > { %v5986_v61 = vmul.f32 %v13929_v2, %v5967_v54  ;;  %v13943_v54 = vpop.eup %13942 }
 0x8e6   : > { %v13356_v3 = vpop.f32.mrf.mxu1  ;;  %v13945_v44 = vpop.eup %13944 }
 0x8e7   : > { %6073 = vrot.lane.b32.xlu1 %v5986_v61, %s16851_s25  ;;  %v16886_v3 = vld [vmem:[#allocation20_spill] sm:$0xff]  ;;  %v2018_v24 = vmul.f32 %v13945_v44, %v16887_v62  ;;  %s16907_s25 = smov 48  }
 0x8e8   : > { %v2017_v19 = vmul.f32 %v13943_v54, %v16886_v3 }
 0x918   : > { %v6060_v50 = vpop.permute.xlu0 %6059 }
 0x919   : > { %v6101_v48 = vsel %vm6100_vm7, %v6092_v22, %v6060_v50  ;;  %v16889_v22 = vld [vmem:[#allocation8_spill] sm:$0xff] }
 0x91a   : > { %13373 = vmatprep.mubr.msk.f32.mxu0 %vm591_vm2, %v6101_v48 }
 0x91c   : > { %v6062_v25 = vpop.permute.xlu1 %6061  ;;  %v6036_v18 = vpop.permute.xlu0 %6035 }
 0x91d   : > { %v6102_v31 = vsel %vm6100_vm7, %v6093_v14, %v6062_v25  ;;  %v6096_v41 = vsel %vm6091_vm6, %v6087_v43, %v6036_v18  ;;  %v16890_v25 = vld [vmem:[#allocation10_spill] sm:$0xff] }
 0x91e   : > { %13374 = vmatmul.mubr.msk.f32.vlgmr.msra.gmra.mxu0 %vm591_vm2, %v6102_v31 }
 0x920   : > { %v6038_v38 = vpop.permute.xlu1 %6037  ;;  %v6064_v51 = vpop.permute.xlu0 %6063 }
 0x921   : > { %v6103_v39 = vsel %vm6100_vm7, %v6094_v29, %v6064_v51  ;;  %v6097_v11 = vsel %vm6091_vm6, %v6088_v47, %v6038_v38  ;;  %v16892_v51 = vld [vmem:[#allocation13_spill] sm:$0xff] }
 0x922   : > { %13376 = vmatprep.mubr.msk.f32.mxu0 %vm591_vm2, %v6103_v39 }
 0x924   : > { %v6066_v15 = vpop.permute.xlu1 %6065  ;;  %v6008_v63 = vpop.permute.xlu0 %6007 }
 0x925   : > { %v6104_v23 = vsel %vm6100_vm7, %v6095_v52, %v6066_v15  ;;  %v6089_v57 = vsel %vm732_vm4, %v2017_v19, %v6008_v63 }
 0x926   : > { %13377 = vmatmul.mubr.msk.f32.gmra.mxu0 %vm591_vm2, %v6104_v23  ;;  %v16894_v23 = vld [vmem:[#allocation15_spill] sm:$0xff] }
 0x928   : > { %v6010_v58 = vpop.permute.xlu1 %6009  ;;  %v6068_v13 = vpop.permute.xlu0 %6067 }
 0x929   : > { %v6105_v46 = vsel %vm6100_vm7, %v6096_v41, %v6068_v13  ;;  %v6090_v42 = vsel %vm732_vm4, %v2018_v24, %v6010_v58  ;;  %v16895_v41 = vld [vmem:[#allocation14_spill] sm:$0xff] }
 0x92a   : > { %13379 = vmatprep.mubr.msk.f32.mxu0 %vm591_vm2, %v6105_v46 }
 0x92c   : > { %v6070_v27 = vpop.permute.xlu1 %6069  ;;  %v6040_v61 = vpop.permute.xlu0 %6039 }
 0x92d   : > { %v6106_v2 = vsel %vm6100_vm7, %v6097_v11, %v6070_v27  ;;  %v6098_v7 = vsel %vm6091_vm6, %v6089_v57, %v6040_v61 }
 0x92e   : > { %13380 = vmatmul.mubr.msk.f32.gmra.mxu0 %vm591_vm2, %v6106_v2 }
 0x930   : > { %v6042_v55 = vpop.permute.xlu1 %6041 }
 0x931   : > { %v6099_v49 = vsel %vm6091_vm6, %v6090_v42, %v6042_v55 }
 0x955   : > { %v6072_v40 = vpop.permute.xlu0 %6071 }
 0x956   : > { %v6107_v20 = vsel %vm6100_vm7, %v6098_v7, %v6072_v40 }
 0x957   : > { %13382 = vmatprep.mubr.msk.f32.mxu0 %vm591_vm2, %v6107_v20 }
 0x959   : > { %v6074_v28 = vpop.permute.xlu1 %6073 }
 0x95a   : > { %v6108_v0 = vsel %vm6100_vm7, %v6099_v49, %v6074_v28 }
 0x95b   : > { %13383 = vmatmul.mubr.msk.f32.gmra.mxu0 %vm591_vm2, %v6108_v0 }
 0x95c   : > { %13387 = vmatprep.mubr.msk.f32.mxu0 %vm14202_vm3, %v16882_v37 }
 0x9de   : > { %v13375_v45 = vpop.f32.mrf.mxu0 }
 0x9df   : > { %v6211_v53 = vadd.f32 %v13375_v45, %v12550_v12 }
 0x9e0   : > { %v6205_v16 = vpop.f32.mrf.mxu0 }
 0x9e1   : > { %v6245_v32 = vadd.f32 %v6211_v53, %v16888_v34  ;;  %v6206_v1 = vadd.f32 %v12550_v12, %v6205_v16 }
 0x9e3   : > { %v6244_v60 = vadd.f32 %v6206_v1, %v16889_v22  ;;  %v6255_v50 = vsel %vm591_vm2, %v6245_v32, 0.0 }
 0x9e4   : > { %6256 = vadd.xlane.f32.xlu1 %v6255_v50  ;;  %v12575_v50 = vld [vmem:[%s16818_s3 + $0xf0] sm:$0xff] }
 0x9e5   : > { %v6252_v5 = vsel %vm591_vm2, %v6244_v60, 0.0 }
 0x9e6   : > { %6253 = vadd.xlane.f32.xlu0 %v6252_v5  ;;  %v13378_v48 = vpop.f32.mrf.mxu0  ;;  %v12574_v5 = vld [vmem:[%s16818_s3 + $0xe8] sm:$0xff] }
 0x9e7   : > { %v6221_v35 = vadd.f32 %v13378_v48, %v12550_v12  ;;  %v12573_v48 = vld [vmem:[%s16818_s3 + $0xe0] sm:$0xff] }
 0x9e8   : > { %v6215_v17 = vpop.f32.mrf.mxu0 }
 0x9e9   : > { %v6216_v14 = vadd.f32 %v12550_v12, %v6215_v17  ;;  %v6247_v31 = vadd.f32 %v6221_v35, %v16891_v8  ;;  %v12572_v17 = vld [vmem:[%s16818_s3 + $0xd8] sm:$0xff]  ;;  %v12571_v35 = vld [vmem:[%s16818_s3 + $0xd0] sm:$0xff] }
 0x9ea   : > { %v12567_v8 = vld [vmem:[%s16818_s3 + $0xb0] sm:$0xff] }
 0x9eb   : > { %v6246_v18 = vadd.f32 %v6216_v14, %v16890_v25  ;;  %v6261_v39 = vsel %vm591_vm2, %v6247_v31, 0.0  ;;  %v12570_v14 = vld [vmem:[%s16818_s3 + $0xc8] sm:$0xff]  ;;  %v12569_v25 = vld [vmem:[%s16818_s3 + $0xc0] sm:$0xff] }
 0x9ed   : > { %v6258_v33 = vsel %vm591_vm2, %v6246_v18, 0.0 }
 0x9ee   : > { %6259 = vadd.xlane.f32.xlu0 %v6258_v33  ;;  %v13381_v30 = vpop.f32.mrf.mxu0  ;;  %v12565_v33 = vld [vmem:[%s16818_s3 + $0xa0] sm:$0xff] }
 0x9ef   : > { %v6231_v29 = vadd.f32 %v13381_v30, %v12550_v12  ;;  %v12564_v30 = vld [vmem:[%s16818_s3 + $0x98] sm:$0xff] }
 0x9f0   : > { %v6225_v38 = vpop.f32.mrf.mxu0 }
 0x9f1   : > { %v6249_v26 = vadd.f32 %v6231_v29, %v16892_v51  ;;  %v6226_v6 = vadd.f32 %v12550_v12, %v6225_v38  ;;  %v12563_v29 = vld [vmem:[%s16818_s3 + $0x90] sm:$0xff]  ;;  %v12562_v38 = vld [vmem:[%s16818_s3 + $0x88] sm:$0xff]  ;;  %v12561_v51 = vld [vmem:[%s16818_s3 + $0x80] sm:$0xff] }
 0x9f2   : > { %6262 = vadd.xlane.f32.xlu0 %v6261_v39 }
 0x9f3   : > { %v6248_v36 = vadd.f32 %v6226_v6, %v16893_v21  ;;  %v6267_v52 = vsel %vm591_vm2, %v6249_v26, 0.0 }
 0x9f5   : > { %v6264_v15 = vsel %vm591_vm2, %v6248_v36, 0.0 }
 0x9f6   : > { %6268 = vadd.xlane.f32.xlu0 %v6267_v52  ;;  %6265 = vadd.xlane.f32.xlu1 %v6264_v15 }
 0xa1b   : > { %v13384_v63 = vpop.f32.mrf.mxu0 }
 0xa1c   : > { %v6241_v4 = vadd.f32 %v13384_v63, %v12550_v12 }
 0xa1d   : > { %v6235_v9 = vpop.f32.mrf.mxu0 }
 0xa1e   : > { %v15483_v56 = vadd.f32 %v6241_v4, %v16894_v23  ;;  %v6236_v43 = vadd.f32 %v12550_v12, %v6235_v9 }
 0xa20   : > { %v15486_v58 = vadd.f32 %v6236_v43, %v16895_v41  ;;  %v6273_v13 = vsel %vm591_vm2, %v15483_v56, 0.0 }
 0xa21   : > { %6274 = vadd.xlane.f32.xlu0 %v6273_v13 }
 0xa22   : > { %v6270_v59 = vsel %vm591_vm2, %v15486_v58, 0.0 }
 0xa23   : > { %6271 = vadd.xlane.f32.xlu1 %v6270_v59 }
 0xa6d   : > { %v6257_v10 = vpop.xlane.xlu1 %6256 }
 0xa6e   : > { %v6278_v46 = vmul.f32 0.015625, %v6257_v10 }
 0xa6f   : > { %v6254_v47 = vpop.xlane.xlu0 %6253 }
 0xa70   : > { %v15492_v11 = vsub.f32 %v6245_v32, %v6278_v46  ;;  %v6277_v27 = vmul.f32 0.015625, %v6254_v47 }
 0xa72   : > { %v15494_v2 = vsub.f32 %v6244_v60, %v6277_v27  ;;  %v6294_v54 = vmul.f32 %v15492_v11, %v15492_v11  ;;  %v12576_v60 = vld [vmem:[%s16818_s3 + $0xf8] sm:$0xff] }
 0xa73   : > { %6468 = vmatprep.subr.mxu1 %v12576_v60 }
 0xa74   : > { %v6304_v61 = vsel %vm591_vm2, %v6294_v54, 0.0  ;;  %v6293_v3 = vmul.f32 %v15494_v2, %v15494_v2  ;;  %6469 = vmatpush1.msra.mxu1 %v12575_v50 }
 0xa75   : > { %6305 = vadd.xlane.f32.xlu0 %v6304_v61  ;;  %6470 = vmatprep.subr.mxu1 %v12574_v5 }
 0xa76   : > { %v6301_v19 = vsel %vm591_vm2, %v6293_v3, 0.0  ;;  %6471 = vmatpush1.msra.mxu1 %v12573_v48 }
 0xa77   : > { %6302 = vadd.xlane.f32.xlu1 %v6301_v19  ;;  %v6260_v44 = vpop.xlane.xlu0 %6259  ;;  %6472 = vmatprep.subr.mxu1 %v12572_v17 }
 0xa78   : > { %v6279_v57 = vmul.f32 0.015625, %v6260_v44  ;;  %6473 = vmatpush1.msra.mxu1 %v12571_v35 }
 0xa79   : > { %6474 = vmatprep.subr.mxu1 %v12570_v14 }
 0xa7a   : > { %v15502_v7 = vsub.f32 %v6246_v18, %v6279_v57  ;;  %6475 = vmatpush1.msra.mxu1 %v12569_v25  ;;  %v12568_v18 = vld [vmem:[%s16818_s3 + $0xb8] sm:$0xff] }
 0xa7b   : > { %v6263_v55 = vpop.xlane.xlu0 %6262  ;;  %6476 = vmatprep.subr.mxu1 %v12568_v18 }
 0xa7c   : > { %v6280_v40 = vmul.f32 0.015625, %v6263_v55  ;;  %v6295_v62 = vmul.f32 %v15502_v7, %v15502_v7  ;;  %6477 = vmatpush1.msra.mxu1 %v12567_v8 }
 0xa7e   : > { %v15506_v24 = vsub.f32 %v6247_v31, %v6280_v40  ;;  %v6307_v20 = vsel %vm591_vm2, %v6295_v62, 0.0  ;;  %v12566_v31 = vld [vmem:[%s16818_s3 + $0xa8] sm:$0xff] }
 0xa7f   : > { %v6266_v42 = vpop.xlane.xlu1 %6265  ;;  %6308 = vadd.xlane.f32.xlu1 %v6307_v20  ;;  %v6269_v49 = vpop.xlane.xlu0 %6268  ;;  %6478 = vmatprep.subr.mxu1 %v12566_v31 }
 0xa80   : > { %v6281_v28 = vmul.f32 0.015625, %v6266_v42  ;;  %v6282_v0 = vmul.f32 0.015625, %v6269_v49  ;;  %v6296_v12 = vmul.f32 %v15506_v24, %v15506_v24  ;;  %6479 = vmatpush1.msra.mxu1 %v12565_v33  ;;  %v12559_v49 = vld [vmem:[%s16822_s7] ss:$0 sm:$0xff] }
 0xa81   : > { %6480 = vmatprep.subr.mxu1 %v12564_v30 }
 0xa82   : > { %v15511_v45 = vsub.f32 %v6248_v36, %v6281_v28  ;;  %v15513_v53 = vsub.f32 %v6249_v26, %v6282_v0  ;;  %v6310_v16 = vsel %vm591_vm2, %v6296_v12, 0.0  ;;  %6481 = vmatpush1.msra.mxu1 %v12563_v29  ;;  %v12560_v0 = vld [vmem:[%s16823_s8] ss:$0 sm:$0xff] }
 0xa83   : > { %6311 = vadd.xlane.f32.xlu0 %v6310_v16  ;;  %6482 = vmatprep.subr.mxu1 %v12562_v38 }
 0xa84   : > { %v6297_v34 = vmul.f32 %v15511_v45, %v15511_v45  ;;  %v6298_v32 = vmul.f32 %v15513_v53, %v15513_v53  ;;  %6483 = vmatpush1.msra.mxu1 %v12561_v51 }
 0xa85   : > { %13410 = vmatprep.subr.mxu1 %v16882_v37 }
 0xa86   : > { %v6313_v1 = vsel %vm591_vm2, %v6297_v34, 0.0  ;;  %v6316_v22 = vsel %vm591_vm2, %v6298_v32, 0.0 }
 0xa87   : > { %6314 = vadd.xlane.f32.xlu1 %v6313_v1  ;;  %6317 = vadd.xlane.f32.xlu0 %v6316_v22 }
 0xaaa   : > { %v6275_v26 = vpop.xlane.xlu0 %6274 }
 0xaab   : > { %v6284_v6 = vmul.f32 0.015625, %v6275_v26 }
 0xaac   : > { %v6272_v39 = vpop.xlane.xlu1 %6271 }
 0xaad   : > { %v15572_v21 = vsub.f32 %v15483_v56, %v6284_v6  ;;  %v6283_v36 = vmul.f32 0.015625, %v6272_v39 }
 0xaaf   : > { %v15575_v52 = vsub.f32 %v15486_v58, %v6283_v36  ;;  %v6300_v15 = vmul.f32 %v15572_v21, %v15572_v21 }
 0xab1   : > { %v6322_v63 = vsel %vm591_vm2, %v6300_v15, 0.0  ;;  %v6299_v4 = vmul.f32 %v15575_v52, %v15575_v52 }
 0xab2   : > { %6323 = vadd.xlane.f32.xlu0 %v6322_v63 }
 0xab3   : > { %v6319_v9 = vsel %vm591_vm2, %v6299_v4, 0.0 }
 0xab4   : > { %6320 = vadd.xlane.f32.xlu1 %v6319_v9 }
 0xafe   : > { %v6306_v23 = vpop.xlane.xlu0 %6305 }
 0xaff   : > { %v6326_v43 = vmul.f32 0.015625, %v6306_v23 }
 0xb00   : > { %v6303_v56 = vpop.xlane.xlu1 %6302 }
 0xb01   : > { %v6334_v41 = vadd.f32 1e-05, %v6326_v43  ;;  %v6325_v13 = vmul.f32 0.015625, %v6303_v56 }
 0xb03   : > { %13946 = vrsqrt.f32 %v6334_v41  ;;  %v6333_v58 = vadd.f32 1e-05, %v6325_v13 }
 0xb05   : > { %13948 = vrsqrt.f32 %v6333_v58 }
 0xb08   : > { %v6309_v59 = vpop.xlane.xlu1 %6308 }
 0xb09   : > { %v6327_v10 = vmul.f32 0.015625, %v6309_v59 }
 0xb0b   : > { %v6335_v46 = vadd.f32 1e-05, %v6327_v10 }
 0xb0c   : > { %v6312_v47 = vpop.xlane.xlu0 %6311 }
 0xb0d   : > { %13950 = vrsqrt.f32 %v6335_v46  ;;  %v6328_v27 = vmul.f32 0.015625, %v6312_v47 }
 0xb0f   : > { %v6336_v54 = vadd.f32 1e-05, %v6328_v27 }
 0xb10   : > { %v13947_v61 = vpop.eup %13946  ;;  %v6315_v3 = vpop.xlane.xlu1 %6314 }
 0xb11   : > { %v6318_v19 = vpop.xlane.xlu0 %6317  ;;  %13952 = vrsqrt.f32 %v6336_v54  ;;  %v6329_v44 = vmul.f32 0.015625, %v6315_v3  ;;  %v6350_v42 = vmul.f32 %v13947_v61, %v15492_v11 }
 0xb12   : > { %v6330_v57 = vmul.f32 0.015625, %v6318_v19  ;;  %v13949_v55 = vpop.eup %13948 }
 0xb13   : > { %v6337_v40 = vadd.f32 1e-05, %v6329_v44  ;;  %v6349_v20 = vmul.f32 %v13949_v55, %v15494_v2  ;;  %v6365_v16 = vmul.f32 %v12559_v49, %v6350_v42 }
 0xb14   : > { %v6338_v62 = vadd.f32 1e-05, %v6330_v57 }
 0xb15   : > { %13954 = vrsqrt.f32 %v6337_v40  ;;  %v6364_v28 = vmul.f32 %v12559_v49, %v6349_v20  ;;  %v15596_v11 = vadd.f32 %v12560_v0, %v6365_v16 }
 0xb16   : > { %13956 = vrsqrt.f32 %v6338_v62 }
 0xb17   : > { %v15591_v12 = vadd.f32 %v12560_v0, %v6364_v28  ;;  %16897 = vst [vmem:[#allocation18_spill] sm:$0xff] %v15596_v11 }
 0xb19   : > { %16896 = vst [vmem:[#allocation17_spill] sm:$0xff] %v15591_v12  ;;  %12579 = vmatmul.mubr.msk.f32.vlgmr.msra.gmra.mxu1 %vm591_vm2, %v15591_v12 }
 0xb1a   : > { %v13951_v2 = vpop.eup %13950  ;;  %6522 = vmatprep.mubr.f32.mxu1 %v16882_v37 }
 0xb1b   : > { %v6351_v34 = vmul.f32 %v13951_v2, %v15502_v7 }
 0xb1d   : > { %12580 = vmatmul.mubr.msk.f32.gmra.mxu1 %vm591_vm2, %v15596_v11  ;;  %v6366_v32 = vmul.f32 %v12559_v49, %v6351_v34 }
 0xb1e   : > { %v13953_v1 = vpop.eup %13952  ;;  %6528 = vmatprep.mubr.f32.mxu1 %v16882_v37 }
 0xb1f   : > { %v15602_v22 = vadd.f32 %v12560_v0, %v6366_v32  ;;  %v6352_v60 = vmul.f32 %v13953_v1, %v15506_v24 }
 0xb21   : > { %16898 = vst [vmem:[#allocation19_spill] sm:$0xff] %v15602_v22  ;;  %12581 = vmatmul.mubr.msk.f32.gmra.mxu1 %vm591_vm2, %v15602_v22  ;;  %v6367_v50 = vmul.f32 %v12559_v49, %v6352_v60 }
 0xb22   : > { %v13955_v5 = vpop.eup %13954  ;;  %6534 = vmatprep.mubr.f32.mxu1 %v16882_v37 }
 0xb23   : > { %v13957_v48 = vpop.eup %13956  ;;  %v15608_v7 = vadd.f32 %v12560_v0, %v6367_v50  ;;  %v6353_v17 = vmul.f32 %v13955_v5, %v15511_v45 }
 0xb24   : > { %v6354_v35 = vmul.f32 %v13957_v48, %v15513_v53 }
 0xb25   : > { %16899 = vst [vmem:[#allocation20_spill] sm:$0xff] %v15608_v7  ;;  %12582 = vmatmul.mubr.msk.f32.gmra.mxu1 %vm591_vm2, %v15608_v7  ;;  %v6368_v14 = vmul.f32 %v12559_v49, %v6353_v17 }
 0xb26   : > { %6540 = vmatprep.mubr.f32.mxu1 %v16882_v37  ;;  %v6369_v25 = vmul.f32 %v12559_v49, %v6354_v35 }
 0xb27   : > { %v15615_v24 = vadd.f32 %v12560_v0, %v6368_v14 }
 0xb28   : > { %v15620_v18 = vadd.f32 %v12560_v0, %v6369_v25 }
 0xb29   : > { %16900 = vst [vmem:[#allocation21_spill] sm:$0xff] %v15615_v24  ;;  %12583 = vmatmul.mubr.msk.f32.gmra.mxu1 %vm591_vm2, %v15615_v24 }
 0xb2a   : > { %6546 = vmatprep.mubr.f32.mxu1 %v16882_v37  ;;  %16901 = vst [vmem:[#allocation9_spill] sm:$0xff] %v15620_v18 }
 0xb2d   : > { %12584 = vmatmul.mubr.msk.f32.gmra.mxu1 %vm591_vm2, %v15620_v18 }
 0xb2e   : > { %6552 = vmatprep.mubr.f32.mxu1 %v16882_v37 }
 0xb3b   : > { %v6324_v45 = vpop.xlane.xlu0 %6323 }
 0xb3c   : > { %v6332_v53 = vmul.f32 0.015625, %v6324_v45 }
 0xb3d   : > { %v6321_v8 = vpop.xlane.xlu1 %6320 }
 0xb3e   : > { %v6340_v31 = vadd.f32 1e-05, %v6332_v53  ;;  %v6331_v33 = vmul.f32 0.015625, %v6321_v8 }
 0xb40   : > { %13958 = vrsqrt.f32 %v6340_v31  ;;  %v6339_v30 = vadd.f32 1e-05, %v6331_v33 }
 0xb42   : > { %13960 = vrsqrt.f32 %v6339_v30 }
 0xb4d   : > { %v13959_v29 = vpop.eup %13958 }
 0xb4e   : > { %v6356_v38 = vmul.f32 %v13959_v29, %v15572_v21  ;;  %v15641_v21 = vld [vmem:[%s16819_s4 + $0x2] sm:$0x3] }
 0xb4f   : > { %v13961_v51 = vpop.eup %13960 }
 0xb50   : > { %v6355_v26 = vmul.f32 %v13961_v51, %v15575_v52  ;;  %v6371_v6 = vmul.f32 %v12559_v49, %v6356_v38  ;;  %v16904_v52 = vld [vmem:[#allocation16_spill] sm:$0xff] }
 0xb51   : > { %v16905_v63 = vsub.s32 0, %v16904_v52  ;;  %v16909_v32 = vsub.s32 1, %v16904_v52 }
 0xb52   : > { %v6370_v39 = vmul.f32 %v12559_v49, %v6355_v26  ;;  %v15627_v36 = vadd.f32 %v12560_v0, %v6371_v6 }
 0xb53   : > { %v6421_v4 = vrot.slane %v15641_v21, %v16905_v63  ;;  %v15743_v1 = vrot.slane %v15641_v21, %v16909_v32 }
 0xb54   : > { %16902 = vst [vmem:[#allocation8_spill] sm:$0xff] %v15627_v36  ;;  %v15629_v15 = vadd.f32 %v12560_v0, %v6370_v39 }
 0xb56   : > { %16903 = vst [vmem:[#allocation10_spill] sm:$0xff] %v15629_v15  ;;  %12585 = vmatmul.mubr.msk.f32.gmra.mxu1 %vm591_vm2, %v15629_v15 }
 0xb57   : > { %6558 = vmatprep.mubr.f32.mxu1 %v16882_v37 }
 0xb5a   : > { %12586 = vmatmul.mubr.msk.f32.gmra.mxu1 %vm591_vm2, %v15627_v36 }
 0xb5b   : > { %13412 = vmatprep.mubr.msk.f32.mxu1 %vm14202_vm3, %v16882_v37 }
 0xbd9   : > { %v6518_v9 = vpop.f32.mrf.mxu1 }
 0xbda   : > { %v15646_v23 = vadd.f32 %v6518_v9, %v6421_v4 }
 0xbdb   : > { %v15648_v43 = vpop.f32.mrf.mxu1 }
 0xbdc   : > { %6566 = vrot.lane.b32.xlu1 %v15646_v23, %s16906_s24  ;;  %v15749_v50 = vadd.f32 %v15648_v43, %v15743_v1 }
 0xbdd   : > { %v6524_v56 = vpop.f32.mrf.mxu1 }
 0xbde   : > { %v15652_v41 = vadd.f32 %v6524_v56, %v6421_v4 }
 0xbdf   : > { %v15654_v13 = vpop.f32.mrf.mxu1 }
 0xbe0   : > { %6643 = vrot.lane.b32.xlu0 %v15652_v41, %s16906_s24  ;;  %v15760_v48 = vadd.f32 %v15654_v13, %v15743_v1 }
 0xbe1   : > { %v6530_v58 = vpop.f32.mrf.mxu1 }
 0xbe2   : > { %v15658_v59 = vadd.f32 %v6530_v58, %v6421_v4 }
 0xbe3   : > { %v15660_v10 = vpop.f32.mrf.mxu1 }
 0xbe4   : > { %6720 = vrot.lane.b32.xlu1 %v15658_v59, %s16906_s24 }
 0xbe5   : > { %v6536_v46 = vpop.f32.mrf.mxu1 }
 0xbe6   : > { %v15664_v47 = vadd.f32 %v6536_v46, %v6421_v4  ;;  %v15823_v46 = vadd.f32 %v15660_v10, %v15743_v1 }
 0xbe7   : > { %v15666_v27 = vpop.f32.mrf.mxu1 }
 0xbe8   : > { %6797 = vrot.lane.b32.xlu1 %v15664_v47, %s16906_s24 }
 0xbe9   : > { %v6542_v54 = vpop.f32.mrf.mxu1 }
 0xbea   : > { %v15670_v61 = vadd.f32 %v6542_v54, %v6421_v4  ;;  %v15831_v54 = vadd.f32 %v15666_v27, %v15743_v1 }
 0xbeb   : > { %v15672_v3 = vpop.f32.mrf.mxu1 }
 0xbec   : > { %6874 = vrot.lane.b32.xlu0 %v15670_v61, %s16906_s24 }
 0xbed   : > { %v6548_v19 = vpop.f32.mrf.mxu1 }
 0xbee   : > { %v15676_v44 = vadd.f32 %v6548_v19, %v6421_v4  ;;  %v15843_v19 = vadd.f32 %v15672_v3, %v15743_v1 }
 0xbef   : > { %v15680_v57 = vpop.f32.mrf.mxu1 }
 0xbf0   : > { %6951 = vrot.lane.b32.xlu1 %v15676_v44, %s16906_s24  ;;  %v15839_v10 = vadd.f32 %v15680_v57, %v15743_v1 }
 0xc16   : > { %v6554_v55 = vpop.f32.mrf.mxu1 }
 0xc17   : > { %v15682_v40 = vadd.f32 %v6554_v55, %v6421_v4 }
 0xc18   : > { %v15684_v62 = vpop.f32.mrf.mxu1 }
 0xc19   : > { %7028 = vrot.lane.b32.xlu0 %v15682_v40, %s16906_s24  ;;  %v15854_v55 = vadd.f32 %v15684_v62, %v15743_v1 }
 0xc1a   : > { %v6560_v20 = vpop.f32.mrf.mxu1 }
 0xc1b   : > { %v15688_v42 = vadd.f32 %v6560_v20, %v6421_v4 }
 0xc1c   : > { %v6562_v6 = vpop.f32.mrf.mxu1 }
 0xc1d   : > { %7933 = vrot.lane.b32.xlu0 %v15652_v41, %s16907_s25  ;;  %7105 = vrot.lane.b32.xlu1 %v15688_v42, %s16906_s24  ;;  %v15850_v27 = vadd.f32 %v6562_v6, %v15743_v1  ;;  %s14211_s24 = smov [#allocation5]  }
 0xc21   : > { %8011 = vrot.lane.b32.xlu0 %v15658_v59, %s16907_s25  ;;  %7855 = vrot.lane.b32.xlu1 %v15646_v23, %s16907_s25 }
 0xc25   : > { %7853 = vrot.lane.b32.xlu1 %v15646_v23, %s16908_s22 }
 0xc29   : > { %7931 = vrot.lane.b32.xlu1 %v15652_v41, %s16908_s22 }
 0xc2d   : > { %8089 = vrot.lane.b32.xlu1 %v15664_v47, %s16907_s25 }
 0xc4e   : > { %v6567_v49 = vpop.permute.xlu1 %6566 }
 0xc4f   : > { %13386 = vmatpush3.xpose.msk.msra.mxu0 %vm732_vm4, %v6567_v49 }
 0xc50   : > { %13390 = vmatprep.subr.mxu0 %v16882_v37 }
 0xc52   : > { %13388 = vmatmul.mubr.msk.f32.vlgmr.msra.gmra.mxu0 %vm732_vm4, %v15646_v23  ;;  %v6644_v28 = vpop.permute.xlu0 %6643 }
 0xc53   : > { %13391 = vmatpush3.xpose.msk.msra.mxu0 %vm732_vm4, %v6644_v28  ;;  %13392 = vmatprep.mubr.msk.f32.mxu0 %vm14202_vm3, %v16882_v37 }
 0xc54   : > { %13395 = vmatprep.subr.mxu0 %v16882_v37 }
 0xc56   : > { %v6721_v0 = vpop.permute.xlu1 %6720  ;;  %13393 = vmatmul.mubr.msk.f32.vlgmr.msra.gmra.mxu0 %vm732_vm4, %v15652_v41 }
 0xc57   : > { %13396 = vmatpush3.xpose.msk.msra.mxu0 %vm732_vm4, %v6721_v0  ;;  %13397 = vmatprep.mubr.msk.f32.mxu0 %vm14202_vm3, %v16882_v37 }
 0xc58   : > { %13400 = vmatprep.subr.mxu0 %v16882_v37 }
 0xc5a   : > { %v6798_v16 = vpop.permute.xlu1 %6797  ;;  %13398 = vmatmul.mubr.msk.f32.vlgmr.msra.gmra.mxu0 %vm732_vm4, %v15658_v59 }
 0xc5b   : > { %13401 = vmatpush3.xpose.msk.msra.mxu0 %vm732_vm4, %v6798_v16  ;;  %13402 = vmatprep.mubr.msk.f32.mxu0 %vm14202_vm3, %v16882_v37 }
 0xc5c   : > { %13405 = vmatprep.subr.mxu0 %v16882_v37 }
 0xc5e   : > { %13403 = vmatmul.mubr.msk.f32.vlgmr.msra.gmra.mxu0 %vm732_vm4, %v15664_v47  ;;  %v6875_v2 = vpop.permute.xlu0 %6874 }
 0xc5f   : > { %13406 = vmatpush3.xpose.msk.msra.mxu0 %vm732_vm4, %v6875_v2  ;;  %13407 = vmatprep.mubr.msk.f32.mxu0 %vm14202_vm3, %v16882_v37 }
 0xc60   : > { %13415 = vmatprep.subr.mxu0 %v16882_v37 }
 0xc62   : > { %v6952_v34 = vpop.permute.xlu1 %6951  ;;  %13408 = vmatmul.mubr.msk.f32.vlgmr.msra.gmra.mxu0 %vm732_vm4, %v15670_v61 }
 0xc63   : > { %13411 = vmatpush3.xpose.msk.msra.mxu1 %vm732_vm4, %v6952_v34  ;;  %13417 = vmatprep.mubr.msk.f32.mxu0 %vm14202_vm3, %v16882_v37 }
 0xc64   : > { %13420 = vmatprep.subr.mxu1 %v16882_v37 }
 0xc66   : > { %13413 = vmatmul.mubr.msk.f32.vlgmr.msra.gmra.mxu1 %vm732_vm4, %v15676_v44 }
 0xc67   : > { %13422 = vmatprep.mubr.msk.f32.mxu1 %vm14202_vm3, %v16882_v37 }
 0xc8b   : > { %v7029_v60 = vpop.permute.xlu0 %7028 }
 0xc8c   : > { %13416 = vmatpush3.xpose.msk.msra.mxu0 %vm732_vm4, %v7029_v60 }
 0xc8d   : > { %13425 = vmatprep.subr.mxu0 %v16882_v37 }
 0xc8f   : > { %v7106_v5 = vpop.permute.xlu1 %7105  ;;  %13418 = vmatmul.mubr.msk.f32.vlgmr.msra.gmra.mxu0 %vm732_vm4, %v15682_v40  ;;  %v15874_v62 = vpop.permute.xlu0 %7933 }
 0xc90   : > { %13421 = vmatpush3.xpose.msk.msra.mxu1 %vm732_vm4, %v7106_v5  ;;  %13426 = vmatpush3.msra.mxu0 %v15749_v50 }
 0xc91   : > { %13430 = vmatprep.subr.mxu1 %v16882_v37  ;;  %13427 = vmatprep.mubr.msk.f32.mxu0 %vm14202_vm3, %v16882_v37 }
 0xc92   : > { %13435 = vmatprep.subr.mxu0 %v16882_v37 }
 0xc93   : > { %13423 = vmatmul.mubr.msk.f32.vlgmr.msra.gmra.mxu1 %vm732_vm4, %v15688_v42  ;;  %v15862_v3 = vpop.permute.xlu1 %7855  ;;  %v15880_v49 = vpop.permute.xlu0 %8011 }
 0xc94   : > { %13431 = vmatpush3.msra.mxu1 %v15760_v48  ;;  %13432 = vmatprep.mubr.msk.f32.mxu1 %vm14202_vm3, %v16882_v37 }
 0xc95   : > { %13440 = vmatprep.subr.mxu1 %v16882_v37 }
 0xc97   : > { %v15870_v57 = vpop.permute.xlu1 %7853 }
 0xc9b   : > { %v15878_v20 = vpop.permute.xlu1 %7931 }
 0xc9f   : > { %v15882_v28 = vpop.permute.xlu1 %8089 }
 0xd12   : > { %v15769_v17 = vpop.f32.mrf.mxu0 }
 0xd13   : > { %v7181_v35 = vsel %vm1346_vm5, %v15769_v17, -inf }
 0xd14   : > { %v13389_v14 = vpop.f32.mrf.mxu0  ;;  %7182 = vmax.xlane.f32.xlu0 %v7181_v35 }
 0xd16   : > { %v15773_v25 = vpop.f32.mrf.mxu0 }
 0xd17   : > { %v7184_v45 = vsel %vm1346_vm5, %v15773_v25, -inf }
 0xd18   : > { %7185 = vmax.xlane.f32.xlu1 %v7184_v45  ;;  %v13394_v53 = vpop.f32.mrf.mxu0 }
 0xd1a   : > { %v15777_v8 = vpop.f32.mrf.mxu0 }
 0xd1b   : > { %v7187_v31 = vsel %vm1346_vm5, %v15777_v8, -inf }
 0xd1c   : > { %7188 = vmax.xlane.f32.xlu0 %v7187_v31  ;;  %v13399_v33 = vpop.f32.mrf.mxu0 }
 0xd1e   : > { %v15781_v30 = vpop.f32.mrf.mxu0 }
 0xd1f   : > { %v7190_v29 = vsel %vm1346_vm5, %v15781_v30, -inf }
 0xd20   : > { %7191 = vmax.xlane.f32.xlu0 %v7190_v29  ;;  %v13404_v38 = vpop.f32.mrf.mxu0 }
 0xd22   : > { %v15785_v51 = vpop.f32.mrf.mxu0 }
 0xd23   : > { %v7193_v26 = vsel %vm1346_vm5, %v15785_v51, -inf }
 0xd24   : > { %7194 = vmax.xlane.f32.xlu1 %v7193_v26  ;;  %v13409_v39 = vpop.f32.mrf.mxu0 }
 0xd26   : > { %v15789_v21 = vpop.f32.mrf.mxu1 }
 0xd27   : > { %v7196_v52 = vsel %vm1346_vm5, %v15789_v21, -inf }
 0xd28   : > { %v13414_v63 = vpop.f32.mrf.mxu1  ;;  %7197 = vmax.xlane.f32.xlu0 %v7196_v52 }
 0xd4f   : > { %v15793_v4 = vpop.f32.mrf.mxu0 }
 0xd50   : > { %v7199_v9 = vsel %vm1346_vm5, %v15793_v4, -inf }
 0xd51   : > { %7200 = vmax.xlane.f32.xlu1 %v7199_v9  ;;  %v13419_v43 = vpop.f32.mrf.mxu0 }
 0xd53   : > { %v15797_v56 = vpop.f32.mrf.mxu1 }
 0xd54   : > { %v7202_v13 = vsel %vm1346_vm5, %v15797_v56, -inf }
 0xd55   : > { %v13424_v58 = vpop.f32.mrf.mxu1  ;;  %7203 = vmax.xlane.f32.xlu0 %v7202_v13 }
 0xd62   : > { %8087 = vrot.lane.b32.xlu1 %v15664_v47, %s16908_s22 }
 0xd66   : > { %8245 = vrot.lane.b32.xlu1 %v15676_v44, %s16907_s25 }
 0xd6a   : > { %8243 = vrot.lane.b32.xlu1 %v15676_v44, %s16908_s22 }
 0xd6b   : > { %8009 = vrot.lane.b32.xlu0 %v15658_v59, %s16908_s22 }
 0xd6e   : > { %8401 = vrot.lane.b32.xlu1 %v15688_v42, %s16907_s25 }
 0xd6f   : > { %8167 = vrot.lane.b32.xlu0 %v15670_v61, %s16907_s25 }
 0xd72   : > { %8399 = vrot.lane.b32.xlu1 %v15688_v42, %s16908_s22 }
 0xd73   : > { %8165 = vrot.lane.b32.xlu0 %v15670_v61, %s16908_s22 }
 0xd76   : > { %8550 = vrot.lane.b32.xlu1 %v15749_v50, %s16908_s22 }
 0xd77   : > { %8323 = vrot.lane.b32.xlu0 %v15682_v40, %s16907_s25 }
 0xd7a   : > { %8704 = vrot.lane.b32.xlu1 %v15823_v46, %s16908_s22 }
 0xd7b   : > { %8321 = vrot.lane.b32.xlu0 %v15682_v40, %s16908_s22 }
 0xd7e   : > { %8781 = vrot.lane.b32.xlu1 %v15831_v54, %s16908_s22 }
 0xd7f   : > { %8627 = vrot.lane.b32.xlu0 %v15760_v48, %s16908_s22 }
 0xd82   : > { %8935 = vrot.lane.b32.xlu1 %v15839_v10, %s16908_s22 }
 0xd83   : > { %8858 = vrot.lane.b32.xlu0 %v15843_v19, %s16908_s22 }
 0xd86   : > { %9089 = vrot.lane.b32.xlu1 %v15850_v27, %s16908_s22 }
 0xd87   : > { %9012 = vrot.lane.b32.xlu0 %v15854_v55, %s16908_s22 }
 0xd8a   : > { %9261 = vrot.lane.b32.xlu1 %v15652_v41, %s16910_s14 }
 0xd8b   : > { %9183 = vrot.lane.b32.xlu0 %v15646_v23, %s16910_s14 }
 0xd8e   : > { %9259 = vrot.lane.b32.xlu1 %v15652_v41, %s16911_s12 }
 0xd8f   : > { %9181 = vrot.lane.b32.xlu0 %v15646_v23, %s16911_s12 }
 0xd92   : > { %9417 = vrot.lane.b32.xlu1 %v15664_v47, %s16910_s14 }
 0xd93   : > { %9339 = vrot.lane.b32.xlu0 %v15658_v59, %s16910_s14 }
 0xd9d   : > { %v7183_v0 = vpop.xlane.xlu0 %7182 }
 0xd9e   : > { %v7205_v16 = vsub.f32 %v15769_v17, %v7183_v0 }
 0xda0   : > { %v7213_v2 = vmul.f32 1.442695, %v7205_v16 }
 0xda1   : > { %v7186_v34 = vpop.xlane.xlu1 %7185 }
 0xda2   : > { %13962 = vpow2.f32 %v7213_v2  ;;  %v7206_v32 = vsub.f32 %v15773_v25, %v7186_v34 }
 0xda4   : > { %v7215_v1 = vmul.f32 1.442695, %v7206_v32 }
 0xda5   : > { %v7189_v60 = vpop.xlane.xlu0 %7188 }
 0xda6   : > { %13964 = vpow2.f32 %v7215_v1  ;;  %v7207_v5 = vsub.f32 %v15777_v8, %v7189_v60 }
 0xda8   : > { %v7217_v35 = vmul.f32 1.442695, %v7207_v5 }
 0xda9   : > { %v7192_v14 = vpop.xlane.xlu0 %7191 }
 0xdaa   : > { %13966 = vpow2.f32 %v7217_v35  ;;  %v7208_v45 = vsub.f32 %v15781_v30, %v7192_v14 }
 0xdac   : > { %v7219_v53 = vmul.f32 1.442695, %v7208_v45 }
 0xdad   : > { %v7195_v31 = vpop.xlane.xlu1 %7194 }
 0xdae   : > { %13968 = vpow2.f32 %v7219_v53  ;;  %v7209_v17 = vsub.f32 %v15785_v51, %v7195_v31 }
 0xdaf   : > { %v15889_v33 = vpop.eup %13962 }
 0xdb0   : > { %v7221_v29 = vmul.f32 1.442695, %v7209_v17  ;;  %13428 = vmatmul.mubr.msk.f32.vlgmr.msra.gmra.mxu0 %vm1346_vm5, %v15889_v33 }
 0xdb1   : > { %13436 = vmatpush3.msra.mxu0 %v15823_v46  ;;  %v7198_v25 = vpop.xlane.xlu0 %7197  ;;  %13437 = vmatprep.mubr.msk.f32.mxu0 %vm14202_vm3, %v16882_v37 }
 0xdb2   : > { %13970 = vpow2.f32 %v7221_v29  ;;  %v7210_v8 = vsub.f32 %v15789_v21, %v7198_v25  ;;  %13445 = vmatprep.subr.mxu0 %v16882_v37 }
 0xdb3   : > { %v15898_v30 = vpop.eup %13964 }
 0xdb4   : > { %v7223_v38 = vmul.f32 1.442695, %v7210_v8  ;;  %13433 = vmatmul.mubr.msk.f32.vlgmr.msra.gmra.mxu1 %vm1346_vm5, %v15898_v30 }
 0xdb5   : > { %13441 = vmatpush3.msra.mxu1 %v15831_v54  ;;  %13442 = vmatprep.mubr.msk.f32.mxu1 %vm14202_vm3, %v16882_v37 }
 0xdb6   : > { %13972 = vpow2.f32 %v7223_v38  ;;  %13450 = vmatprep.subr.mxu1 %v16882_v37 }
 0xdb7   : > { %v15906_v51 = vpop.eup %13966 }
 0xdb8   : > { %13438 = vmatmul.mubr.msk.f32.vlgmr.msra.gmra.mxu0 %vm1346_vm5, %v15906_v51 }
 0xdb9   : > { %13446 = vmatpush3.msra.mxu0 %v15843_v19  ;;  %13447 = vmatprep.mubr.msk.f32.mxu0 %vm14202_vm3, %v16882_v37 }
 0xdba   : > { %13455 = vmatprep.subr.mxu0 %v16882_v37 }
 0xdbb   : > { %v15914_v26 = vpop.eup %13968 }
 0xdbc   : > { %13443 = vmatmul.mubr.msk.f32.vlgmr.msra.gmra.mxu1 %vm1346_vm5, %v15914_v26 }
 0xdbd   : > { %13451 = vmatpush3.msra.mxu1 %v15839_v10  ;;  %13452 = vmatprep.mubr.msk.f32.mxu1 %vm14202_vm3, %v16882_v37 }
 0xdbe   : > { %13460 = vmatprep.subr.mxu1 %v16882_v37 }
 0xdbf   : > { %v15922_v6 = vpop.eup %13970 }
 0xdc0   : > { %13448 = vmatmul.mubr.msk.f32.vlgmr.msra.gmra.mxu0 %vm1346_vm5, %v15922_v6 }
 0xdc1   : > { %13456 = vmatpush3.msra.mxu0 %v15854_v55  ;;  %13457 = vmatprep.mubr.msk.f32.mxu0 %vm14202_vm3, %v16882_v37 }
 0xdc2   : > { %13465 = vmatprep.subr.mxu0 %v16882_v37 }
 0xdc3   : > { %v15930_v39 = vpop.eup %13972 }
 0xdc4   : > { %13453 = vmatmul.mubr.msk.f32.vlgmr.msra.gmra.mxu1 %vm1346_vm5, %v15930_v39 }
 0xdc5   : > { %13461 = vmatpush3.msra.mxu1 %v15850_v27  ;;  %13462 = vmatprep.mubr.msk.f32.mxu1 %vm14202_vm3, %v16882_v37 }
 0xdc6   : > { %13470 = vmatprep.subr.mxu1 %v16882_v37 }
 0xdda   : > { %v7201_v21 = vpop.xlane.xlu1 %7200 }
 0xddb   : > { %v7211_v52 = vsub.f32 %v15793_v4, %v7201_v21 }
 0xddd   : > { %v7225_v63 = vmul.f32 1.442695, %v7211_v52 }
 0xdde   : > { %v7204_v9 = vpop.xlane.xlu0 %7203  ;;  %v8088_v43 = vpop.permute.xlu1 %8087 }
 0xddf   : > { %13974 = vpow2.f32 %v7225_v63  ;;  %v7212_v13 = vsub.f32 %v15797_v56, %v7204_v9 }
 0xde1   : > { %v7227_v58 = vmul.f32 1.442695, %v7212_v13 }
 0xde2   : > { %v8010_v0 = vpop.permute.xlu0 %8009  ;;  %v8246_v16 = vpop.permute.xlu1 %8245 }
 0xde3   : > { %13976 = vpow2.f32 %v7227_v58 }
 0xde6   : > { %v8168_v2 = vpop.permute.xlu0 %8167  ;;  %v8244_v34 = vpop.permute.xlu1 %8243 }
 0xdea   : > { %v8166_v4 = vpop.permute.xlu0 %8165  ;;  %v8402_v1 = vpop.permute.xlu1 %8401 }
 0xdec   : > { %v15940_v32 = vpop.eup %13974 }
 0xded   : > { %13458 = vmatmul.mubr.msk.f32.vlgmr.msra.gmra.mxu0 %vm1346_vm5, %v15940_v32 }
 0xdee   : > { %13466 = vmatpush3.xpose.msk.msra.mxu0 %vm732_vm4, %v15862_v3  ;;  %13467 = vmatprep.mubr.msk.f32.mxu0 %vm14202_vm3, %v16882_v37  ;;  %v8324_v3 = vpop.permute.xlu0 %8323 }
 0xdef   : > { %13475 = vmatprep.subr.mxu0 %v16882_v37 }
 0xdf0   : > { %v15949_v56 = vpop.eup %13976 }
 0xdf1   : > { %13463 = vmatmul.mubr.msk.f32.vlgmr.msra.gmra.mxu1 %vm1346_vm5, %v15949_v56  ;;  %13468 = vmatmul.mubr.msk.f32.vlgmr.msra.gmra.mxu0 %vm732_vm4, %v15870_v57  ;;  %v8400_v57 = vpop.permute.xlu1 %8399 }
 0xdf2   : > { %13471 = vmatpush3.xpose.msk.msra.mxu1 %vm732_vm4, %v15874_v62  ;;  %13476 = vmatpush3.xpose.msk.msra.mxu0 %vm732_vm4, %v15880_v49  ;;  %v8322_v62 = vpop.permute.xlu0 %8321 }
 0xdf3   : > { %13472 = vmatprep.mubr.msk.f32.mxu1 %vm14202_vm3, %v16882_v37  ;;  %13477 = vmatprep.mubr.msk.f32.mxu0 %vm14202_vm3, %v16882_v37 }
 0xdf4   : > { %13480 = vmatprep.subr.mxu1 %v16882_v37  ;;  %13485 = vmatprep.subr.mxu0 %v16882_v37 }
 0xdf5   : > { %13473 = vmatmul.mubr.msk.f32.vlgmr.msra.gmra.mxu1 %vm732_vm4, %v15878_v20  ;;  %13478 = vmatmul.mubr.msk.f32.vlgmr.msra.gmra.mxu0 %vm732_vm4, %v8010_v0  ;;  %v8551_v20 = vpop.permute.xlu1 %8550 }
 0xdf6   : > { %13481 = vmatpush3.xpose.msk.msra.mxu1 %vm732_vm4, %v15882_v28  ;;  %13486 = vmatpush3.xpose.msk.msra.mxu0 %vm732_vm4, %v8168_v2  ;;  %v8628_v49 = vpop.permute.xlu0 %8627 }
 0xdf7   : > { %13482 = vmatprep.mubr.msk.f32.mxu1 %vm14202_vm3, %v16882_v37  ;;  %13487 = vmatprep.mubr.msk.f32.mxu0 %vm14202_vm3, %v16882_v37 }
 0xdf8   : > { %13490 = vmatprep.subr.mxu1 %v16882_v37  ;;  %13495 = vmatprep.subr.mxu0 %v16882_v37 }
 0xdf9   : > { %13483 = vmatmul.mubr.msk.f32.vlgmr.msra.gmra.mxu1 %vm732_vm4, %v8088_v43  ;;  %13488 = vmatmul.mubr.msk.f32.vlgmr.msra.gmra.mxu0 %vm732_vm4, %v8166_v4 }
 0xdfa   : > { %13491 = vmatpush3.xpose.msk.msra.mxu1 %vm732_vm4, %v8246_v16  ;;  %13496 = vmatpush3.xpose.msk.msra.mxu0 %vm732_vm4, %v8324_v3 }
 0xdfb   : > { %13492 = vmatprep.mubr.msk.f32.mxu1 %vm14202_vm3, %v16882_v37  ;;  %13497 = vmatprep.mubr.msk.f32.mxu0 %vm14202_vm3, %v16882_v37 }
 0xdfc   : > { %13500 = vmatprep.subr.mxu1 %v16882_v37  ;;  %13505 = vmatprep.subr.mxu0 %v16882_v37 }
 0xdfd   : > { %13493 = vmatmul.mubr.msk.f32.vlgmr.msra.gmra.mxu1 %vm732_vm4, %v8244_v34  ;;  %13498 = vmatmul.mubr.msk.f32.vlgmr.msra.gmra.mxu0 %vm732_vm4, %v8322_v62 }
 0xdfe   : > { %13501 = vmatpush3.xpose.msk.msra.mxu1 %vm732_vm4, %v8402_v1  ;;  %13506 = vmatpush3.msra.mxu0 %v8551_v20 }
 0xdff   : > { %13502 = vmatprep.mubr.msk.f32.mxu1 %vm14202_vm3, %v16882_v37  ;;  %13510 = vmatprep.subr.mxu1 %v16882_v37 }
 0xe00   : > { %13507 = vmatprep.mubr.msk.f32.mxu0 %vm14202_vm3, %v16882_v37  ;;  %13515 = vmatprep.subr.mxu0 %v16882_v37 }
 0xe01   : > { %13503 = vmatmul.mubr.msk.f32.vlgmr.msra.gmra.mxu1 %vm732_vm4, %v8400_v57 }
 0xe02   : > { %13511 = vmatpush3.msra.mxu1 %v8628_v49  ;;  %13512 = vmatprep.mubr.msk.f32.mxu1 %vm14202_vm3, %v16882_v37 }
 0xe03   : > { %13520 = vmatprep.subr.mxu1 %v16882_v37 }
 0xe70   : > { %v16000_v28 = vpop.f32.mrf.mxu0 }
 0xe72   : > { %v13429_v60 = vpop.f32.mrf.mxu0 }
 0xe74   : > { %v16002_v5 = vpop.f32.mrf.mxu1 }
 0xe76   : > { %v13434_v35 = vpop.f32.mrf.mxu1 }
 0xe78   : > { %v16004_v14 = vpop.f32.mrf.mxu0 }
 0xe7a   : > { %v13439_v45 = vpop.f32.mrf.mxu0 }
 0xe7c   : > { %v16006_v53 = vpop.f32.mrf.mxu1 }
 0xe7d   : > { %16912 = vst [vmem:[#allocation11_spill] sm:$0xff] %v16006_v53 }
 0xe7e   : > { %v13444_v31 = vpop.f32.mrf.mxu1 }
 0xe80   : > { %v16008_v17 = vpop.f32.mrf.mxu0 }
 0xe81   : > { %16913 = vst [vmem:[#allocation13_spill] sm:$0xff] %v16008_v17 }
 0xe82   : > { %v13449_v29 = vpop.f32.mrf.mxu0 }
 0xe84   : > { %v16010_v25 = vpop.f32.mrf.mxu1 }
 0xe85   : > { %16914 = vst [vmem:[#allocation12_spill] sm:$0xff] %v16010_v25 }
 0xe86   : > { %v13454_v8 = vpop.f32.mrf.mxu1 }
 0xead   : > { %v16012_v38 = vpop.f32.mrf.mxu0 }
 0xeae   : > { %16915 = vst [vmem:[#allocation15_spill] sm:$0xff] %v16012_v38 }
 0xeaf   : > { %v13459_v21 = vpop.f32.mrf.mxu0 }
 0xeb1   : > { %v16014_v52 = vpop.f32.mrf.mxu1  ;;  %v16016_v63 = vpop.f32.mrf.mxu0 }
 0xeb2   : > { %16916 = vst [vmem:[#allocation14_spill] sm:$0xff] %v16014_v52  ;;  %v8477_v9 = vsel %vm1346_vm5, %v16016_v63, -inf }
 0xeb3   : > { %8478 = vmax.xlane.f32.xlu0 %v8477_v9  ;;  %v13464_v43 = vpop.f32.mrf.mxu1  ;;  %v13469_v13 = vpop.f32.mrf.mxu0 }
 0xeb4   : > { %v8705_v13 = vpop.permute.xlu1 %8704 }
 0xeb5   : > { %v16020_v58 = vpop.f32.mrf.mxu1  ;;  %v16022_v0 = vpop.f32.mrf.mxu0 }
 0xeb6   : > { %v8480_v16 = vsel %vm1346_vm5, %v16020_v58, -inf  ;;  %v8483_v2 = vsel %vm1346_vm5, %v16022_v0, -inf }
 0xeb7   : > { %8481 = vmax.xlane.f32.xlu1 %v8480_v16  ;;  %v13474_v34 = vpop.f32.mrf.mxu1  ;;  %8484 = vmax.xlane.f32.xlu0 %v8483_v2  ;;  %v13479_v4 = vpop.f32.mrf.mxu0 }
 0xeb8   : > { %v8782_v16 = vpop.permute.xlu1 %8781  ;;  %v8859_v2 = vpop.permute.xlu0 %8858 }
 0xeb9   : > { %v16028_v1 = vpop.f32.mrf.mxu1  ;;  %v16030_v3 = vpop.f32.mrf.mxu0 }
 0xeba   : > { %v8486_v57 = vsel %vm1346_vm5, %v16028_v1, -inf  ;;  %v8489_v62 = vsel %vm1346_vm5, %v16030_v3, -inf }
 0xebb   : > { %v13484_v20 = vpop.f32.mrf.mxu1  ;;  %8487 = vmax.xlane.f32.xlu0 %v8486_v57  ;;  %8490 = vmax.xlane.f32.xlu1 %v8489_v62  ;;  %v13489_v49 = vpop.f32.mrf.mxu0 }
 0xebc   : > { %v16096_v34 = vpop.permute.xlu1 %8935  ;;  %v16098_v4 = vpop.permute.xlu0 %9012 }
 0xebd   : > { %v16036_v60 = vpop.f32.mrf.mxu1  ;;  %v16038_v35 = vpop.f32.mrf.mxu0 }
 0xebe   : > { %v8492_v45 = vsel %vm1346_vm5, %v16036_v60, -inf  ;;  %v8495_v31 = vsel %vm1346_vm5, %v16038_v35, -inf }
 0xebf   : > { %v13494_v29 = vpop.f32.mrf.mxu1  ;;  %8493 = vmax.xlane.f32.xlu0 %v8492_v45  ;;  %8496 = vmax.xlane.f32.xlu1 %v8495_v31  ;;  %v13499_v8 = vpop.f32.mrf.mxu0 }
 0xec0   : > { %v16100_v57 = vpop.permute.xlu1 %9089  ;;  %v16102_v62 = vpop.permute.xlu0 %9183 }
 0xec1   : > { %v16044_v21 = vpop.f32.mrf.mxu1 }
 0xec2   : > { %v8498_v9 = vsel %vm1346_vm5, %v16044_v21, -inf }
 0xec3   : > { %v13504_v43 = vpop.f32.mrf.mxu1  ;;  %8499 = vmax.xlane.f32.xlu0 %v8498_v9 }
 0xed0   : > { %9415 = vrot.lane.b32.xlu1 %v15664_v47, %s16911_s12 }
 0xed4   : > { %9573 = vrot.lane.b32.xlu1 %v15676_v44, %s16910_s14 }
 0xed8   : > { %9571 = vrot.lane.b32.xlu1 %v15676_v44, %s16911_s12 }
 0xed9   : > { %9337 = vrot.lane.b32.xlu0 %v15658_v59, %s16911_s12 }
 0xedc   : > { %9729 = vrot.lane.b32.xlu1 %v15688_v42, %s16910_s14 }
 0xedd   : > { %9495 = vrot.lane.b32.xlu0 %v15670_v61, %s16910_s14 }
 0xee0   : > { %9727 = vrot.lane.b32.xlu1 %v15688_v42, %s16911_s12 }
 0xee1   : > { %9493 = vrot.lane.b32.xlu0 %v15670_v61, %s16911_s12 }
 0xee4   : > { %9877 = vrot.lane.b32.xlu1 %v15749_v50, %s16911_s12 }
 0xee5   : > { %9651 = vrot.lane.b32.xlu0 %v15682_v40, %s16910_s14 }
 0xee8   : > { %10029 = vrot.lane.b32.xlu1 %v15823_v46, %s16911_s12 }
 0xee9   : > { %9649 = vrot.lane.b32.xlu0 %v15682_v40, %s16911_s12 }
 0xeec   : > { %10105 = vrot.lane.b32.xlu1 %v15831_v54, %s16911_s12 }
 0xeed   : > { %9953 = vrot.lane.b32.xlu0 %v15760_v48, %s16911_s12 }
 0xef0   : > { %10257 = vrot.lane.b32.xlu1 %v15839_v10, %s16911_s12 }
 0xef1   : > { %10181 = vrot.lane.b32.xlu0 %v15843_v19, %s16911_s12 }
 0xef4   : > { %10409 = vrot.lane.b32.xlu1 %v15850_v27, %s16911_s12 }
 0xef5   : > { %10333 = vrot.lane.b32.xlu0 %v15854_v55, %s16911_s12 }
 0xef8   : > { %10581 = vrot.lane.b32.xlu1 %v15652_v41, %s16917_s15 }
 0xef9   : > { %10503 = vrot.lane.b32.xlu0 %v15646_v23, %s16917_s15 }
 0xefc   : > { %10579 = vrot.lane.b32.xlu1 %v15652_v41, %s16918_s16  ;;  %v16104_v41 = vpop.permute.xlu1 %9261 }
 0xefd   : > { %10501 = vrot.lane.b32.xlu0 %v15646_v23, %s16918_s16  ;;  %v16106_v23 = vpop.permute.xlu0 %9181 }
 0xf00   : > { %10737 = vrot.lane.b32.xlu1 %v15664_v47, %s16917_s15  ;;  %v16108_v20 = vpop.permute.xlu1 %9259 }
 0xf01   : > { %10659 = vrot.lane.b32.xlu0 %v15658_v59, %s16917_s15  ;;  %v16110_v49 = vpop.permute.xlu0 %9339 }
 0xf04   : > { %v16112_v45 = vpop.permute.xlu1 %9417 }
 0xf3c   : > { %v8479_v31 = vpop.xlane.xlu0 %8478 }
 0xf3d   : > { %v8501_v29 = vsub.f32 %v16016_v63, %v8479_v31 }
 0xf3f   : > { %v8509_v8 = vmul.f32 1.442695, %v8501_v29 }
 0xf40   : > { %v8482_v9 = vpop.xlane.xlu1 %8481  ;;  %v8485_v43 = vpop.xlane.xlu0 %8484 }
 0xf41   : > { %13978 = vpow2.f32 %v8509_v8  ;;  %v8502_v12 = vsub.f32 %v16020_v58, %v8482_v9  ;;  %v8503_v22 = vsub.f32 %v16022_v0, %v8485_v43 }
 0xf43   : > { %v8511_v11 = vmul.f32 1.442695, %v8502_v12  ;;  %v8513_v24 = vmul.f32 1.442695, %v8503_v22 }
 0xf44   : > { %v8491_v7 = vpop.xlane.xlu1 %8490  ;;  %v8488_v15 = vpop.xlane.xlu0 %8487 }
 0xf45   : > { %13980 = vpow2.f32 %v8511_v11  ;;  %v8505_v18 = vsub.f32 %v16030_v3, %v8491_v7  ;;  %v8504_v36 = vsub.f32 %v16028_v1, %v8488_v15 }
 0xf46   : > { %13982 = vpow2.f32 %v8513_v24 }
 0xf47   : > { %v8517_v52 = vmul.f32 1.442695, %v8505_v18  ;;  %v8515_v63 = vmul.f32 1.442695, %v8504_v36 }
 0xf48   : > { %v8497_v31 = vpop.xlane.xlu1 %8496  ;;  %v8494_v29 = vpop.xlane.xlu0 %8493 }
 0xf49   : > { %13984 = vpow2.f32 %v8517_v52  ;;  %v8507_v8 = vsub.f32 %v16038_v35, %v8497_v31  ;;  %v8506_v58 = vsub.f32 %v16036_v60, %v8494_v29 }
 0xf4a   : > { %13986 = vpow2.f32 %v8515_v63 }
 0xf4b   : > { %v8521_v12 = vmul.f32 1.442695, %v8507_v8  ;;  %v8519_v22 = vmul.f32 1.442695, %v8506_v58 }
 0xf4c   : > { %v8500_v0 = vpop.xlane.xlu0 %8499  ;;  %v9416_v24 = vpop.permute.xlu1 %9415 }
 0xf4d   : > { %13988 = vpow2.f32 %v8521_v12  ;;  %v8508_v11 = vsub.f32 %v16044_v21, %v8500_v0 }
 0xf4e   : > { %v16122_v7 = vpop.eup %13978  ;;  %13990 = vpow2.f32 %v8519_v22 }
 0xf4f   : > { %v8523_v18 = vmul.f32 1.442695, %v8508_v11  ;;  %13508 = vmatmul.mubr.msk.f32.vlgmr.msra.gmra.mxu0 %vm1346_vm5, %v16122_v7 }
 0xf50   : > { %13516 = vmatpush3.msra.mxu0 %v8705_v13  ;;  %13517 = vmatprep.mubr.msk.f32.mxu0 %vm14202_vm3, %v16882_v37  ;;  %v9338_v15 = vpop.permute.xlu0 %9337  ;;  %v9574_v1 = vpop.permute.xlu1 %9573 }
 0xf51   : > { %13992 = vpow2.f32 %v8523_v18  ;;  %13525 = vmatprep.subr.mxu0 %v16882_v37 }
 0xf52   : > { %v16129_v36 = vpop.eup %13980 }
 0xf53   : > { %v16131_v52 = vpop.eup %13982  ;;  %13513 = vmatmul.mubr.msk.f32.vlgmr.msra.gmra.mxu1 %vm1346_vm5, %v16129_v36 }
 0xf54   : > { %13518 = vmatmul.mubr.msk.f32.vlgmr.msra.gmra.mxu0 %vm1346_vm5, %v16131_v52  ;;  %13521 = vmatpush3.msra.mxu1 %v8782_v16  ;;  %v9496_v35 = vpop.permute.xlu0 %9495  ;;  %v9572_v13 = vpop.permute.xlu1 %9571 }
 0xf55   : > { %13526 = vmatpush3.msra.mxu0 %v8859_v2  ;;  %13522 = vmatprep.mubr.msk.f32.mxu1 %vm14202_vm3, %v16882_v37 }
 0xf56   : > { %v16139_v3 = vpop.eup %13984  ;;  %13527 = vmatprep.mubr.msk.f32.mxu0 %vm14202_vm3, %v16882_v37  ;;  %13530 = vmatprep.subr.mxu1 %v16882_v37 }
 0xf57   : > { %v16144_v60 = vpop.eup %13986  ;;  %13535 = vmatprep.subr.mxu0 %v16882_v37 }
 0xf58   : > { %13523 = vmatmul.mubr.msk.f32.vlgmr.msra.gmra.mxu1 %vm1346_vm5, %v16144_v60  ;;  %13528 = vmatmul.mubr.msk.f32.vlgmr.msra.gmra.mxu0 %vm1346_vm5, %v16139_v3 }
 0xf59   : > { %13531 = vmatpush3.msra.mxu1 %v16096_v34  ;;  %13536 = vmatpush3.msra.mxu0 %v16098_v4  ;;  %v9494_v34 = vpop.permute.xlu0 %9493  ;;  %v9730_v4 = vpop.permute.xlu1 %9729 }
 0xf5a   : > { %v16153_v21 = vpop.eup %13988  ;;  %13532 = vmatprep.mubr.msk.f32.mxu1 %vm14202_vm3, %v16882_v37  ;;  %13537 = vmatprep.mubr.msk.f32.mxu0 %vm14202_vm3, %v16882_v37 }
 0xf5b   : > { %v16159_v16 = vpop.eup %13990  ;;  %13540 = vmatprep.subr.mxu1 %v16882_v37  ;;  %13545 = vmatprep.subr.mxu0 %v16882_v37 }
 0xf5c   : > { %13533 = vmatmul.mubr.msk.f32.vlgmr.msra.gmra.mxu1 %vm1346_vm5, %v16159_v16  ;;  %13538 = vmatmul.mubr.msk.f32.vlgmr.msra.gmra.mxu0 %vm1346_vm5, %v16153_v21 }
 0xf5d   : > { %13541 = vmatpush3.msra.mxu1 %v16100_v57  ;;  %13546 = vmatpush3.xpose.msk.msra.mxu0 %vm732_vm4, %v16102_v62  ;;  %v9652_v57 = vpop.permute.xlu0 %9651  ;;  %v9728_v62 = vpop.permute.xlu1 %9727 }
 0xf5e   : > { %v16170_v2 = vpop.eup %13992  ;;  %13542 = vmatprep.mubr.msk.f32.mxu1 %vm14202_vm3, %v16882_v37  ;;  %13547 = vmatprep.mubr.msk.f32.mxu0 %vm14202_vm3, %v16882_v37 }
 0xf5f   : > { %13550 = vmatprep.subr.mxu1 %v16882_v37  ;;  %13555 = vmatprep.subr.mxu0 %v16882_v37 }
 0xf60   : > { %13543 = vmatmul.mubr.msk.f32.vlgmr.msra.gmra.mxu1 %vm1346_vm5, %v16170_v2  ;;  %13548 = vmatmul.mubr.msk.f32.vlgmr.msra.gmra.mxu0 %vm732_vm4, %v16106_v23 }
 0xf61   : > { %13551 = vmatpush3.xpose.msk.msra.mxu1 %vm732_vm4, %v16104_v41  ;;  %13556 = vmatpush3.xpose.msk.msra.mxu0 %vm732_vm4, %v16110_v49  ;;  %v9650_v41 = vpop.permute.xlu0 %9649  ;;  %v9878_v23 = vpop.permute.xlu1 %9877 }
 0xf62   : > { %13552 = vmatprep.mubr.msk.f32.mxu1 %vm14202_vm3, %v16882_v37  ;;  %13557 = vmatprep.mubr.msk.f32.mxu0 %vm14202_vm3, %v16882_v37 }
 0xf63   : > { %13560 = vmatprep.subr.mxu1 %v16882_v37  ;;  %13565 = vmatprep.subr.mxu0 %v16882_v37 }
 0xf64   : > { %13553 = vmatmul.mubr.msk.f32.vlgmr.msra.gmra.mxu1 %vm732_vm4, %v16108_v20  ;;  %13558 = vmatmul.mubr.msk.f32.vlgmr.msra.gmra.mxu0 %vm732_vm4, %v9338_v15 }
 0xf65   : > { %13561 = vmatpush3.xpose.msk.msra.mxu1 %vm732_vm4, %v16112_v45  ;;  %13566 = vmatpush3.xpose.msk.msra.mxu0 %vm732_vm4, %v9496_v35  ;;  %v9954_v20 = vpop.permute.xlu0 %9953 }
 0xf66   : > { %13562 = vmatprep.mubr.msk.f32.mxu1 %vm14202_vm3, %v16882_v37  ;;  %13567 = vmatprep.mubr.msk.f32.mxu0 %vm14202_vm3, %v16882_v37 }
 0xf67   : > { %13570 = vmatprep.subr.mxu1 %v16882_v37  ;;  %13575 = vmatprep.subr.mxu0 %v16882_v37 }
 0xf68   : > { %13563 = vmatmul.mubr.msk.f32.vlgmr.msra.gmra.mxu1 %vm732_vm4, %v9416_v24  ;;  %13568 = vmatmul.mubr.msk.f32.vlgmr.msra.gmra.mxu0 %vm732_vm4, %v9494_v34 }
 0xf69   : > { %13571 = vmatpush3.xpose.msk.msra.mxu1 %vm732_vm4, %v9574_v1  ;;  %13576 = vmatpush3.xpose.msk.msra.mxu0 %vm732_vm4, %v9652_v57 }
 0xf6a   : > { %13572 = vmatprep.mubr.msk.f32.mxu1 %vm14202_vm3, %v16882_v37  ;;  %13577 = vmatprep.mubr.msk.f32.mxu0 %vm14202_vm3, %v16882_v37 }
 0xf6b   : > { %13580 = vmatprep.subr.mxu1 %v16882_v37  ;;  %13585 = vmatprep.subr.mxu0 %v16882_v37 }
 0xf6c   : > { %13573 = vmatmul.mubr.msk.f32.vlgmr.msra.gmra.mxu1 %vm732_vm4, %v9572_v13  ;;  %13578 = vmatmul.mubr.msk.f32.vlgmr.msra.gmra.mxu0 %vm732_vm4, %v9650_v41 }
 0xf6d   : > { %13581 = vmatpush3.xpose.msk.msra.mxu1 %vm732_vm4, %v9730_v4  ;;  %13586 = vmatpush3.msra.mxu0 %v9878_v23 }
 0xf6e   : > { %13582 = vmatprep.mubr.msk.f32.mxu1 %vm14202_vm3, %v16882_v37  ;;  %13590 = vmatprep.subr.mxu1 %v16882_v37 }
 0xf6f   : > { %13587 = vmatprep.mubr.msk.f32.mxu0 %vm14202_vm3, %v16882_v37  ;;  %13595 = vmatprep.subr.mxu0 %v16882_v37 }
 0xf70   : > { %13583 = vmatmul.mubr.msk.f32.vlgmr.msra.gmra.mxu1 %vm732_vm4, %v9728_v62 }
 0xf71   : > { %13591 = vmatpush3.msra.mxu1 %v9954_v20  ;;  %13592 = vmatprep.mubr.msk.f32.mxu1 %vm14202_vm3, %v16882_v37 }
 0xf72   : > { %13600 = vmatprep.subr.mxu1 %v16882_v37 }
0x100f   : > { %v16227_v49 = vpop.f32.mrf.mxu0 }
0x1011   : > { %v13509_v45 = vpop.f32.mrf.mxu0 }
0x1013   : > { %v16229_v9 = vpop.f32.mrf.mxu1 }
0x1014   : > { %v16231_v43 = vpop.f32.mrf.mxu0 }
0x1015   : > { %v13514_v63 = vpop.f32.mrf.mxu1 }
0x1016   : > { %v13519_v31 = vpop.f32.mrf.mxu0 }
0x1018   : > { %v16233_v29 = vpop.f32.mrf.mxu1  ;;  %v16235_v8 = vpop.f32.mrf.mxu0 }
0x101a   : > { %v13524_v58 = vpop.f32.mrf.mxu1  ;;  %v13529_v12 = vpop.f32.mrf.mxu0 }
0x101c   : > { %v16237_v22 = vpop.f32.mrf.mxu1  ;;  %v16239_v0 = vpop.f32.mrf.mxu0 }
0x101e   : > { %v13534_v11 = vpop.f32.mrf.mxu1  ;;  %v13539_v24 = vpop.f32.mrf.mxu0 }
0x1020   : > { %v16241_v18 = vpop.f32.mrf.mxu1  ;;  %v16243_v15 = vpop.f32.mrf.mxu0 }
0x1021   : > { %v9805_v1 = vsel %vm1346_vm5, %v16243_v15, -inf }
0x1022   : > { %9806 = vmax.xlane.f32.xlu0 %v9805_v1  ;;  %v13544_v35 = vpop.f32.mrf.mxu1  ;;  %v13549_v13 = vpop.f32.mrf.mxu0 }
0x1024   : > { %v16247_v34 = vpop.f32.mrf.mxu1  ;;  %v16249_v4 = vpop.f32.mrf.mxu0 }
0x1025   : > { %v9808_v57 = vsel %vm1346_vm5, %v16247_v34, -inf  ;;  %v9811_v62 = vsel %vm1346_vm5, %v16249_v4, -inf }
0x1026   : > { %9809 = vmax.xlane.f32.xlu1 %v9808_v57  ;;  %v13554_v41 = vpop.f32.mrf.mxu1  ;;  %9812 = vmax.xlane.f32.xlu0 %v9811_v62  ;;  %v13559_v23 = vpop.f32.mrf.mxu0 }
0x1028   : > { %v16255_v20 = vpop.f32.mrf.mxu1  ;;  %v16257_v45 = vpop.f32.mrf.mxu0 }
0x1029   : > { %v9814_v63 = vsel %vm1346_vm5, %v16255_v20, -inf  ;;  %v9817_v31 = vsel %vm1346_vm5, %v16257_v45, -inf }
0x102a   : > { %v13564_v58 = vpop.f32.mrf.mxu1  ;;  %9815 = vmax.xlane.f32.xlu0 %v9814_v63  ;;  %9818 = vmax.xlane.f32.xlu1 %v9817_v31  ;;  %v13569_v12 = vpop.f32.mrf.mxu0 }
0x102c   : > { %v16263_v11 = vpop.f32.mrf.mxu1  ;;  %v16265_v24 = vpop.f32.mrf.mxu0 }
0x102d   : > { %v9820_v1 = vsel %vm1346_vm5, %v16263_v11, -inf  ;;  %v9823_v35 = vsel %vm1346_vm5, %v16265_v24, -inf }
0x102e   : > { %v13574_v13 = vpop.f32.mrf.mxu1  ;;  %9821 = vmax.xlane.f32.xlu0 %v9820_v1  ;;  %9824 = vmax.xlane.f32.xlu1 %v9823_v35  ;;  %v13579_v57 = vpop.f32.mrf.mxu0 }
0x1030   : > { %v16271_v62 = vpop.f32.mrf.mxu1 }
0x1031   : > { %v9826_v41 = vsel %vm1346_vm5, %v16271_v62, -inf }
0x1032   : > { %v13584_v23 = vpop.f32.mrf.mxu1  ;;  %9827 = vmax.xlane.f32.xlu0 %v9826_v41 }
0x103f   : > { %10735 = vrot.lane.b32.xlu1 %v15664_v47, %s16918_s16 }
0x1043   : > { %10893 = vrot.lane.b32.xlu1 %v15676_v44, %s16917_s15 }
0x1047   : > { %10891 = vrot.lane.b32.xlu1 %v15676_v44, %s16918_s16 }
0x1048   : > { %10657 = vrot.lane.b32.xlu0 %v15658_v59, %s16918_s16  ;;  %v10030_v59 = vpop.permute.xlu1 %10029 }
0x104b   : > { %11049 = vrot.lane.b32.xlu1 %v15688_v42, %s16917_s15 }
0x104c   : > { %10815 = vrot.lane.b32.xlu0 %v15670_v61, %s16917_s15  ;;  %v10106_v47 = vpop.permute.xlu1 %10105 }
0x104f   : > { %11047 = vrot.lane.b32.xlu1 %v15688_v42, %s16918_s16 }
0x1050   : > { %10813 = vrot.lane.b32.xlu0 %v15670_v61, %s16918_s16  ;;  %v10182_v61 = vpop.permute.xlu0 %10181  ;;  %v16307_v44 = vpop.permute.xlu1 %10257 }
0x1053   : > { %11197 = vrot.lane.b32.xlu1 %v15749_v50, %s16918_s16 }
0x1054   : > { %10971 = vrot.lane.b32.xlu0 %v15682_v40, %s16917_s15  ;;  %v16309_v42 = vpop.permute.xlu0 %10333 }
0x1057   : > { %11349 = vrot.lane.b32.xlu1 %v15823_v46, %s16918_s16 }
0x1058   : > { %10969 = vrot.lane.b32.xlu0 %v15682_v40, %s16918_s16  ;;  %v16311_v40 = vpop.permute.xlu1 %10409  ;;  %v16313_v50 = vpop.permute.xlu0 %10503 }
0x105b   : > { %11425 = vrot.lane.b32.xlu1 %v15831_v54, %s16918_s16 }
0x105c   : > { %11273 = vrot.lane.b32.xlu0 %v15760_v48, %s16918_s16  ;;  %v16315_v46 = vpop.permute.xlu1 %10581  ;;  %v16317_v48 = vpop.permute.xlu0 %10501 }
0x105f   : > { %11577 = vrot.lane.b32.xlu1 %v15839_v10, %s16918_s16 }
0x1060   : > { %11501 = vrot.lane.b32.xlu0 %v15843_v19, %s16918_s16  ;;  %v16319_v54 = vpop.permute.xlu1 %10579  ;;  %v16321_v10 = vpop.permute.xlu0 %10659 }
0x1064   : > { %v16323_v19 = vpop.permute.xlu1 %10737 }
0x10ab   : > { %v9807_v63 = vpop.xlane.xlu0 %9806 }
0x10ac   : > { %v9829_v31 = vsub.f32 %v16243_v15, %v9807_v63 }
0x10ae   : > { %v9837_v58 = vmul.f32 1.442695, %v9829_v31 }
0x10af   : > { %v9810_v12 = vpop.xlane.xlu1 %9809  ;;  %v9813_v1 = vpop.xlane.xlu0 %9812 }
0x10b0   : > { %13994 = vpow2.f32 %v9837_v58  ;;  %v9830_v35 = vsub.f32 %v16247_v34, %v9810_v12  ;;  %v9831_v13 = vsub.f32 %v16249_v4, %v9813_v1 }
0x10b2   : > { %v9839_v57 = vmul.f32 1.442695, %v9830_v35  ;;  %v9841_v41 = vmul.f32 1.442695, %v9831_v13 }
0x10b3   : > { %v9819_v23 = vpop.xlane.xlu1 %9818  ;;  %v9816_v25 = vpop.xlane.xlu0 %9815 }
0x10b4   : > { %13996 = vpow2.f32 %v9839_v57  ;;  %v9833_v38 = vsub.f32 %v16257_v45, %v9819_v23  ;;  %v9832_v17 = vsub.f32 %v16255_v20, %v9816_v25 }
0x10b5   : > { %13998 = vpow2.f32 %v9841_v41 }
0x10b6   : > { %v9845_v53 = vmul.f32 1.442695, %v9833_v38  ;;  %v9843_v15 = vmul.f32 1.442695, %v9832_v17 }
0x10b7   : > { %v9825_v63 = vpop.xlane.xlu1 %9824  ;;  %v9822_v31 = vpop.xlane.xlu0 %9821 }
0x10b8   : > { %14000 = vpow2.f32 %v9845_v53  ;;  %v9835_v58 = vsub.f32 %v16265_v24, %v9825_v63  ;;  %v9834_v34 = vsub.f32 %v16263_v11, %v9822_v31 }
0x10b9   : > { %14002 = vpow2.f32 %v9843_v15 }
0x10ba   : > { %v9849_v4 = vmul.f32 1.442695, %v9835_v58  ;;  %v9847_v12 = vmul.f32 1.442695, %v9834_v34 }
0x10bb   : > { %v9828_v1 = vpop.xlane.xlu0 %9827  ;;  %v10736_v25 = vpop.permute.xlu1 %10735 }
0x10bc   : > { %14004 = vpow2.f32 %v9849_v4  ;;  %v9836_v35 = vsub.f32 %v16271_v62, %v9828_v1 }
0x10bd   : > { %v16333_v45 = vpop.eup %13994  ;;  %14006 = vpow2.f32 %v9847_v12 }
0x10be   : > { %v9851_v38 = vmul.f32 1.442695, %v9836_v35  ;;  %13588 = vmatmul.mubr.msk.f32.vlgmr.msra.gmra.mxu0 %vm1346_vm5, %v16333_v45 }
0x10bf   : > { %13596 = vmatpush3.msra.mxu0 %v10030_v59  ;;  %13597 = vmatprep.mubr.msk.f32.mxu0 %vm14202_vm3, %v16882_v37  ;;  %v10658_v17 = vpop.permute.xlu0 %10657  ;;  %v10894_v11 = vpop.permute.xlu1 %10893 }
0x10c0   : > { %14008 = vpow2.f32 %v9851_v38  ;;  %13605 = vmatprep.subr.mxu0 %v16882_v37 }
0x10c1   : > { %v16340_v53 = vpop.eup %13996 }
0x10c2   : > { %v16342_v20 = vpop.eup %13998  ;;  %13593 = vmatmul.mubr.msk.f32.vlgmr.msra.gmra.mxu1 %vm1346_vm5, %v16340_v53 }
0x10c3   : > { %13598 = vmatmul.mubr.msk.f32.vlgmr.msra.gmra.mxu0 %vm1346_vm5, %v16342_v20  ;;  %13601 = vmatpush3.msra.mxu1 %v10106_v47  ;;  %v10816_v59 = vpop.permute.xlu0 %10815 }
0x10c4   : > { %13606 = vmatpush3.msra.mxu0 %v10182_v61  ;;  %13602 = vmatprep.mubr.msk.f32.mxu1 %vm14202_vm3, %v16882_v37  ;;  %v10892_v61 = vpop.permute.xlu1 %10891 }
0x10c5   : > { %v16350_v24 = vpop.eup %14000  ;;  %13607 = vmatprep.mubr.msk.f32.mxu0 %vm14202_vm3, %v16882_v37  ;;  %13610 = vmatprep.subr.mxu1 %v16882_v37 }
0x10c6   : > { %v16355_v62 = vpop.eup %14002  ;;  %13615 = vmatprep.subr.mxu0 %v16882_v37 }
0x10c7   : > { %13603 = vmatmul.mubr.msk.f32.vlgmr.msra.gmra.mxu1 %vm1346_vm5, %v16355_v62  ;;  %13608 = vmatmul.mubr.msk.f32.vlgmr.msra.gmra.mxu0 %vm1346_vm5, %v16350_v24 }
0x10c8   : > { %13611 = vmatpush3.msra.mxu1 %v16307_v44  ;;  %13616 = vmatpush3.msra.mxu0 %v16309_v42  ;;  %v10814_v42 = vpop.permute.xlu0 %10813  ;;  %v11050_v57 = vpop.permute.xlu1 %11049 }
0x10c9   : > { %v16364_v47 = vpop.eup %14004  ;;  %13612 = vmatprep.mubr.msk.f32.mxu1 %vm14202_vm3, %v16882_v37  ;;  %13617 = vmatprep.mubr.msk.f32.mxu0 %vm14202_vm3, %v16882_v37 }
0x10ca   : > { %v16370_v13 = vpop.eup %14006  ;;  %13620 = vmatprep.subr.mxu1 %v16882_v37  ;;  %13625 = vmatprep.subr.mxu0 %v16882_v37 }
0x10cb   : > { %13613 = vmatmul.mubr.msk.f32.vlgmr.msra.gmra.mxu1 %vm1346_vm5, %v16370_v13  ;;  %13618 = vmatmul.mubr.msk.f32.vlgmr.msra.gmra.mxu0 %vm1346_vm5, %v16364_v47 }
0x10cc   : > { %13621 = vmatpush3.msra.mxu1 %v16311_v40  ;;  %13626 = vmatpush3.xpose.msk.msra.mxu0 %vm732_vm4, %v16313_v50  ;;  %v10972_v40 = vpop.permute.xlu0 %10971  ;;  %v11048_v50 = vpop.permute.xlu1 %11047 }
0x10cd   : > { %v16381_v44 = vpop.eup %14008  ;;  %13622 = vmatprep.mubr.msk.f32.mxu1 %vm14202_vm3, %v16882_v37  ;;  %13627 = vmatprep.mubr.msk.f32.mxu0 %vm14202_vm3, %v16882_v37 }
0x10ce   : > { %13630 = vmatprep.subr.mxu1 %v16882_v37  ;;  %13635 = vmatprep.subr.mxu0 %v16882_v37 }
0x10cf   : > { %13623 = vmatmul.mubr.msk.f32.vlgmr.msra.gmra.mxu1 %vm1346_vm5, %v16381_v44  ;;  %13628 = vmatmul.mubr.msk.f32.vlgmr.msra.gmra.mxu0 %vm732_vm4, %v16317_v48 }
0x10d0   : > { %13631 = vmatpush3.xpose.msk.msra.mxu1 %vm732_vm4, %v16315_v46  ;;  %13636 = vmatpush3.xpose.msk.msra.mxu0 %vm732_vm4, %v16321_v10  ;;  %v10970_v46 = vpop.permute.xlu0 %10969  ;;  %v11198_v48 = vpop.permute.xlu1 %11197 }
0x10d1   : > { %13632 = vmatprep.mubr.msk.f32.mxu1 %vm14202_vm3, %v16882_v37  ;;  %13637 = vmatprep.mubr.msk.f32.mxu0 %vm14202_vm3, %v16882_v37 }
0x10d2   : > { %13640 = vmatprep.subr.mxu1 %v16882_v37  ;;  %13645 = vmatprep.subr.mxu0 %v16882_v37 }
0x10d3   : > { %13633 = vmatmul.mubr.msk.f32.vlgmr.msra.gmra.mxu1 %vm732_vm4, %v16319_v54  ;;  %13638 = vmatmul.mubr.msk.f32.vlgmr.msra.gmra.mxu0 %vm732_vm4, %v10658_v17 }
0x10d4   : > { %13641 = vmatpush3.xpose.msk.msra.mxu1 %vm732_vm4, %v16323_v19  ;;  %13646 = vmatpush3.xpose.msk.msra.mxu0 %vm732_vm4, %v10816_v59  ;;  %v11274_v54 = vpop.permute.xlu0 %11273 }
0x10d5   : > { %13642 = vmatprep.mubr.msk.f32.mxu1 %vm14202_vm3, %v16882_v37  ;;  %13647 = vmatprep.mubr.msk.f32.mxu0 %vm14202_vm3, %v16882_v37 }
0x10d6   : > { %13650 = vmatprep.subr.mxu1 %v16882_v37  ;;  %13655 = vmatprep.subr.mxu0 %v16882_v37 }
0x10d7   : > { %13643 = vmatmul.mubr.msk.f32.vlgmr.msra.gmra.mxu1 %vm732_vm4, %v10736_v25  ;;  %13648 = vmatmul.mubr.msk.f32.vlgmr.msra.gmra.mxu0 %vm732_vm4, %v10814_v42 }
0x10d8   : > { %13651 = vmatpush3.xpose.msk.msra.mxu1 %vm732_vm4, %v10894_v11  ;;  %13656 = vmatpush3.xpose.msk.msra.mxu0 %vm732_vm4, %v10972_v40 }
0x10d9   : > { %13652 = vmatprep.mubr.msk.f32.mxu1 %vm14202_vm3, %v16882_v37  ;;  %13657 = vmatprep.mubr.msk.f32.mxu0 %vm14202_vm3, %v16882_v37 }
0x10da   : > { %13660 = vmatprep.subr.mxu1 %v16882_v37  ;;  %13665 = vmatprep.subr.mxu0 %v16882_v37 }
0x10db   : > { %13653 = vmatmul.mubr.msk.f32.vlgmr.msra.gmra.mxu1 %vm732_vm4, %v10892_v61  ;;  %13658 = vmatmul.mubr.msk.f32.vlgmr.msra.gmra.mxu0 %vm732_vm4, %v10970_v46 }
0x10dc   : > { %13661 = vmatpush3.xpose.msk.msra.mxu1 %vm732_vm4, %v11050_v57  ;;  %13666 = vmatpush3.msra.mxu0 %v11198_v48 }
0x10dd   : > { %13662 = vmatprep.mubr.msk.f32.mxu1 %vm14202_vm3, %v16882_v37  ;;  %13670 = vmatprep.subr.mxu1 %v16882_v37 }
0x10de   : > { %13667 = vmatprep.mubr.msk.f32.mxu0 %vm14202_vm3, %v16882_v37  ;;  %13675 = vmatprep.subr.mxu0 %v16882_v37 }
0x10df   : > { %13663 = vmatmul.mubr.msk.f32.vlgmr.msra.gmra.mxu1 %vm732_vm4, %v11048_v50 }
0x10e0   : > { %13671 = vmatpush3.msra.mxu1 %v11274_v54  ;;  %13672 = vmatprep.mubr.msk.f32.mxu1 %vm14202_vm3, %v16882_v37 }
0x10e1   : > { %13680 = vmatprep.subr.mxu1 %v16882_v37 }
0x117e   : > { %v16438_v10 = vpop.f32.mrf.mxu0 }
0x1180   : > { %v13589_v19 = vpop.f32.mrf.mxu0 }
0x1182   : > { %v16440_v41 = vpop.f32.mrf.mxu1 }
0x1183   : > { %v16442_v23 = vpop.f32.mrf.mxu0 }
0x1184   : > { %v13594_v15 = vpop.f32.mrf.mxu1 }
0x1185   : > { %v13599_v63 = vpop.f32.mrf.mxu0 }
0x1187   : > { %v16444_v31 = vpop.f32.mrf.mxu1  ;;  %v16446_v58 = vpop.f32.mrf.mxu0 }
0x1189   : > { %v13604_v34 = vpop.f32.mrf.mxu1  ;;  %v13609_v4 = vpop.f32.mrf.mxu0 }
0x118b   : > { %v16448_v12 = vpop.f32.mrf.mxu1  ;;  %v16450_v1 = vpop.f32.mrf.mxu0 }
0x118d   : > { %v13614_v35 = vpop.f32.mrf.mxu1  ;;  %v13619_v25 = vpop.f32.mrf.mxu0 }
0x118f   : > { %v16452_v38 = vpop.f32.mrf.mxu1  ;;  %v16454_v17 = vpop.f32.mrf.mxu0 }
0x1190   : > { %v11125_v11 = vsel %vm1346_vm5, %v16454_v17, -inf }
0x1191   : > { %11126 = vmax.xlane.f32.xlu0 %v11125_v11  ;;  %v13624_v59 = vpop.f32.mrf.mxu1  ;;  %v13629_v61 = vpop.f32.mrf.mxu0 }
0x1193   : > { %v16458_v42 = vpop.f32.mrf.mxu1  ;;  %v16460_v57 = vpop.f32.mrf.mxu0 }
0x1194   : > { %v11128_v40 = vsel %vm1346_vm5, %v16458_v42, -inf  ;;  %v11131_v50 = vsel %vm1346_vm5, %v16460_v57, -inf }
0x1195   : > { %11129 = vmax.xlane.f32.xlu1 %v11128_v40  ;;  %v13634_v46 = vpop.f32.mrf.mxu1  ;;  %11132 = vmax.xlane.f32.xlu0 %v11131_v50  ;;  %v13639_v48 = vpop.f32.mrf.mxu0 }
0x1197   : > { %v16466_v54 = vpop.f32.mrf.mxu1  ;;  %v16468_v19 = vpop.f32.mrf.mxu0 }
0x1198   : > { %v11134_v15 = vsel %vm1346_vm5, %v16466_v54, -inf  ;;  %v11137_v63 = vsel %vm1346_vm5, %v16468_v19, -inf }
0x1199   : > { %v13644_v34 = vpop.f32.mrf.mxu1  ;;  %11135 = vmax.xlane.f32.xlu0 %v11134_v15  ;;  %11138 = vmax.xlane.f32.xlu1 %v11137_v63  ;;  %v13649_v4 = vpop.f32.mrf.mxu0  ;;  %v8528_v15 = vsel %vm1346_vm5, %v16129_v36, 0.0  ;;  %v8525_v63 = vsel %vm1346_vm5, %v16122_v7, 0.0  ;;  %v8537_v36 = vsel %vm1346_vm5, %v16139_v3, 0.0  ;;  %v8534_v7 = vsel %vm1346_vm5, %v16144_v60, 0.0 }
0x119a   : > { %v8531_v34 = vsel %vm1346_vm5, %v16131_v52, 0.0  ;;  %v9853_v4 = vsel %vm1346_vm5, %v16333_v45, 0.0  ;;  %v9865_v52 = vsel %vm1346_vm5, %v16350_v24, 0.0  ;;  %v9862_v45 = vsel %vm1346_vm5, %v16355_v62, 0.0  ;;  %v11350_v62 = vpop.permute.xlu1 %11349 }
0x119b   : > { %v16474_v35 = vpop.f32.mrf.mxu1  ;;  %v16476_v25 = vpop.f32.mrf.mxu0  ;;  %v8540_v3 = vsel %vm1346_vm5, %v16159_v16, 0.0  ;;  %v9868_v60 = vsel %vm1346_vm5, %v16370_v13, 0.0  ;;  %v7229_v24 = vsel %vm1346_vm5, %v15889_v33, 0.0  ;;  %v9874_v16 = vsel %vm1346_vm5, %v16381_v44, 0.0 }
0x119c   : > { %v11140_v11 = vsel %vm1346_vm5, %v16474_v35, -inf  ;;  %v11143_v59 = vsel %vm1346_vm5, %v16476_v25, -inf }
0x119d   : > { %v13654_v61 = vpop.f32.mrf.mxu1  ;;  %11141 = vmax.xlane.f32.xlu0 %v11140_v11  ;;  %11144 = vmax.xlane.f32.xlu1 %v11143_v59  ;;  %v13659_v40 = vpop.f32.mrf.mxu0 }
0x119e   : > { %v11502_v11 = vpop.permute.xlu0 %11501 }
0x119f   : > { %v16482_v50 = vpop.f32.mrf.mxu1 }
0x11a0   : > { %v11146_v46 = vsel %vm1346_vm5, %v16482_v50, -inf }
0x11a1   : > { %v13664_v48 = vpop.f32.mrf.mxu1  ;;  %11147 = vmax.xlane.f32.xlu0 %v11146_v46 }
0x11ae   : > { %11729 = vrot.lane.b32.xlu1 %v15850_v27, %s16918_s16  ;;  %v9859_v27 = vsel %vm1346_vm5, %v16342_v20, 0.0  ;;  %v8543_v20 = vsel %vm1346_vm5, %v16153_v21, 0.0  ;;  %v8546_v21 = vsel %vm1346_vm5, %v16170_v2, 0.0 }
0x11b7   : > { %11653 = vrot.lane.b32.xlu0 %v15854_v55, %s16918_s16  ;;  %v9856_v55 = vsel %vm1346_vm5, %v16340_v53, 0.0  ;;  %v9871_v53 = vsel %vm1346_vm5, %v16364_v47, 0.0  ;;  %v11426_v47 = vpop.permute.xlu1 %11425 }
0x11bb   : > { %v11578_v59 = vpop.permute.xlu1 %11577 }
0x11d2   : > { %8529 = vadd.xlane.f32.xlu1 %v8528_v15 }
0x11d6   : > { %8526 = vadd.xlane.f32.xlu0 %v8525_v63  ;;  %8532 = vadd.xlane.f32.xlu1 %v8531_v34 }
0x11da   : > { %9854 = vadd.xlane.f32.xlu0 %v9853_v4  ;;  %9860 = vadd.xlane.f32.xlu1 %v9859_v27 }
0x11de   : > { %9857 = vadd.xlane.f32.xlu0 %v9856_v55  ;;  %8538 = vadd.xlane.f32.xlu1 %v8537_v36 }
0x11e2   : > { %8535 = vadd.xlane.f32.xlu0 %v8534_v7  ;;  %9866 = vadd.xlane.f32.xlu1 %v9865_v52 }
0x11e6   : > { %9863 = vadd.xlane.f32.xlu0 %v9862_v45  ;;  %8544 = vadd.xlane.f32.xlu1 %v8543_v20 }
0x11ea   : > { %8541 = vadd.xlane.f32.xlu0 %v8540_v3  ;;  %9872 = vadd.xlane.f32.xlu1 %v9871_v53 }
0x11ee   : > { %9869 = vadd.xlane.f32.xlu0 %v9868_v60  ;;  %7230 = vadd.xlane.f32.xlu1 %v7229_v24 }
0x11f2   : > { %8547 = vadd.xlane.f32.xlu0 %v8546_v21 }
0x11f6   : > { %9875 = vadd.xlane.f32.xlu0 %v9874_v16 }
0x121a   : > { %v11127_v61 = vpop.xlane.xlu0 %11126 }
0x121b   : > { %v11149_v13 = vsub.f32 %v16454_v17, %v11127_v61 }
0x121d   : > { %v11157_v40 = vmul.f32 1.442695, %v11149_v13 }
0x121e   : > { %v11130_v46 = vpop.xlane.xlu1 %11129  ;;  %v11133_v33 = vpop.xlane.xlu0 %11132 }
0x121f   : > { %14010 = vpow2.f32 %v11157_v40  ;;  %v11150_v48 = vsub.f32 %v16458_v42, %v11130_v46  ;;  %v11151_v2 = vsub.f32 %v16460_v57, %v11133_v33 }
0x1221   : > { %v11159_v15 = vmul.f32 1.442695, %v11150_v48  ;;  %v11161_v63 = vmul.f32 1.442695, %v11151_v2  ;;  %v7235_v48 = vsel %vm1346_vm5, %v15906_v51, 0.0  ;;  %v7241_v2 = vsel %vm1346_vm5, %v15922_v6, 0.0 }
0x1222   : > { %v11139_v34 = vpop.xlane.xlu1 %11138  ;;  %v11136_v44 = vpop.xlane.xlu0 %11135  ;;  %v7244_v51 = vsel %vm1346_vm5, %v15930_v39, 0.0  ;;  %v7250_v6 = vsel %vm1346_vm5, %v15949_v56, 0.0 }
0x1223   : > { %14012 = vpow2.f32 %v11159_v15  ;;  %v11153_v4 = vsub.f32 %v16468_v19, %v11139_v34  ;;  %v11152_v27 = vsub.f32 %v16466_v54, %v11136_v44  ;;  %v7232_v15 = vsel %vm1346_vm5, %v15898_v30, 0.0 }
0x1224   : > { %14014 = vpow2.f32 %v11161_v63  ;;  %v7238_v63 = vsel %vm1346_vm5, %v15914_v26, 0.0 }
0x1225   : > { %v11165_v55 = vmul.f32 1.442695, %v11153_v4  ;;  %v11163_v17 = vmul.f32 1.442695, %v11152_v27 }
0x1226   : > { %v11145_v36 = vpop.xlane.xlu1 %11144  ;;  %v11142_v7 = vpop.xlane.xlu0 %11141 }
0x1227   : > { %14016 = vpow2.f32 %v11165_v55  ;;  %v11155_v52 = vsub.f32 %v16476_v25, %v11145_v36  ;;  %v11154_v42 = vsub.f32 %v16474_v35, %v11142_v7 }
0x1228   : > { %14018 = vpow2.f32 %v11163_v17 }
0x1229   : > { %v11169_v57 = vmul.f32 1.442695, %v11155_v52  ;;  %v11167_v45 = vmul.f32 1.442695, %v11154_v42 }
0x122a   : > { %v11148_v20 = vpop.xlane.xlu0 %11147  ;;  %v11730_v46 = vpop.permute.xlu1 %11729 }
0x122b   : > { %14020 = vpow2.f32 %v11169_v57  ;;  %v11156_v3 = vsub.f32 %v16482_v50, %v11148_v20 }
0x122c   : > { %v14011_v19 = vpop.eup %14010  ;;  %14022 = vpow2.f32 %v11167_v45 }
0x122d   : > { %v11171_v54 = vmul.f32 1.442695, %v11156_v3  ;;  %13668 = vmatmul.mubr.msk.f32.vlgmr.msra.gmra.mxu0 %vm1346_vm5, %v14011_v19  ;;  %v11173_v53 = vsel %vm1346_vm5, %v14011_v19, 0.0 }
0x122e   : > { %13676 = vmatpush3.msra.mxu0 %v11350_v62  ;;  %11174 = vadd.xlane.f32.xlu1 %v11173_v53 }
0x122f   : > { %14024 = vpow2.f32 %v11171_v54  ;;  %13677 = vmatprep.mubr.msk.f32.mxu0 %vm14202_vm3, %v16882_v37  ;;  %13685 = vmatprep.subr.mxu0 %v16882_v37 }
0x1230   : > { %v14013_v35 = vpop.eup %14012 }
0x1231   : > { %v14015_v25 = vpop.eup %14014  ;;  %13673 = vmatmul.mubr.msk.f32.vlgmr.msra.gmra.mxu1 %vm1346_vm5, %v14013_v35  ;;  %v11176_v50 = vsel %vm1346_vm5, %v14013_v35, 0.0 }
0x1232   : > { %13678 = vmatmul.mubr.msk.f32.vlgmr.msra.gmra.mxu0 %vm1346_vm5, %v14015_v25  ;;  %13681 = vmatpush3.msra.mxu1 %v11426_v47  ;;  %v11179_v60 = vsel %vm1346_vm5, %v14015_v25, 0.0  ;;  %v11654_v47 = vpop.permute.xlu0 %11653 }
0x1233   : > { %13686 = vmatpush3.msra.mxu0 %v11502_v11  ;;  %11177 = vadd.xlane.f32.xlu0 %v11176_v50 }
0x1234   : > { %v14017_v24 = vpop.eup %14016  ;;  %11180 = vadd.xlane.f32.xlu1 %v11179_v60  ;;  %13682 = vmatprep.mubr.msk.f32.mxu1 %vm14202_vm3, %v16882_v37 }
0x1235   : > { %v14019_v21 = vpop.eup %14018  ;;  %13687 = vmatprep.mubr.msk.f32.mxu0 %vm14202_vm3, %v16882_v37  ;;  %13690 = vmatprep.subr.mxu1 %v16882_v37  ;;  %v11185_v16 = vsel %vm1346_vm5, %v14017_v24, 0.0 }
0x1236   : > { %13695 = vmatprep.subr.mxu0 %v16882_v37  ;;  %13683 = vmatmul.mubr.msk.f32.vlgmr.msra.gmra.mxu1 %vm1346_vm5, %v14019_v21  ;;  %v11182_v62 = vsel %vm1346_vm5, %v14019_v21, 0.0 }
0x1237   : > { %13688 = vmatmul.mubr.msk.f32.vlgmr.msra.gmra.mxu0 %vm1346_vm5, %v14017_v24  ;;  %13691 = vmatpush3.msra.mxu1 %v11578_v59 }
0x1238   : > { %v14021_v11 = vpop.eup %14020  ;;  %13696 = vmatpush3.msra.mxu0 %v11654_v47  ;;  %11186 = vadd.xlane.f32.xlu1 %v11185_v16 }
0x1239   : > { %v14023_v61 = vpop.eup %14022  ;;  %11183 = vadd.xlane.f32.xlu0 %v11182_v62  ;;  %13692 = vmatprep.mubr.msk.f32.mxu1 %vm14202_vm3, %v16882_v37  ;;  %v11191_v13 = vsel %vm1346_vm5, %v14021_v11, 0.0 }
0x123a   : > { %13697 = vmatprep.mubr.msk.f32.mxu0 %vm14202_vm3, %v16882_v37  ;;  %13700 = vmatprep.subr.mxu1 %v16882_v37  ;;  %v11188_v40 = vsel %vm1346_vm5, %v14023_v61, 0.0 }
0x123b   : > { %13693 = vmatmul.mubr.msk.f32.vlgmr.msra.gmra.mxu1 %vm1346_vm5, %v14023_v61  ;;  %13698 = vmatmul.mubr.msk.f32.vlgmr.msra.gmra.mxu0 %vm1346_vm5, %v14021_v11 }
0x123c   : > { %v14025_v59 = vpop.eup %14024  ;;  %13701 = vmatpush3.msra.mxu1 %v11730_v46  ;;  %11192 = vadd.xlane.f32.xlu1 %v11191_v13  ;;  %v6414_v13 = vld [vmem:[#allocation2 + $0x78] sm:$0xff]  ;;  %v6412_v46 = vld [vmem:[#allocation2 + $0x68] sm:$0xff] }
0x123d   : > { %11189 = vadd.xlane.f32.xlu0 %v11188_v40  ;;  %13702 = vmatprep.mubr.msk.f32.mxu1 %vm14202_vm3, %v16882_v37  ;;  %v11194_v33 = vsel %vm1346_vm5, %v14025_v59, 0.0  ;;  %v7247_v37 = vsel %vm1346_vm5, %v15940_v32, 0.0 }
0x123e   : > { %13705 = vmatprep.subr.mxu0 %v6414_v13 }
0x123f   : > { %13703 = vmatmul.mubr.msk.f32.vlgmr.msra.gmra.mxu1 %vm1346_vm5, %v14025_v59  ;;  %13706 = vmatpush3.msra.mxu0 %v6414_v13 }
0x1240   : > { %7236 = vadd.xlane.f32.xlu1 %v7235_v48 }
0x1241   : > { %11195 = vadd.xlane.f32.xlu0 %v11194_v33  ;;  %v6410_v33 = vld [vmem:[#allocation2 + $0x58] sm:$0xff] }
0x1244   : > { %7242 = vadd.xlane.f32.xlu1 %v7241_v2  ;;  %v6409_v2 = vld [vmem:[#allocation2 + $0x50] sm:$0xff] }
0x1245   : > { %7233 = vadd.xlane.f32.xlu0 %v7232_v15 }
0x1248   : > { %7248 = vadd.xlane.f32.xlu1 %v7247_v37 }
0x1249   : > { %7239 = vadd.xlane.f32.xlu0 %v7238_v63 }
0x124d   : > { %7245 = vadd.xlane.f32.xlu0 %v7244_v51 }
0x1251   : > { %7251 = vadd.xlane.f32.xlu0 %v7250_v6  ;;  %v6408_v6 = vld [vmem:[#allocation2 + $0x48] sm:$0xff] }
0x125b   : > { %v8530_v34 = vpop.xlane.xlu1 %8529 }
0x125c   : > { %14026 = vrcp.f32 %v8530_v34 }
0x125f   : > { %v8533_v30 = vpop.xlane.xlu1 %8532  ;;  %v8527_v44 = vpop.xlane.xlu0 %8526 }
0x1260   : > { %14028 = vrcp.f32 %v8533_v30  ;;  %v6407_v30 = vld [vmem:[#allocation2 + $0x40] sm:$0xff] }
0x1261   : > { %14030 = vrcp.f32 %v8527_v44 }
0x1263   : > { %v9861_v32 = vpop.xlane.xlu1 %9860  ;;  %v9855_v4 = vpop.xlane.xlu0 %9854 }
0x1264   : > { %14032 = vrcp.f32 %v9861_v32 }
0x1265   : > { %14034 = vrcp.f32 %v9855_v4 }
0x1267   : > { %v8539_v26 = vpop.xlane.xlu1 %8538  ;;  %v9858_v27 = vpop.xlane.xlu0 %9857 }
0x1268   : > { %14036 = vrcp.f32 %v8539_v26 }
0x1269   : > { %v14027_v55 = vpop.eup %14026  ;;  %14038 = vrcp.f32 %v9858_v27 }
0x126a   : > { %v9174_v39 = vmul.f32 %v14027_v55, %v16229_v9 }
0x126b   : > { %v9867_v17 = vpop.xlane.xlu1 %9866  ;;  %v8536_v56 = vpop.xlane.xlu0 %8535 }
0x126c   : > { %14040 = vrcp.f32 %v9867_v17  ;;  %11831 = vrot.lane.b32.xlu0 %v9174_v39, %s16917_s15 }
0x126d   : > { %v14029_v36 = vpop.eup %14028  ;;  %14042 = vrcp.f32 %v8536_v56 }
0x126e   : > { %v14031_v7 = vpop.eup %14030  ;;  %v9175_v52 = vmul.f32 %v14029_v36, %v16231_v43 }
0x126f   : > { %v8545_v42 = vpop.xlane.xlu1 %8544  ;;  %v9864_v57 = vpop.xlane.xlu0 %9863  ;;  %v9173_v45 = vmul.f32 %v14031_v7, %v16227_v49 }
0x1270   : > { %14044 = vrcp.f32 %v8545_v42  ;;  %11833 = vrot.lane.b32.xlu0 %v9175_v52, %s16917_s15 }
0x1271   : > { %v14033_v20 = vpop.eup %14032  ;;  %14046 = vrcp.f32 %v9864_v57  ;;  %11829 = vrot.lane.b32.xlu1 %v9173_v45, %s16917_s15 }
0x1272   : > { %v14035_v9 = vpop.eup %14034  ;;  %v10495_v3 = vmul.f32 %v14033_v20, %v16442_v23 }
0x1273   : > { %v9873_v19 = vpop.xlane.xlu1 %9872  ;;  %v8542_v54 = vpop.xlane.xlu0 %8541  ;;  %v10493_v53 = vmul.f32 %v14035_v9, %v16438_v10 }
0x1274   : > { %14048 = vrcp.f32 %v9873_v19  ;;  %11865 = vrot.lane.b32.xlu0 %v10495_v3, %s16910_s14 }
0x1275   : > { %v14037_v43 = vpop.eup %14036  ;;  %14050 = vrcp.f32 %v8542_v54  ;;  %11861 = vrot.lane.b32.xlu1 %v10493_v53, %s16910_s14 }
0x1276   : > { %v14039_v49 = vpop.eup %14038  ;;  %v9177_v35 = vmul.f32 %v14037_v43, %v16235_v8 }
0x1277   : > { %v9870_v25 = vpop.xlane.xlu0 %9869  ;;  %v10494_v50 = vmul.f32 %v14039_v49, %v16440_v41  ;;  %v16610_v15 = vpop.xlane.xlu1 %7230 }
0x1278   : > { %11837 = vrot.lane.b32.xlu0 %v9177_v35, %s16917_s15  ;;  %14052 = vrcp.f32 %v9870_v25 }
0x1279   : > { %v14041_v23 = vpop.eup %14040  ;;  %11863 = vrot.lane.b32.xlu1 %v10494_v50, %s16910_s14 }
0x127a   : > { %v14043_v10 = vpop.eup %14042  ;;  %v10497_v60 = vmul.f32 %v14041_v23, %v16446_v58 }
0x127b   : > { %v8548_v24 = vpop.xlane.xlu0 %8547  ;;  %v9176_v21 = vmul.f32 %v14043_v10, %v16233_v29 }
0x127c   : > { %14054 = vrcp.f32 %v8548_v24  ;;  %11869 = vrot.lane.b32.xlu0 %v10497_v60, %s16910_s14 }
0x127d   : > { %v14045_v16 = vpop.eup %14044  ;;  %11835 = vrot.lane.b32.xlu1 %v9176_v21, %s16917_s15 }
0x127e   : > { %v14047_v8 = vpop.eup %14046  ;;  %v9179_v41 = vmul.f32 %v14045_v16, %v16239_v0  ;;  %v6413_v0 = vld [vmem:[#allocation2 + $0x70] sm:$0xff] }
0x127f   : > { %v9876_v62 = vpop.xlane.xlu0 %9875  ;;  %v10496_v47 = vmul.f32 %v14047_v8, %v16444_v31  ;;  %13707 = vmatprep.subr.mxu0 %v6413_v0 }
0x1280   : > { %14056 = vrcp.f32 %v9876_v62  ;;  %11841 = vrot.lane.b32.xlu0 %v9179_v41, %s16917_s15  ;;  %13708 = vmatpush3.msra.mxu0 %v6413_v0 }
0x1281   : > { %v14049_v11 = vpop.eup %14048  ;;  %11867 = vrot.lane.b32.xlu1 %v10496_v47, %s16910_s14  ;;  %13709 = vmatprep.subr.mxu0 %v6412_v46 }
0x1282   : > { %v14051_v58 = vpop.eup %14050  ;;  %v10499_v29 = vmul.f32 %v14049_v11, %v16450_v1  ;;  %v6411_v1 = vld [vmem:[#allocation2 + $0x60] sm:$0xff]  ;;  %13710 = vmatpush3.msra.mxu0 %v6412_v46 }
0x1283   : > { %v9178_v61 = vmul.f32 %v14051_v58, %v16237_v22  ;;  %13711 = vmatprep.subr.mxu0 %v6411_v1 }
0x1284   : > { %11873 = vrot.lane.b32.xlu0 %v10499_v29, %s16910_s14  ;;  %13712 = vmatpush3.msra.mxu0 %v6411_v1 }
0x1285   : > { %11839 = vrot.lane.b32.xlu1 %v9178_v61, %s16917_s15  ;;  %v14053_v40 = vpop.eup %14052  ;;  %13713 = vmatprep.subr.mxu0 %v6410_v33 }
0x1286   : > { %v10498_v31 = vmul.f32 %v14053_v40, %v16448_v12  ;;  %13714 = vmatpush3.msra.mxu0 %v6410_v33 }
0x1287   : > { %13715 = vmatprep.subr.mxu0 %v6409_v2 }
0x1288   : > { %13716 = vmatpush3.msra.mxu0 %v6409_v2 }
0x1289   : > { %v14055_v59 = vpop.eup %14054  ;;  %11871 = vrot.lane.b32.xlu1 %v10498_v31, %s16910_s14  ;;  %13717 = vmatprep.subr.mxu0 %v6408_v6 }
0x128a   : > { %v9180_v22 = vmul.f32 %v14055_v59, %v16241_v18  ;;  %13718 = vmatpush3.msra.mxu0 %v6408_v6 }
0x128b   : > { %13719 = vmatprep.subr.mxu0 %v6407_v30 }
0x128c   : > { %13720 = vmatpush3.msra.mxu0 %v6407_v30 }
0x128d   : > { %v14057_v48 = vpop.eup %14056  ;;  %11843 = vrot.lane.b32.xlu1 %v9180_v22, %s16917_s15  ;;  %s12709_s15 = sshll.u32 %s14295_s21, 8 }
0x128e   : > { %v10500_v12 = vmul.f32 %v14057_v48, %v16452_v38  ;;  %s16772_s30 = scalar_lea.hbm %s16826_s11, %s12709_s15 }
0x1291   : > { %11875 = vrot.lane.b32.xlu1 %v10500_v12, %s16910_s14 }
0x12b7   : > { %v11175_v18 = vpop.xlane.xlu1 %11174 }
0x12b8   : > { %14058 = vrcp.f32 %v11175_v18 }
0x12bc   : > { %v11178_v37 = vpop.xlane.xlu0 %11177 }
0x12bd   : > { %v11181_v63 = vpop.xlane.xlu1 %11180  ;;  %14060 = vrcp.f32 %v11178_v37 }
0x12be   : > { %14062 = vrcp.f32 %v11181_v63 }
0x12c1   : > { %v11187_v34 = vpop.xlane.xlu1 %11186 }
0x12c2   : > { %v11184_v51 = vpop.xlane.xlu0 %11183 }
0x12c3   : > { %14064 = vrcp.f32 %v11184_v51 }
0x12c4   : > { %14066 = vrcp.f32 %v11187_v34 }
0x12c5   : > { %v11193_v44 = vpop.xlane.xlu1 %11192  ;;  %v14059_v32 = vpop.eup %14058 }
0x12c6   : > { %v11190_v38 = vpop.xlane.xlu0 %11189  ;;  %14068 = vrcp.f32 %v11193_v44 }
0x12c7   : > { %14070 = vrcp.f32 %v11190_v38 }
0x12c9   : > { %v7237_v62 = vpop.xlane.xlu1 %7236 }
0x12ca   : > { %v11196_v27 = vpop.xlane.xlu0 %11195  ;;  %v14061_v39 = vpop.eup %14060 }
0x12cb   : > { %v14063_v56 = vpop.eup %14062  ;;  %14072 = vrcp.f32 %v11196_v27 }
0x12cc   : > { %14074 = vrcp.f32 %v16610_v15 }
0x12cd   : > { %v7243_v11 = vpop.xlane.xlu1 %7242 }
0x12ce   : > { %v7234_v47 = vpop.xlane.xlu0 %7233 }
0x12cf   : > { %14076 = vrcp.f32 %v7234_v47 }
0x12d0   : > { %v14065_v45 = vpop.eup %14064  ;;  %14078 = vrcp.f32 %v7237_v62 }
0x12d1   : > { %v14067_v9 = vpop.eup %14066  ;;  %v7249_v29 = vpop.xlane.xlu1 %7248 }
0x12d2   : > { %v7240_v58 = vpop.xlane.xlu0 %7239 }
0x12d3   : > { %v14069_v49 = vpop.eup %14068  ;;  %14080 = vrcp.f32 %v7240_v58 }
0x12d4   : > { %v14071_v35 = vpop.eup %14070  ;;  %14082 = vrcp.f32 %v7243_v11 }
0x12d5   : > { %14084 = vrcp.f32 %v7249_v29  ;;  %v16923_v29 = vld [vmem:[#allocation14_spill] sm:$0xff] }
0x12d6   : > { %v7246_v61 = vpop.xlane.xlu0 %7245 }
0x12d7   : > { %14086 = vrcp.f32 %v7246_v61 }
0x12d8   : > { %v14073_v21 = vpop.eup %14072 }
0x12d9   : > { %v14075_v63 = vpop.eup %14074 }
0x12da   : > { %v7252_v0 = vpop.xlane.xlu0 %7251  ;;  %v7845_v34 = vmul.f32 %v14075_v63, %v16000_v28 }
0x12db   : > { %14088 = vrcp.f32 %v7252_v0 }
0x12dc   : > { %v14077_v30 = vpop.eup %14076 }
0x12dd   : > { %v14079_v38 = vpop.eup %14078 }
0x12de   : > { %v11832_v31 = vpop.permute.xlu0 %11831 }
0x12e2   : > { %v11834_v59 = vpop.permute.xlu0 %11833 }
0x12e3   : > { %v11830_v13 = vpop.permute.xlu1 %11829 }
0x12e4   : > { %v11917_v15 = vsel %vm732_vm4, %v7845_v34, %v11830_v13 }
0x12e6   : > { %v11866_v22 = vpop.permute.xlu0 %11865 }
0x12e7   : > { %v11862_v40 = vpop.permute.xlu1 %11861 }
0x12e8   : > { %v11925_v44 = vsel %vm6091_vm6, %v11917_v15, %v11862_v40 }
0x12ea   : > { %v11838_v48 = vpop.permute.xlu0 %11837 }
0x12eb   : > { %v11864_v46 = vpop.permute.xlu1 %11863 }
0x12ed   : > { %v11269_v4 = vpop.f32.mrf.mxu0 }
0x12ee   : > { %v11813_v26 = vmul.f32 %v14059_v32, %v11269_v4  ;;  %v11870_v12 = vpop.permute.xlu0 %11869 }
0x12ef   : > { %v13669_v55 = vpop.f32.mrf.mxu0  ;;  %v11836_v1 = vpop.permute.xlu1 %11835 }
0x12f0   : > { %11893 = vrot.lane.b32.xlu0 %v11813_v26, %s16907_s25  ;;  %v7846_v26 = vmul.f32 %v14077_v30, %v16002_v5  ;;  %v7847_v55 = vmul.f32 %v14079_v38, %v16004_v14  ;;  %v16924_v30 = vld [vmem:[#allocation8_spill] sm:$0xff] }
0x12f1   : > { %v11345_v17 = vpop.f32.mrf.mxu1 }
0x12f2   : > { %v11814_v36 = vmul.f32 %v14061_v39, %v11345_v17  ;;  %v11421_v7 = vpop.f32.mrf.mxu0  ;;  %v11842_v37 = vpop.permute.xlu0 %11841  ;;  %v11918_v28 = vsel %vm732_vm4, %v7846_v26, %v11832_v31  ;;  %v16926_v26 = vld [vmem:[#allocation10_spill] sm:$0xff] }
0x12f3   : > { %v11815_v52 = vmul.f32 %v14063_v56, %v11421_v7  ;;  %v13674_v42 = vpop.f32.mrf.mxu1  ;;  %v11868_v33 = vpop.permute.xlu1 %11867  ;;  %v11919_v56 = vsel %vm732_vm4, %v7847_v55, %v11834_v59 }
0x12f4   : > { %v13679_v57 = vpop.f32.mrf.mxu0  ;;  %11895 = vrot.lane.b32.xlu1 %v11814_v36, %s16907_s25  ;;  %v14081_v39 = vpop.eup %14080  ;;  %v11926_v36 = vsel %vm6091_vm6, %v11918_v28, %v11864_v46  ;;  %v16927_v28 = vld [vmem:[#allocation20_spill] sm:$0xff] }
0x12f5   : > { %11897 = vrot.lane.b32.xlu0 %v11815_v52, %s16907_s25  ;;  %v14083_v17 = vpop.eup %14082  ;;  %v11927_v52 = vsel %vm6091_vm6, %v11919_v56, %v11866_v22  ;;  %v16919_v57 = vld [vmem:[#allocation11_spill] sm:$0xff] }
0x12f6   : > { %v11497_v20 = vpop.f32.mrf.mxu1  ;;  %v11874_v6 = vpop.permute.xlu0 %11873 }
0x12f7   : > { %v11816_v3 = vmul.f32 %v14065_v45, %v11497_v20  ;;  %v11573_v19 = vpop.f32.mrf.mxu0  ;;  %v11840_v2 = vpop.permute.xlu1 %11839  ;;  %v7848_v45 = vmul.f32 %v14081_v39, %v16919_v57 }
0x12f8   : > { %v11817_v54 = vmul.f32 %v14067_v9, %v11573_v19  ;;  %v13684_v53 = vpop.f32.mrf.mxu1  ;;  %v14085_v20 = vpop.eup %14084  ;;  %v16920_v9 = vld [vmem:[#allocation13_spill] sm:$0xff] }
0x12f9   : > { %v13689_v43 = vpop.f32.mrf.mxu0  ;;  %11899 = vrot.lane.b32.xlu1 %v11816_v3, %s16907_s25  ;;  %v7849_v3 = vmul.f32 %v14083_v17, %v16920_v9  ;;  %v14087_v19 = vpop.eup %14086 }
0x12fa   : > { %11901 = vrot.lane.b32.xlu0 %v11817_v54, %s16907_s25  ;;  %v11920_v54 = vsel %vm732_vm4, %v7848_v45, %v11836_v1 }
0x12fb   : > { %v11649_v25 = vpop.f32.mrf.mxu1  ;;  %v11725_v50 = vpop.f32.mrf.mxu0  ;;  %v11921_v53 = vsel %vm732_vm4, %v7849_v3, %v11838_v48  ;;  %v11928_v43 = vsel %vm6091_vm6, %v11920_v54, %v11868_v33  ;;  %v16931_v54 = vld [vmem:[#allocation17_spill] sm:$0xff] }
0x12fc   : > { %v11818_v23 = vmul.f32 %v14071_v35, %v11649_v25  ;;  %v11819_v10 = vmul.f32 %v14069_v49, %v11725_v50  ;;  %v11872_v18 = vpop.permute.xlu1 %11871  ;;  %v11929_v35 = vsel %vm6091_vm6, %v11921_v53, %v11870_v12 }
0x12fd   : > { %v13694_v60 = vpop.f32.mrf.mxu1  ;;  %v13699_v24 = vpop.f32.mrf.mxu0 }
0x12fe   : > { %11905 = vrot.lane.b32.xlu0 %v11819_v10, %s16907_s25  ;;  %11903 = vrot.lane.b32.xlu1 %v11818_v23, %s16907_s25  ;;  %v16921_v23 = vld [vmem:[#allocation15_spill] sm:$0xff]  ;;  %v16922_v60 = vld [vmem:[#allocation12_spill] sm:$0xff] }
0x12ff   : > { %v11801_v16 = vpop.f32.mrf.mxu1  ;;  %v7851_v10 = vmul.f32 %v14085_v20, %v16921_v23  ;;  %v7850_v24 = vmul.f32 %v14087_v19, %v16922_v60  ;;  %v16930_v20 = vld [vmem:[#allocation19_spill] sm:$0xff] }
0x1300   : > { %v11820_v8 = vmul.f32 %v14073_v21, %v11801_v16  ;;  %v11844_v51 = vpop.permute.xlu1 %11843  ;;  %v14089_v16 = vpop.eup %14088 }
0x1301   : > { %v13704_v41 = vpop.f32.mrf.mxu1  ;;  %v7852_v61 = vmul.f32 %v14089_v16, %v16923_v29 }
0x1302   : > { %11907 = vrot.lane.b32.xlu1 %v11820_v8, %s16907_s25  ;;  %v11923_v8 = vsel %vm732_vm4, %v7851_v10, %v11842_v37  ;;  %v11922_v41 = vsel %vm732_vm4, %v7850_v24, %v11840_v2  ;;  %s393_s25 = sand.u32 1, %s14188_s18  }
0x1303   : > { %v11931_v62 = vsel %vm6091_vm6, %v11923_v8, %v11874_v6  ;;  %v11930_v47 = vsel %vm6091_vm6, %v11922_v41, %v11872_v18  ;;  %v11924_v40 = vsel %vm732_vm4, %v7852_v61, %v11844_v51  ;;  %v12683_v18 = vld [vmem:[%s16821_s6 + $0x1] ss:$0 sm:$0xff]  ;;  %s12433_s22 = sshll.u32 %s393_s25, 4  ;;  %s16775_s13 = scalar_lea.sflag [#allocation4], %s393_s25 }
0x1304   : > { %v11876_v32 = vpop.permute.xlu1 %11875  ;;  %s395_s14 = scalar_lea.vmem [#allocation5], %s12433_s22  ;;  %s14136_s22 = sshll.u32 %s14211_s24, 4  ;;  %s14137_s22 = int_to_ptr.vmem [resolvable:$false] %s14136_s22 }
0x1305   : > { %v11932_v31 = vsel %vm6091_vm6, %v11924_v40, %v11876_v32  ;;  %s12353_s12 = sshll.u32 %s395_s14, 4  ;;  %s14138_s0 = scalar_lea.vmem %s14137_s22, 512  ;;  %s16766_s12 = int_to_ptr.vmem [resolvable:$true] %s12353_s12 }
0x1306   : > { %s14132_s21 = scalar_lea.vmem %s16766_s12, 256  ;;  %p14139_p11 = scmp.lt.s32.totalorder %s16766_s12, %s14137_s22 }
0x1307   : > { %p14133_p6 = scmp.ne.s32.totalorder %s16766_s12, %s14132_s21  ;;  %p14140_p12 = scmp.lt.s32.totalorder %s14138_s0, %s14132_s21 }
0x1309   : > { %p14134_p9 = pnand %p14133_p6, %p14312_p5  ;;  %p14141_p13 = por %p14140_p12, %p14139_p11 }
0x130b   : > { %p14135_p10 = pneg %p14134_p9 }
0x130d   : > { %p14142_p0 = pnand %p14141_p13, %p14135_p10 }
0x1362   : > { %v11894_v4 = vpop.permute.xlu0 %11893 }
0x1363   : > { %v11933_v27 = vsel %vm6100_vm7, %v11925_v44, %v11894_v4  ;;  %v16925_v44 = vld [vmem:[#allocation9_spill] sm:$0xff] }
0x1364   : > { %13721 = vmatprep.mubr.msk.f32.mxu0 %vm591_vm2, %v11933_v27 }
0x1366   : > { %v11896_v7 = vpop.permute.xlu1 %11895 }
0x1367   : > { %v11934_v42 = vsel %vm6100_vm7, %v11926_v36, %v11896_v7  ;;  %v11898_v5 = vpop.permute.xlu0 %11897  ;;  %v16928_v7 = vld [vmem:[#allocation21_spill] sm:$0xff] }
0x1368   : > { %v11935_v14 = vsel %vm6100_vm7, %v11927_v52, %v11898_v5  ;;  %13722 = vmatmul.mubr.msk.f32.vlgmr.msra.gmra.mxu0 %vm591_vm2, %v11934_v42  ;;  %v16929_v5 = vld [vmem:[#allocation18_spill] sm:$0xff] }
0x1369   : > { %13724 = vmatprep.mubr.msk.f32.mxu0 %vm591_vm2, %v11935_v14 }
0x136b   : > { %v11900_v49 = vpop.permute.xlu1 %11899 }
0x136c   : > { %v11936_v25 = vsel %vm6100_vm7, %v11928_v43, %v11900_v49  ;;  %v11902_v50 = vpop.permute.xlu0 %11901 }
0x136d   : > { %v11937_v21 = vsel %vm6100_vm7, %v11929_v35, %v11902_v50  ;;  %13725 = vmatmul.mubr.msk.f32.gmra.mxu0 %vm591_vm2, %v11936_v25 }
0x136e   : > { %13727 = vmatprep.mubr.msk.f32.mxu0 %vm591_vm2, %v11937_v21 }
0x1370   : > { %v11904_v11 = vpop.permute.xlu1 %11903  ;;  %v11906_v58 = vpop.permute.xlu0 %11905 }
0x1371   : > { %v11938_v13 = vsel %vm6100_vm7, %v11930_v47, %v11904_v11  ;;  %v11939_v0 = vsel %vm6100_vm7, %v11931_v62, %v11906_v58 }
0x1372   : > { %13728 = vmatmul.mubr.msk.f32.gmra.mxu0 %vm591_vm2, %v11938_v13 }
0x1373   : > { %13730 = vmatprep.mubr.msk.f32.mxu0 %vm591_vm2, %v11939_v0 }
0x1374   : > { %v11908_v46 = vpop.permute.xlu1 %11907 }
0x1375   : > { %v11940_v59 = vsel %vm6100_vm7, %v11932_v31, %v11908_v46 }
0x1376   : > { %13731 = vmatmul.mubr.msk.f32.gmra.mxu0 %vm591_vm2, %v11940_v59 }
0x1428   : > { %v13723_v1 = vpop.f32.mrf.mxu0 }
0x1429   : > { %v12043_v39 = vadd.f32 %v13723_v1, %v12683_v18 }
0x142a   : > { %v12037_v22 = vpop.f32.mrf.mxu0 }
0x142b   : > { %v12077_v57 = vadd.f32 %v12043_v39, %v16929_v5  ;;  %v12038_v14 = vadd.f32 %v12683_v18, %v12037_v22 }
0x142d   : > { %v13726_v33 = vpop.f32.mrf.mxu0  ;;  %v12087_v19 = vsel %vm591_vm2, %v12077_v57, 0.0  ;;  %v12076_v53 = vadd.f32 %v12038_v14, %v16931_v54 }
0x142e   : > { %v12053_v34 = vadd.f32 %v13726_v33, %v12683_v18 }
0x142f   : > { %v12047_v48 = vpop.f32.mrf.mxu0  ;;  %v12084_v49 = vsel %vm591_vm2, %v12076_v53, 0.0 }
0x1430   : > { %v12079_v17 = vadd.f32 %v12053_v34, %v16927_v28  ;;  %v12048_v36 = vadd.f32 %v12683_v18, %v12047_v48 }
0x1432   : > { %v13729_v2 = vpop.f32.mrf.mxu0  ;;  %v12093_v45 = vsel %vm591_vm2, %v12079_v17, 0.0  ;;  %v12078_v9 = vadd.f32 %v12048_v36, %v16930_v20 }
0x1433   : > { %v12063_v63 = vadd.f32 %v13729_v2, %v12683_v18 }
0x1434   : > { %v12057_v12 = vpop.f32.mrf.mxu0  ;;  %v12090_v43 = vsel %vm591_vm2, %v12078_v9, 0.0 }
0x1435   : > { %v12081_v32 = vadd.f32 %v12063_v63, %v16925_v44  ;;  %v12058_v4 = vadd.f32 %v12683_v18, %v12057_v12 }
0x1436   : > { %v13732_v37 = vpop.f32.mrf.mxu0 }
0x1437   : > { %v12073_v51 = vadd.f32 %v13732_v37, %v12683_v18  ;;  %v12080_v52 = vadd.f32 %v12058_v4, %v16928_v7  ;;  %v12099_v42 = vsel %vm591_vm2, %v12081_v32, 0.0  ;;  %v12218_v4 = vld [vmem:[%s16824_s9] sm:$0xff] }
0x1438   : > { %v12067_v6 = vpop.f32.mrf.mxu0  ;;  %13749 = vmatprep.mubr.msk.f32.mxu1 %vm591_vm2, %v12218_v4 }
0x1439   : > { %v12083_v38 = vadd.f32 %v12073_v51, %v16924_v30  ;;  %v12068_v15 = vadd.f32 %v12683_v18, %v12067_v6  ;;  %v12096_v3 = vsel %vm591_vm2, %v12080_v52, 0.0 }
0x143b   : > { %v12082_v27 = vadd.f32 %v12068_v15, %v16926_v26  ;;  %v12105_v55 = vsel %vm591_vm2, %v12083_v38, 0.0  ;;  %v12221_v26 = vld [vmem:[%s16825_s10 + $0x8] sm:$0xff] }
0x143c   : > { %12106 = vadd.xlane.f32.xlu0 %v12105_v55  ;;  %v14210_v55 = vmov 0  }
0x143d   : > { %v12102_v56 = vsel %vm591_vm2, %v12082_v27, 0.0  ;;  %13817 = vset.pattern.permute.xlu0 %v14210_v55  ;;  %13816 = vset.pattern.permute.xlu1 %v14210_v55 }
0x143e   : > { %12103 = vadd.xlane.f32.xlu1 %v12102_v56 }
0x1440   : > { %12100 = vadd.xlane.f32.xlu0 %v12099_v42 }
0x1442   : > { %12094 = vadd.xlane.f32.xlu1 %v12093_v45 }
0x1444   : > { %12097 = vadd.xlane.f32.xlu0 %v12096_v3 }
0x1446   : > { %12088 = vadd.xlane.f32.xlu1 %v12087_v19 }
0x1448   : > { %12091 = vadd.xlane.f32.xlu0 %v12090_v43 }
0x144c   : > { %12085 = vadd.xlane.f32.xlu0 %v12084_v49 }
0x14c5   : > { %v12107_v35 = vpop.xlane.xlu0 %12106 }
0x14c6   : > { %v12115_v25 = vmul.f32 0.015625, %v12107_v35 }
0x14c7   : > { %v12104_v50 = vpop.xlane.xlu1 %12103 }
0x14c8   : > { %v16680_v23 = vsub.f32 %v12083_v38, %v12115_v25  ;;  %v12114_v10 = vmul.f32 0.015625, %v12104_v50 }
0x14c9   : > { %v12101_v60 = vpop.xlane.xlu0 %12100 }
0x14ca   : > { %v16682_v24 = vsub.f32 %v12082_v27, %v12114_v10  ;;  %v12113_v21 = vmul.f32 0.015625, %v12101_v60  ;;  %v12131_v16 = vmul.f32 %v16680_v23, %v16680_v23  ;;  %v12220_v27 = vld [vmem:[%s16825_s10] sm:$0xff] }
0x14cb   : > { %v12095_v8 = vpop.xlane.xlu1 %12094  ;;  %v12692_v60 = vld [vmem:[%s16822_s7] ss:$0 sm:$0xff] }
0x14cc   : > { %v16686_v41 = vsub.f32 %v12081_v32, %v12113_v21  ;;  %v12111_v62 = vmul.f32 0.015625, %v12095_v8  ;;  %v12153_v47 = vsel %vm591_vm2, %v12131_v16, 0.0  ;;  %v12130_v11 = vmul.f32 %v16682_v24, %v16682_v24  ;;  %v12693_v8 = vld [vmem:[%s16823_s8] ss:$0 sm:$0xff] }
0x14cd   : > { %v12098_v58 = vpop.xlane.xlu0 %12097  ;;  %12154 = vadd.xlane.f32.xlu1 %v12153_v47 }
0x14ce   : > { %v16691_v29 = vsub.f32 %v12079_v17, %v12111_v62  ;;  %v12112_v61 = vmul.f32 0.015625, %v12098_v58  ;;  %v12150_v13 = vsel %vm591_vm2, %v12130_v11, 0.0  ;;  %v12129_v0 = vmul.f32 %v16686_v41, %v16686_v41 }
0x14cf   : > { %12151 = vadd.xlane.f32.xlu0 %v12150_v13  ;;  %v12089_v40 = vpop.xlane.xlu1 %12088 }
0x14d0   : > { %v16696_v31 = vsub.f32 %v12080_v52, %v12112_v61  ;;  %v12109_v46 = vmul.f32 0.015625, %v12089_v40  ;;  %v12147_v59 = vsel %vm591_vm2, %v12129_v0, 0.0  ;;  %v12127_v1 = vmul.f32 %v16691_v29, %v16691_v29 }
0x14d1   : > { %v12092_v22 = vpop.xlane.xlu0 %12091  ;;  %12148 = vadd.xlane.f32.xlu1 %v12147_v59 }
0x14d2   : > { %v16701_v33 = vsub.f32 %v12077_v57, %v12109_v46  ;;  %v12110_v48 = vmul.f32 0.015625, %v12092_v22  ;;  %v12128_v2 = vmul.f32 %v16696_v31, %v16696_v31  ;;  %v12141_v37 = vsel %vm591_vm2, %v12127_v1, 0.0 }
0x14d4   : > { %v16705_v12 = vsub.f32 %v12078_v9, %v12110_v48  ;;  %v12144_v18 = vsel %vm591_vm2, %v12128_v2, 0.0  ;;  %v12125_v63 = vmul.f32 %v16701_v33, %v16701_v33 }
0x14d5   : > { %v12086_v51 = vpop.xlane.xlu0 %12085  ;;  %12145 = vadd.xlane.f32.xlu0 %v12144_v18  ;;  %12142 = vadd.xlane.f32.xlu1 %v12141_v37 }
0x14d6   : > { %v12108_v6 = vmul.f32 0.015625, %v12086_v51  ;;  %v12126_v34 = vmul.f32 %v16705_v12, %v16705_v12  ;;  %v12135_v15 = vsel %vm591_vm2, %v12125_v63, 0.0 }
0x14d8   : > { %v16713_v30 = vsub.f32 %v12076_v53, %v12108_v6  ;;  %v12138_v38 = vsel %vm591_vm2, %v12126_v34, 0.0 }
0x14d9   : > { %12139 = vadd.xlane.f32.xlu0 %v12138_v38  ;;  %12136 = vadd.xlane.f32.xlu1 %v12135_v15 }
0x14da   : > { %v12124_v44 = vmul.f32 %v16713_v30, %v16713_v30 }
0x14dc   : > { %v12132_v32 = vsel %vm591_vm2, %v12124_v44, 0.0 }
0x14dd   : > { %12133 = vadd.xlane.f32.xlu0 %v12132_v32 }
0x14ea   : > { %12224 = vperm.xlu1 %13816, %v12220_v27  }
0x14f3   : > { %12229 = vperm.xlu0 %13817, %v12221_v26  }
0x1556   : > { %v12155_v39 = vpop.xlane.xlu1 %12154 }
0x1557   : > { %v12163_v28 = vmul.f32 0.015625, %v12155_v39 }
0x1558   : > { %v12152_v17 = vpop.xlane.xlu0 %12151 }
0x1559   : > { %v12171_v56 = vadd.f32 1e-05, %v12163_v28  ;;  %v12162_v36 = vmul.f32 0.015625, %v12152_v17 }
0x155a   : > { %v12149_v7 = vpop.xlane.xlu1 %12148 }
0x155b   : > { %14090 = vrsqrt.f32 %v12171_v56  ;;  %v12170_v52 = vadd.f32 1e-05, %v12162_v36  ;;  %v12161_v42 = vmul.f32 0.015625, %v12149_v7 }
0x155d   : > { %14092 = vrsqrt.f32 %v12170_v52  ;;  %v12169_v5 = vadd.f32 1e-05, %v12161_v42 }
0x155e   : > { %v12146_v57 = vpop.xlane.xlu0 %12145  ;;  %v12143_v45 = vpop.xlane.xlu1 %12142 }
0x155f   : > { %14094 = vrsqrt.f32 %v12169_v5  ;;  %v12160_v14 = vmul.f32 0.015625, %v12146_v57  ;;  %v12159_v20 = vmul.f32 0.015625, %v12143_v45 }
0x1561   : > { %v12168_v9 = vadd.f32 1e-05, %v12160_v14  ;;  %v12167_v3 = vadd.f32 1e-05, %v12159_v20 }
0x1562   : > { %v12140_v19 = vpop.xlane.xlu0 %12139  ;;  %v12137_v54 = vpop.xlane.xlu1 %12136 }
0x1563   : > { %14096 = vrsqrt.f32 %v12168_v9  ;;  %v12158_v53 = vmul.f32 0.015625, %v12140_v19  ;;  %v12157_v43 = vmul.f32 0.015625, %v12137_v54 }
0x1564   : > { %14098 = vrsqrt.f32 %v12167_v3 }
0x1565   : > { %v12166_v49 = vadd.f32 1e-05, %v12158_v53  ;;  %v12165_v25 = vadd.f32 1e-05, %v12157_v43 }
0x1566   : > { %v12134_v35 = vpop.xlane.xlu0 %12133  ;;  %v12225_v26 = vpop.permute.xlu1 %12224 }
0x1567   : > { %14100 = vrsqrt.f32 %v12166_v49  ;;  %v12156_v50 = vmul.f32 0.015625, %v12134_v35 }
0x1568   : > { %v14091_v10 = vpop.eup %14090  ;;  %14102 = vrsqrt.f32 %v12165_v25 }
0x1569   : > { %v12187_v21 = vmul.f32 %v14091_v10, %v16680_v23  ;;  %v12164_v62 = vadd.f32 1e-05, %v12156_v50 }
0x156a   : > { %v14093_v16 = vpop.eup %14092 }
0x156b   : > { %v12202_v47 = vmul.f32 %v12692_v60, %v12187_v21  ;;  %v12186_v11 = vmul.f32 %v14093_v16, %v16682_v24  ;;  %14104 = vrsqrt.f32 %v12164_v62 }
0x156c   : > { %v14095_v58 = vpop.eup %14094 }
0x156d   : > { %v12217_v61 = vadd.f32 %v12693_v8, %v12202_v47  ;;  %v12201_v13 = vmul.f32 %v12692_v60, %v12186_v11  ;;  %v12185_v0 = vmul.f32 %v14095_v58, %v16686_v41 }
0x156e   : > { %v12230_v32 = vpop.permute.xlu0 %12229 }
0x156f   : > { %13733 = vmatprep.subr.msk.mxu1 %vm591_vm2, %v12217_v61  ;;  %v12216_v40 = vadd.f32 %v12693_v8, %v12201_v13  ;;  %v12200_v23 = vmul.f32 %v12692_v60, %v12185_v0 }
0x1570   : > { %v14097_v46 = vpop.eup %14096  ;;  %13734 = vmatpush3.xpose.msk.msra.mxu1 %vm591_vm2, %v12217_v61 }
0x1571   : > { %v14099_v59 = vpop.eup %14098  ;;  %13735 = vmatprep.subr.msk.mxu1 %vm591_vm2, %v12216_v40  ;;  %v12184_v1 = vmul.f32 %v14097_v46, %v16696_v31  ;;  %v12215_v22 = vadd.f32 %v12693_v8, %v12200_v23 }
0x1572   : > { %v12183_v48 = vmul.f32 %v14099_v59, %v16691_v29 }
0x1573   : > { %v12199_v24 = vmul.f32 %v12692_v60, %v12184_v1 }
0x1574   : > { %v14101_v2 = vpop.eup %14100  ;;  %13736 = vmatpush3.xpose.msk.msra.mxu1 %vm591_vm2, %v12216_v40  ;;  %v12198_v18 = vmul.f32 %v12692_v60, %v12183_v48 }
0x1575   : > { %13737 = vmatprep.subr.msk.mxu1 %vm591_vm2, %v12215_v22  ;;  %v12214_v41 = vadd.f32 %v12693_v8, %v12199_v24  ;;  %v12182_v37 = vmul.f32 %v14101_v2, %v16705_v12  ;;  %v14103_v63 = vpop.eup %14102 }
0x1576   : > { %v12213_v51 = vadd.f32 %v12693_v8, %v12198_v18  ;;  %v12181_v6 = vmul.f32 %v14103_v63, %v16701_v33 }
0x1577   : > { %v12197_v31 = vmul.f32 %v12692_v60, %v12182_v37 }
0x1578   : > { %13738 = vmatpush3.xpose.msk.msra.mxu1 %vm591_vm2, %v12215_v22  ;;  %v14105_v34 = vpop.eup %14104  ;;  %v12196_v38 = vmul.f32 %v12692_v60, %v12181_v6 }
0x1579   : > { %13739 = vmatprep.subr.msk.mxu1 %vm591_vm2, %v12214_v41  ;;  %v12212_v29 = vadd.f32 %v12693_v8, %v12197_v31  ;;  %v12180_v15 = vmul.f32 %v14105_v34, %v16713_v30  ;;  %v12219_v30 = vld [vmem:[%s16824_s9 + $0x8] sm:$0xff] }
0x157a   : > { %v12211_v12 = vadd.f32 %v12693_v8, %v12196_v38 }
0x157b   : > { %v12195_v44 = vmul.f32 %v12692_v60, %v12180_v15 }
0x157c   : > { %13740 = vmatpush3.xpose.msk.msra.mxu1 %vm591_vm2, %v12214_v41 }
0x157d   : > { %13741 = vmatprep.subr.msk.mxu1 %vm591_vm2, %v12213_v51  ;;  %v12210_v33 = vadd.f32 %v12693_v8, %v12195_v44 }
0x1580   : > { %13742 = vmatpush3.xpose.msk.msra.mxu1 %vm591_vm2, %v12213_v51 }
0x1581   : > { %13743 = vmatprep.subr.msk.mxu1 %vm591_vm2, %v12212_v29 }
0x1584   : > { %13744 = vmatpush3.xpose.msk.msra.mxu1 %vm591_vm2, %v12212_v29 }
0x1585   : > { %13745 = vmatprep.subr.msk.mxu1 %vm591_vm2, %v12211_v12 }
0x1588   : > { %13746 = vmatpush3.xpose.msk.msra.mxu1 %vm591_vm2, %v12211_v12 }
0x1589   : > { %13747 = vmatprep.subr.msk.mxu1 %vm591_vm2, %v12210_v33 }
0x158c   : > { %13748 = vmatpush3.xpose.msk.msra.mxu1 %vm591_vm2, %v12210_v33 }
0x158f   : > { %13750 = vmatmul.mubr.msk.f32.vlgmr.msra.gmra.mxu1 %vm591_vm2, %v12219_v30 }
0x164f   : > { %v13751_v4 = vpop.f32.mrf.mxu1 }
0x1650   : > { %v12334_v27 = vadd.f32 %v13751_v4, %v12230_v32 }
0x1651   : > { %v12328_v55 = vpop.f32.mrf.mxu1 }
0x1652   : > { %12338 = vst.msk [vmem:[%s395_s14 + $0x8] sm:$0xff] %vm591_vm2, %v12334_v27  ;;  %v12329_v39 = vadd.f32 %v12328_v55, %v12225_v26 }
0x1654   : > { %12337 = vst.msk [vmem:[%s395_s14] sm:$0xff] %vm591_vm2, %v12329_v39 }
0x1655   : > { %14145 = shalt.err (!%p14142_p0)
}
0x1656   : > { %s14146_s25 = scalar_lea.hbm %s16772_s30, 256  ;;  %s14150_s16 = scalar_lea.hbm %s16826_s11, 1024 }
0x1657   : > { %p14147_p1 = scmp.ne.s32.totalorder %s16772_s30, %s14146_s25  ;;  %p14151_p4 = scmp.lt.s32.totalorder %s16772_s30, %s16826_s11 }
0x1658   : > { %p14152_p7 = scmp.lt.s32.totalorder %s14150_s16, %s14146_s25 }
0x1659   : > { %p14148_p2 = pnand %p14147_p1, %p14312_p5 }
0x165a   : > { %p14153_p8 = por %p14152_p7, %p14151_p4 }
0x165b   : > { %p14149_p3 = pneg %p14148_p2 }
0x165d   : > { %p14154_p6 = pnand %p14153_p8, %p14149_p3 }
0x165f   : > { %14157 = shalt.err (!%p14154_p6)
}
0x1660   : > { %s14212_s0 = smov 128   ;;  %s14213_s21 = smov 8  }
0x1661   : > { %13756 = dma.vmem_to_hbm [thread:$0]  (%p14312_p5), %s16766_s12, 256, %s16772_s30, %s16775_s13, %s14212_s0, %s14212_s0, %s14213_s21  }
0x1662 PF: > { %p13768_p9 = scmp.ge.s32.totalorder %s14196_s20, 2  ;;  %s12368_s22 = sand.u32 1, %s14184_s17  }
0x1663   : > { %p16932_p10 = scmp.ne.s32.totalorder %s16865_s28, 0  ;;  %s12369_s25 = scalar_lea.sflag [#allocation4], %s12368_s22 }
0x1665   : > { %p13763_p11 = pnand %p13768_p9, %p16932_p10 }
0x1667   : > { %p13764_p12 = pneg %p13763_p11 }
0x1669   : > { %14179 = dma.done.wait (%p13764_p12), %s12369_s25, 256  }
0x166a   : > { %14181 = vsyncadd (%p13764_p12), %s12369_s25, 4294967040  ;;  %p22_p13 = scmp.ge.s32.totalorder %s14299_s23, 6   ;;  %s16933_s17 = smov %s14188_s18 }
0x166b   : > { %s16934_s18 = smov %s14192_s19  ;;  %s16935_s19 = smov %s14310_s26 }
0x166c   : > { %s16936_s20 = smov %s14299_s23  ;;  %24 = sbr.rel (!%p22_p13) target bundleno = 6 (0x6), region = 108 }
0x1671   :  { %12374 = vsyncpa [#allocation3], 1 }
0x1672   :  { %12376 = vsyncpa [#allocation3 + $0x1], 1 }
0x1673   :  { %12377 = vsyncpa [#allocation4], 1 }
0x1674   :  { %12379 = vsyncpa [#allocation4 + $0x1], 1 }

</bundles_post_ra>
